<compile_context>
chip_gen: v7x
topology: tpu7x:2x2x1
jax: 0.10.0
libtpu: 0.0.40
codegen_flags: <defaults>
</compile_context>

<pallas_src>
import functools

import jax
import jax.numpy as jnp
from jax.experimental import pallas as pl
from jax.experimental.pallas import tpu as pltpu


def _layernorm(v, g, b, eps=1e-5):
    # LayerNorm subclass casts to fp32 before the norm; we already compute in fp32.
    mu = jnp.mean(v, axis=-1, keepdims=True)
    var = jnp.mean(jnp.square(v - mu), axis=-1, keepdims=True)
    return (v - mu) * jax.lax.rsqrt(var + eps) * g + b


def resblock_kernel(x_ref,
                    ln1g_ref, ln1b_ref,
                    wqkv_ref, bqkv_ref,
                    wo3_ref, bo_ref,
                    ln2g_ref, ln2b_ref,
                    wfc_ref, bfc_ref,
                    wpj_ref, bpj_ref,
                    o_ref, *, n_head):
    BB, L, D = x_ref.shape                    # block of BB examples
    H = n_head
    Dh = D // H
    R = BB * L
    scale = 1.0 / float(Dh) ** 0.5

    # f32 activations for norm/softmax; bf16 operands for every matmul with
    # f32 accumulation via preferred_element_type.
    x = x_ref[...].astype(jnp.float32).reshape(R, D)

    # ---- attention branch:  x + out_proj(MHA(ln_1(x))) ----
    h = _layernorm(x, ln1g_ref[...], ln1b_ref[...])
    qkv = jnp.dot(h.astype(jnp.bfloat16), wqkv_ref[...],
                  preferred_element_type=jnp.float32) + bqkv_ref[...]   # (R, 3D)
    q = qkv[:, 0 * D:1 * D] * scale
    k = qkv[:, 1 * D:2 * D]
    v = qkv[:, 2 * D:3 * D]

    # Head-major stacks (H, R, Dh): static lane slices stacked on a new
    # leading axis, so all per-head matmuls become one batched einsum
    # (no unrolled per-head matmul/softmax code, no lane-axis concat).
    def split_heads(t):
        return jnp.stack([t[:, hh * Dh:(hh + 1) * Dh] for hh in range(H)],
                         axis=0)

    qh = split_heads(q).astype(jnp.bfloat16)          # (H, R, Dh)
    kh = split_heads(k).astype(jnp.bfloat16)
    vh = split_heads(v).astype(jnp.bfloat16)
    wo3 = wo3_ref[...]                                # (H, Dh, D) bf16

    # TODO(synk): attn_mask is None in the reference default; an additive mask
    # would simply be added to `s` below.
    attn_rows = []
    for b in range(BB):                               # small static loop over examples
        sl = slice(b * L, (b + 1) * L)
        qb, kb, vb = qh[:, sl, :], kh[:, sl, :], vh[:, sl, :]
        s = jnp.einsum('hqd,hkd->hqk', qb, kb,
                       preferred_element_type=jnp.float32)        # (H, L, L) f32
        s = s - jnp.max(s, axis=-1, keepdims=True)
        p = jnp.exp(s)
        p = p * pl.reciprocal(jnp.sum(p, axis=-1, keepdims=True), approx=True)
        ctx = jnp.einsum('hqk,hkd->hqd', p.astype(jnp.bfloat16), vb,
                         preferred_element_type=jnp.float32)      # (H, L, Dh)
        # Fused "concat heads + out_proj": sum_h ctx_h @ Wo_h.
        ob = jnp.einsum('hqd,hde->hqe', ctx.astype(jnp.bfloat16), wo3,
                        preferred_element_type=jnp.float32)       # (H, L, D)
        attn_rows.append(jnp.sum(ob, axis=0))                     # (L, D)
    attn = attn_rows[0] if BB == 1 else jnp.concatenate(attn_rows, axis=0)
    x = x + attn + bo_ref[...]

    # ---- MLP branch:  x + c_proj(QuickGELU(c_fc(ln_2(x)))) ----
    h2 = _layernorm(x, ln2g_ref[...], ln2b_ref[...])
    fc = jnp.dot(h2.astype(jnp.bfloat16), wfc_ref[...],
                 preferred_element_type=jnp.float32) + bfc_ref[...]
    fc = fc * jax.nn.sigmoid(1.702 * fc)              # QuickGELU (f32, EUP)
    proj = jnp.dot(fc.astype(jnp.bfloat16), wpj_ref[...],
                   preferred_element_type=jnp.float32) + bpj_ref[...]
    x = x + proj

    o_ref[...] = x.reshape(BB, L, D).astype(o_ref.dtype)


# Whether single-buffered weight BlockSpecs (pl.Buffered(1)) are supported on
# this JAX/Mosaic build.  Resolved once at runtime, cached afterwards.
_WEIGHT_SINGLE_BUFFER = None


def _pick_block_b(B, L, target_rows=256):
    """Largest divisor of B with block_b*L <= target_rows (MXU row fill)."""
    bb = 1
    for cand in range(1, B + 1):
        if B % cand == 0 and cand * L <= max(target_rows, L):
            bb = cand
    return bb


def _build_call(B, L, D, n_head, block_b, x_dtype, single_buffer_weights):
    H = n_head
    Dh = D // H

    def io_spec():
        return pl.BlockSpec((block_b, L, D), lambda g: (g, 0, 0))

    def w_spec(shape):
        idx = (lambda n: (lambda g: (0,) * n))(len(shape))
        if single_buffer_weights:
            # Weights are grid-invariant: one VMEM copy instead of the default
            # double buffer (halves resident weight VMEM).
            return pl.BlockSpec(shape, idx, pipeline_mode=pl.Buffered(1))
        return pl.BlockSpec(shape, idx)

    in_specs = [
        io_spec(),                                   # x
        w_spec((1, D)), w_spec((1, D)),              # ln_1 gamma, beta
        w_spec((D, 3 * D)), w_spec((1, 3 * D)),      # in_proj W^T, b
        w_spec((H, Dh, D)), w_spec((1, D)),          # out_proj W^T (head-split), b
        w_spec((1, D)), w_spec((1, D)),              # ln_2 gamma, beta
        w_spec((D, 4 * D)), w_spec((1, 4 * D)),      # c_fc W^T, b
        w_spec((4 * D, D)), w_spec((1, D)),          # c_proj W^T, b
    ]

    # Advisory cost estimate for XLA scheduling (whole call).
    R = B * L
    flops = 2 * R * D * (3 * D)            # QKV projection
    flops += 4 * B * H * L * L * Dh        # scores + ctx
    flops += 2 * R * D * D                 # out_proj (fused)
    flops += 2 * R * D * (4 * D) * 2       # MLP
    transcendentals = B * H * L * L + R * 4 * D
    bytes_accessed = 2 * R * D * 4 + 2 * (12 * D * D) + 4 * (12 * D)
    cost = pl.CostEstimate(flops=int(flops),
                           transcendentals=int(transcendentals),
                           bytes_accessed=int(bytes_accessed))

    return pl.pallas_call(
        functools.partial(resblock_kernel, n_head=n_head),
        out_shape=jax.ShapeDtypeStruct((B, L, D), x_dtype),
        grid=(B // block_b,),
        in_specs=in_specs,
        out_specs=io_spec(),
        compiler_params=pltpu.CompilerParams(
            dimension_semantics=("parallel",),
            vmem_limit_bytes=64 * 1024 * 1024),   # safe on v5e/v6e/v7x
        cost_estimate=cost,
    )


def residual_attention_block(x, layer_params, n_head, block_b=None):
    """x: (B, L, D) float32. Runs one fused ResidualAttentionBlock."""
    global _WEIGHT_SINGLE_BUFFER
    B, L, D = x.shape
    assert D % n_head == 0, "d_model must be divisible by n_head"
    if block_b is None:
        block_b = _pick_block_b(B, L)
    assert B % block_b == 0

    modes = ((True, False) if _WEIGHT_SINGLE_BUFFER is None
             else (_WEIGHT_SINGLE_BUFFER,))
    err = None
    for mode in modes:
        try:
            call = _build_call(B, L, D, n_head, block_b, x.dtype, mode)
            out = call(x, *layer_params)
            if _WEIGHT_SINGLE_BUFFER is None:
                jax.block_until_ready(out)          # surface compile errors now
                _WEIGHT_SINGLE_BUFFER = mode
            return out
        except Exception as e:                      # fallback: double-buffered weights
            err = e
    raise err


def init_params(key, width, layers, n_head):
    """Deterministic synthetic parameters.

    Weight matrices are stored pre-transposed as (in, out) in bf16 (MXU
    operands); biases / LayerNorm params stay f32.  The out_proj weight is
    stored head-split as (n_head, head_dim, width) so the kernel fuses the
    head-concat with the output projection.
    """
    params = []
    scale = 0.02
    dh = width // n_head
    for _ in range(layers):
        key, k1, k2, k3, k4 = jax.random.split(key, 5)
        ln1g = jnp.ones((1, width), jnp.float32)
        ln1b = jnp.zeros((1, width), jnp.float32)
        wqkv = (scale * jax.random.normal(k1, (width, 3 * width),
                                          jnp.float32)).astype(jnp.bfloat16)
        bqkv = jnp.zeros((1, 3 * width), jnp.float32)
        wo = (scale * jax.random.normal(k2, (width, width),
                                        jnp.float32)).astype(jnp.bfloat16)
        wo3 = wo.reshape(n_head, dh, width)
        bo = jnp.zeros((1, width), jnp.float32)
        ln2g = jnp.ones((1, width), jnp.float32)
        ln2b = jnp.zeros((1, width), jnp.float32)
        wfc = (scale * jax.random.normal(k3, (width, 4 * width),
                                         jnp.float32)).astype(jnp.bfloat16)
        bfc = jnp.zeros((1, 4 * width), jnp.float32)
        wpj = (scale * jax.random.normal(k4, (4 * width, width),
                                         jnp.float32)).astype(jnp.bfloat16)
        bpj = jnp.zeros((1, width), jnp.float32)
        params.append((ln1g, ln1b, wqkv, bqkv, wo3, bo,
                       ln2g, ln2b, wfc, bfc, wpj, bpj))
    return params


def transformer_forward(x_lnd, params, n_head):
    """x_lnd: (L, N, D) like the PyTorch module. Returns (L, N, D)."""
    x = jnp.transpose(x_lnd, (1, 0, 2))       # (N, L, D) for the kernel
    for layer_params in params:
        x = residual_attention_block(x, layer_params, n_head)
    return jnp.transpose(x, (1, 0, 2))


if __name__ == "__main__":
    # Small shapes consistent with the module: width=32, heads=4, layers=2,
    # seq=8, batch=2.  Input layout (L, N, E) as expected by nn.MultiheadAttention.
    width, layers, heads = 32, 2, 4
    seq, batch = 8, 2

    key = jax.random.PRNGKey(0)
    key, xkey = jax.random.split(key)
    x = jax.random.normal(xkey, (seq, batch, width), jnp.float32)

    params = init_params(key, width, layers, heads)

    out = transformer_forward(x, params, heads)
    out = jax.block_until_ready(out)
    assert out.shape == (seq, batch, width)
    assert bool(jnp.all(jnp.isfinite(out)))
    print("KERNEL_OK")
</pallas_src>

<mosaic_0001>
module attributes {stable_mosaic.version = 11 : i64} {
  func.func @resblock_kernel(%arg0: i32, %arg1: memref<2x8x32xf32, #tpu.memory_space<vmem>>, %arg2: memref<1x32xf32, #tpu.memory_space<vmem>>, %arg3: memref<1x32xf32, #tpu.memory_space<vmem>>, %arg4: memref<32x96xbf16, #tpu.memory_space<vmem>>, %arg5: memref<1x96xf32, #tpu.memory_space<vmem>>, %arg6: memref<4x8x32xbf16, #tpu.memory_space<vmem>>, %arg7: memref<1x32xf32, #tpu.memory_space<vmem>>, %arg8: memref<1x32xf32, #tpu.memory_space<vmem>>, %arg9: memref<1x32xf32, #tpu.memory_space<vmem>>, %arg10: memref<32x128xbf16, #tpu.memory_space<vmem>>, %arg11: memref<1x128xf32, #tpu.memory_space<vmem>>, %arg12: memref<128x32xbf16, #tpu.memory_space<vmem>>, %arg13: memref<1x32xf32, #tpu.memory_space<vmem>>, %arg14: memref<2x8x32xf32, #tpu.memory_space<vmem>>) attributes {dimension_semantics = [#tpu.dimension_semantics<parallel>], iteration_bounds = array<i64: 1>, scalar_prefetch = 0 : i64, scratch_operands = 0 : i64, tpu.core_type = #tpu.core_type<tc>, window_params = [{transform_indices = @transform_0, window_bounds = array<i64: 2, 8, 32>}, {pipeline_mode = #tpu.pipeline_mode<synchronous>, transform_indices = @transform_1, window_bounds = array<i64: 1, 32>}, {pipeline_mode = #tpu.pipeline_mode<synchronous>, transform_indices = @transform_2, window_bounds = array<i64: 1, 32>}, {pipeline_mode = #tpu.pipeline_mode<synchronous>, transform_indices = @transform_3, window_bounds = array<i64: 32, 96>}, {pipeline_mode = #tpu.pipeline_mode<synchronous>, transform_indices = @transform_4, window_bounds = array<i64: 1, 96>}, {pipeline_mode = #tpu.pipeline_mode<synchronous>, transform_indices = @transform_5, window_bounds = array<i64: 4, 8, 32>}, {pipeline_mode = #tpu.pipeline_mode<synchronous>, transform_indices = @transform_6, window_bounds = array<i64: 1, 32>}, {pipeline_mode = #tpu.pipeline_mode<synchronous>, transform_indices = @transform_7, window_bounds = array<i64: 1, 32>}, {pipeline_mode = #tpu.pipeline_mode<synchronous>, transform_indices = @transform_8, window_bounds = array<i64: 1, 32>}, {pipeline_mode = #tpu.pipeline_mode<synchronous>, transform_indices = @transform_9, window_bounds = array<i64: 32, 128>}, {pipeline_mode = #tpu.pipeline_mode<synchronous>, transform_indices = @transform_10, window_bounds = array<i64: 1, 128>}, {pipeline_mode = #tpu.pipeline_mode<synchronous>, transform_indices = @transform_11, window_bounds = array<i64: 128, 32>}, {pipeline_mode = #tpu.pipeline_mode<synchronous>, transform_indices = @transform_12, window_bounds = array<i64: 1, 32>}, {transform_indices = @transform_13, window_bounds = array<i64: 2, 8, 32>}]} {
    %c0 = arith.constant 0 : index
    %c0_0 = arith.constant 0 : index
    %c0_1 = arith.constant 0 : index
    %0 = vector.load %arg1[%c0, %c0_0, %c0_1] : memref<2x8x32xf32, #tpu.memory_space<vmem>>, vector<2x8x32xf32>
    %1 = vector.shape_cast %0 : vector<2x8x32xf32> to vector<16x32xf32>
    %c0_2 = arith.constant 0 : index
    %c0_3 = arith.constant 0 : index
    %2 = vector.load %arg2[%c0_2, %c0_3] : memref<1x32xf32, #tpu.memory_space<vmem>>, vector<1x32xf32>
    %c0_4 = arith.constant 0 : index
    %c0_5 = arith.constant 0 : index
    %3 = vector.load %arg3[%c0_4, %c0_5] : memref<1x32xf32, #tpu.memory_space<vmem>>, vector<1x32xf32>
    %cst = arith.constant dense<0.000000e+00> : vector<16xf32>
    %4 = vector.multi_reduction <add>, %1, %cst [1] : vector<16x32xf32> to vector<16xf32>
    %5 = vector.shape_cast %4 : vector<16xf32> to vector<16x1xf32>
    %cst_6 = arith.constant 3.200000e+01 : f32
    %6 = vector.broadcast %cst_6 : f32 to vector<16x1xf32>
    %7 = arith.divf %5, %6 : vector<16x1xf32>
    %8 = vector.broadcast %7 : vector<16x1xf32> to vector<16x32xf32>
    %9 = arith.subf %1, %8 : vector<16x32xf32>
    %10 = arith.mulf %9, %9 : vector<16x32xf32>
    %cst_7 = arith.constant dense<0.000000e+00> : vector<16xf32>
    %11 = vector.multi_reduction <add>, %10, %cst_7 [1] : vector<16x32xf32> to vector<16xf32>
    %12 = vector.shape_cast %11 : vector<16xf32> to vector<16x1xf32>
    %cst_8 = arith.constant 3.200000e+01 : f32
    %13 = vector.broadcast %cst_8 : f32 to vector<16x1xf32>
    %14 = arith.divf %12, %13 : vector<16x1xf32>
    %15 = vector.broadcast %7 : vector<16x1xf32> to vector<16x32xf32>
    %16 = arith.subf %1, %15 : vector<16x32xf32>
    %cst_9 = arith.constant 9.99999974E-6 : f32
    %17 = vector.broadcast %cst_9 : f32 to vector<16x1xf32>
    %18 = arith.addf %14, %17 : vector<16x1xf32>
    %19 = math.rsqrt %18 : vector<16x1xf32>
    %20 = vector.broadcast %19 : vector<16x1xf32> to vector<16x32xf32>
    %21 = arith.mulf %16, %20 : vector<16x32xf32>
    %22 = vector.broadcast %2 : vector<1x32xf32> to vector<16x32xf32>
    %23 = arith.mulf %21, %22 : vector<16x32xf32>
    %24 = vector.broadcast %3 : vector<1x32xf32> to vector<16x32xf32>
    %25 = arith.addf %23, %24 : vector<16x32xf32>
    %26 = arith.truncf %25 : vector<16x32xf32> to vector<16x32xbf16>
    %c0_10 = arith.constant 0 : index
    %c0_11 = arith.constant 0 : index
    %27 = vector.load %arg4[%c0_10, %c0_11] : memref<32x96xbf16, #tpu.memory_space<vmem>>, vector<32x96xbf16>
    %cst_12 = arith.constant dense<0.000000e+00> : vector<16x96xf32>
    %28 = tpu.matmul %26, %27, %cst_12 {dimension_numbers = #tpu.dot_dimension_numbers<[1], [0], [0], [1], [0, 0, 1, 1], [], []>} : vector<16x32xbf16>, vector<32x96xbf16>, vector<16x96xf32> -> vector<16x96xf32>
    %c0_13 = arith.constant 0 : index
    %c0_14 = arith.constant 0 : index
    %29 = vector.load %arg5[%c0_13, %c0_14] : memref<1x96xf32, #tpu.memory_space<vmem>>, vector<1x96xf32>
    %30 = vector.broadcast %29 : vector<1x96xf32> to vector<16x96xf32>
    %31 = arith.addf %28, %30 : vector<16x96xf32>
    %32 = vector.extract_strided_slice %31 {offsets = [0, 0], sizes = [16, 32], strides = [1, 1]} : vector<16x96xf32> to vector<16x32xf32>
    %cst_15 = arith.constant 0.353553385 : f32
    %33 = vector.broadcast %cst_15 : f32 to vector<16x32xf32>
    %34 = arith.mulf %32, %33 : vector<16x32xf32>
    %35 = vector.extract_strided_slice %31 {offsets = [0, 32], sizes = [16, 32], strides = [1, 1]} : vector<16x96xf32> to vector<16x32xf32>
    %36 = vector.extract_strided_slice %31 {offsets = [0, 64], sizes = [16, 32], strides = [1, 1]} : vector<16x96xf32> to vector<16x32xf32>
    %37 = vector.extract_strided_slice %34 {offsets = [0, 0], sizes = [16, 8], strides = [1, 1]} : vector<16x32xf32> to vector<16x8xf32>
    %38 = vector.extract_strided_slice %34 {offsets = [0, 8], sizes = [16, 8], strides = [1, 1]} : vector<16x32xf32> to vector<16x8xf32>
    %39 = vector.extract_strided_slice %34 {offsets = [0, 16], sizes = [16, 8], strides = [1, 1]} : vector<16x32xf32> to vector<16x8xf32>
    %40 = vector.extract_strided_slice %34 {offsets = [0, 24], sizes = [16, 8], strides = [1, 1]} : vector<16x32xf32> to vector<16x8xf32>
    %41 = vector.shape_cast %37 : vector<16x8xf32> to vector<1x16x8xf32>
    %42 = vector.shape_cast %38 : vector<16x8xf32> to vector<1x16x8xf32>
    %43 = vector.shape_cast %39 : vector<16x8xf32> to vector<1x16x8xf32>
    %44 = vector.shape_cast %40 : vector<16x8xf32> to vector<1x16x8xf32>
    %45 = tpu.concatenate %41, %42, %43, %44 in 0 : vector<1x16x8xf32>, vector<1x16x8xf32>, vector<1x16x8xf32>, vector<1x16x8xf32> -> vector<4x16x8xf32>
    %46 = arith.truncf %45 : vector<4x16x8xf32> to vector<4x16x8xbf16>
    %47 = vector.extract_strided_slice %35 {offsets = [0, 0], sizes = [16, 8], strides = [1, 1]} : vector<16x32xf32> to vector<16x8xf32>
    %48 = vector.extract_strided_slice %35 {offsets = [0, 8], sizes = [16, 8], strides = [1, 1]} : vector<16x32xf32> to vector<16x8xf32>
    %49 = vector.extract_strided_slice %35 {offsets = [0, 16], sizes = [16, 8], strides = [1, 1]} : vector<16x32xf32> to vector<16x8xf32>
    %50 = vector.extract_strided_slice %35 {offsets = [0, 24], sizes = [16, 8], strides = [1, 1]} : vector<16x32xf32> to vector<16x8xf32>
    %51 = vector.shape_cast %47 : vector<16x8xf32> to vector<1x16x8xf32>
    %52 = vector.shape_cast %48 : vector<16x8xf32> to vector<1x16x8xf32>
    %53 = vector.shape_cast %49 : vector<16x8xf32> to vector<1x16x8xf32>
    %54 = vector.shape_cast %50 : vector<16x8xf32> to vector<1x16x8xf32>
    %55 = tpu.concatenate %51, %52, %53, %54 in 0 : vector<1x16x8xf32>, vector<1x16x8xf32>, vector<1x16x8xf32>, vector<1x16x8xf32> -> vector<4x16x8xf32>
    %56 = arith.truncf %55 : vector<4x16x8xf32> to vector<4x16x8xbf16>
    %57 = vector.extract_strided_slice %36 {offsets = [0, 0], sizes = [16, 8], strides = [1, 1]} : vector<16x32xf32> to vector<16x8xf32>
    %58 = vector.extract_strided_slice %36 {offsets = [0, 8], sizes = [16, 8], strides = [1, 1]} : vector<16x32xf32> to vector<16x8xf32>
    %59 = vector.extract_strided_slice %36 {offsets = [0, 16], sizes = [16, 8], strides = [1, 1]} : vector<16x32xf32> to vector<16x8xf32>
    %60 = vector.extract_strided_slice %36 {offsets = [0, 24], sizes = [16, 8], strides = [1, 1]} : vector<16x32xf32> to vector<16x8xf32>
    %61 = vector.shape_cast %57 : vector<16x8xf32> to vector<1x16x8xf32>
    %62 = vector.shape_cast %58 : vector<16x8xf32> to vector<1x16x8xf32>
    %63 = vector.shape_cast %59 : vector<16x8xf32> to vector<1x16x8xf32>
    %64 = vector.shape_cast %60 : vector<16x8xf32> to vector<1x16x8xf32>
    %65 = tpu.concatenate %61, %62, %63, %64 in 0 : vector<1x16x8xf32>, vector<1x16x8xf32>, vector<1x16x8xf32>, vector<1x16x8xf32> -> vector<4x16x8xf32>
    %66 = arith.truncf %65 : vector<4x16x8xf32> to vector<4x16x8xbf16>
    %c0_16 = arith.constant 0 : index
    %c0_17 = arith.constant 0 : index
    %c0_18 = arith.constant 0 : index
    %67 = vector.load %arg6[%c0_16, %c0_17, %c0_18] : memref<4x8x32xbf16, #tpu.memory_space<vmem>>, vector<4x8x32xbf16>
    %68 = vector.extract_strided_slice %46 {offsets = [0, 0, 0], sizes = [4, 8, 8], strides = [1, 1, 1]} : vector<4x16x8xbf16> to vector<4x8x8xbf16>
    %69 = vector.extract_strided_slice %56 {offsets = [0, 0, 0], sizes = [4, 8, 8], strides = [1, 1, 1]} : vector<4x16x8xbf16> to vector<4x8x8xbf16>
    %70 = vector.extract_strided_slice %66 {offsets = [0, 0, 0], sizes = [4, 8, 8], strides = [1, 1, 1]} : vector<4x16x8xbf16> to vector<4x8x8xbf16>
    "tpu.trace_start"() <{level = 10 : i32, message = "hqd,hkd->hqk"}> : () -> ()
    %cst_19 = arith.constant dense<0.000000e+00> : vector<4x8x8xf32>
    %71 = tpu.matmul %68, %69, %cst_19 {dimension_numbers = #tpu.dot_dimension_numbers<[2], [2], [1], [1], [0, 0, 0, 1, 1, 1], [0], [0]>} : vector<4x8x8xbf16>, vector<4x8x8xbf16>, vector<4x8x8xf32> -> vector<4x8x8xf32>
    "tpu.trace_stop"() : () -> ()
    %cst_20 = arith.constant dense<0xFF800000> : vector<4x8xf32>
    %72 = vector.multi_reduction <maximumf>, %71, %cst_20 [2] : vector<4x8x8xf32> to vector<4x8xf32>
    %73 = vector.shape_cast %72 : vector<4x8xf32> to vector<4x8x1xf32>
    %74 = vector.broadcast %73 : vector<4x8x1xf32> to vector<4x8x8xf32>
    %75 = arith.subf %71, %74 : vector<4x8x8xf32>
    %76 = math.exp %75 : vector<4x8x8xf32>
    %cst_21 = arith.constant dense<0.000000e+00> : vector<4x8xf32>
    %77 = vector.multi_reduction <add>, %76, %cst_21 [2] : vector<4x8x8xf32> to vector<4x8xf32>
    %78 = vector.shape_cast %77 : vector<4x8xf32> to vector<4x8x1xf32>
    %79 = tpu.reciprocal %78 {approx = true} : vector<4x8x1xf32> -> vector<4x8x1xf32>
    %80 = vector.broadcast %79 : vector<4x8x1xf32> to vector<4x8x8xf32>
    %81 = arith.mulf %76, %80 : vector<4x8x8xf32>
    %82 = arith.truncf %81 : vector<4x8x8xf32> to vector<4x8x8xbf16>
    "tpu.trace_start"() <{level = 10 : i32, message = "hqk,hkd->hqd"}> : () -> ()
    %cst_22 = arith.constant dense<0.000000e+00> : vector<4x8x8xf32>
    %83 = tpu.matmul %82, %70, %cst_22 {dimension_numbers = #tpu.dot_dimension_numbers<[2], [1], [1], [2], [0, 0, 0, 1, 1, 2], [0], [0]>} : vector<4x8x8xbf16>, vector<4x8x8xbf16>, vector<4x8x8xf32> -> vector<4x8x8xf32>
    "tpu.trace_stop"() : () -> ()
    %84 = arith.truncf %83 : vector<4x8x8xf32> to vector<4x8x8xbf16>
    "tpu.trace_start"() <{level = 10 : i32, message = "hqd,hde->hqe"}> : () -> ()
    %cst_23 = arith.constant dense<0.000000e+00> : vector<4x8x32xf32>
    %85 = tpu.matmul %84, %67, %cst_23 {dimension_numbers = #tpu.dot_dimension_numbers<[2], [1], [1], [2], [0, 0, 0, 1, 1, 2], [0], [0]>} : vector<4x8x8xbf16>, vector<4x8x32xbf16>, vector<4x8x32xf32> -> vector<4x8x32xf32>
    "tpu.trace_stop"() : () -> ()
    %cst_24 = arith.constant dense<0.000000e+00> : vector<8x32xf32>
    %86 = vector.multi_reduction <add>, %85, %cst_24 [0] : vector<4x8x32xf32> to vector<8x32xf32>
    %87 = vector.extract_strided_slice %46 {offsets = [0, 8, 0], sizes = [4, 8, 8], strides = [1, 1, 1]} : vector<4x16x8xbf16> to vector<4x8x8xbf16>
    %88 = vector.extract_strided_slice %56 {offsets = [0, 8, 0], sizes = [4, 8, 8], strides = [1, 1, 1]} : vector<4x16x8xbf16> to vector<4x8x8xbf16>
    %89 = vector.extract_strided_slice %66 {offsets = [0, 8, 0], sizes = [4, 8, 8], strides = [1, 1, 1]} : vector<4x16x8xbf16> to vector<4x8x8xbf16>
    "tpu.trace_start"() <{level = 10 : i32, message = "hqd,hkd->hqk"}> : () -> ()
    %cst_25 = arith.constant dense<0.000000e+00> : vector<4x8x8xf32>
    %90 = tpu.matmul %87, %88, %cst_25 {dimension_numbers = #tpu.dot_dimension_numbers<[2], [2], [1], [1], [0, 0, 0, 1, 1, 1], [0], [0]>} : vector<4x8x8xbf16>, vector<4x8x8xbf16>, vector<4x8x8xf32> -> vector<4x8x8xf32>
    "tpu.trace_stop"() : () -> ()
    %cst_26 = arith.constant dense<0xFF800000> : vector<4x8xf32>
    %91 = vector.multi_reduction <maximumf>, %90, %cst_26 [2] : vector<4x8x8xf32> to vector<4x8xf32>
    %92 = vector.shape_cast %91 : vector<4x8xf32> to vector<4x8x1xf32>
    %93 = vector.broadcast %92 : vector<4x8x1xf32> to vector<4x8x8xf32>
    %94 = arith.subf %90, %93 : vector<4x8x8xf32>
    %95 = math.exp %94 : vector<4x8x8xf32>
    %cst_27 = arith.constant dense<0.000000e+00> : vector<4x8xf32>
    %96 = vector.multi_reduction <add>, %95, %cst_27 [2] : vector<4x8x8xf32> to vector<4x8xf32>
    %97 = vector.shape_cast %96 : vector<4x8xf32> to vector<4x8x1xf32>
    %98 = tpu.reciprocal %97 {approx = true} : vector<4x8x1xf32> -> vector<4x8x1xf32>
    %99 = vector.broadcast %98 : vector<4x8x1xf32> to vector<4x8x8xf32>
    %100 = arith.mulf %95, %99 : vector<4x8x8xf32>
    %101 = arith.truncf %100 : vector<4x8x8xf32> to vector<4x8x8xbf16>
    "tpu.trace_start"() <{level = 10 : i32, message = "hqk,hkd->hqd"}> : () -> ()
    %cst_28 = arith.constant dense<0.000000e+00> : vector<4x8x8xf32>
    %102 = tpu.matmul %101, %89, %cst_28 {dimension_numbers = #tpu.dot_dimension_numbers<[2], [1], [1], [2], [0, 0, 0, 1, 1, 2], [0], [0]>} : vector<4x8x8xbf16>, vector<4x8x8xbf16>, vector<4x8x8xf32> -> vector<4x8x8xf32>
    "tpu.trace_stop"() : () -> ()
    %103 = arith.truncf %102 : vector<4x8x8xf32> to vector<4x8x8xbf16>
    "tpu.trace_start"() <{level = 10 : i32, message = "hqd,hde->hqe"}> : () -> ()
    %cst_29 = arith.constant dense<0.000000e+00> : vector<4x8x32xf32>
    %104 = tpu.matmul %103, %67, %cst_29 {dimension_numbers = #tpu.dot_dimension_numbers<[2], [1], [1], [2], [0, 0, 0, 1, 1, 2], [0], [0]>} : vector<4x8x8xbf16>, vector<4x8x32xbf16>, vector<4x8x32xf32> -> vector<4x8x32xf32>
    "tpu.trace_stop"() : () -> ()
    %cst_30 = arith.constant dense<0.000000e+00> : vector<8x32xf32>
    %105 = vector.multi_reduction <add>, %104, %cst_30 [0] : vector<4x8x32xf32> to vector<8x32xf32>
    %106 = tpu.concatenate %86, %105 in 0 : vector<8x32xf32>, vector<8x32xf32> -> vector<16x32xf32>
    %107 = arith.addf %1, %106 : vector<16x32xf32>
    %c0_31 = arith.constant 0 : index
    %c0_32 = arith.constant 0 : index
    %108 = vector.load %arg7[%c0_31, %c0_32] : memref<1x32xf32, #tpu.memory_space<vmem>>, vector<1x32xf32>
    %109 = vector.broadcast %108 : vector<1x32xf32> to vector<16x32xf32>
    %110 = arith.addf %107, %109 : vector<16x32xf32>
    %c0_33 = arith.constant 0 : index
    %c0_34 = arith.constant 0 : index
    %111 = vector.load %arg8[%c0_33, %c0_34] : memref<1x32xf32, #tpu.memory_space<vmem>>, vector<1x32xf32>
    %c0_35 = arith.constant 0 : index
    %c0_36 = arith.constant 0 : index
    %112 = vector.load %arg9[%c0_35, %c0_36] : memref<1x32xf32, #tpu.memory_space<vmem>>, vector<1x32xf32>
    %cst_37 = arith.constant dense<0.000000e+00> : vector<16xf32>
    %113 = vector.multi_reduction <add>, %110, %cst_37 [1] : vector<16x32xf32> to vector<16xf32>
    %114 = vector.shape_cast %113 : vector<16xf32> to vector<16x1xf32>
    %cst_38 = arith.constant 3.200000e+01 : f32
    %115 = vector.broadcast %cst_38 : f32 to vector<16x1xf32>
    %116 = arith.divf %114, %115 : vector<16x1xf32>
    %117 = vector.broadcast %116 : vector<16x1xf32> to vector<16x32xf32>
    %118 = arith.subf %110, %117 : vector<16x32xf32>
    %119 = arith.mulf %118, %118 : vector<16x32xf32>
    %cst_39 = arith.constant dense<0.000000e+00> : vector<16xf32>
    %120 = vector.multi_reduction <add>, %119, %cst_39 [1] : vector<16x32xf32> to vector<16xf32>
    %121 = vector.shape_cast %120 : vector<16xf32> to vector<16x1xf32>
    %cst_40 = arith.constant 3.200000e+01 : f32
    %122 = vector.broadcast %cst_40 : f32 to vector<16x1xf32>
    %123 = arith.divf %121, %122 : vector<16x1xf32>
    %124 = vector.broadcast %116 : vector<16x1xf32> to vector<16x32xf32>
    %125 = arith.subf %110, %124 : vector<16x32xf32>
    %cst_41 = arith.constant 9.99999974E-6 : f32
    %126 = vector.broadcast %cst_41 : f32 to vector<16x1xf32>
    %127 = arith.addf %123, %126 : vector<16x1xf32>
    %128 = math.rsqrt %127 : vector<16x1xf32>
    %129 = vector.broadcast %128 : vector<16x1xf32> to vector<16x32xf32>
    %130 = arith.mulf %125, %129 : vector<16x32xf32>
    %131 = vector.broadcast %111 : vector<1x32xf32> to vector<16x32xf32>
    %132 = arith.mulf %130, %131 : vector<16x32xf32>
    %133 = vector.broadcast %112 : vector<1x32xf32> to vector<16x32xf32>
    %134 = arith.addf %132, %133 : vector<16x32xf32>
    %135 = arith.truncf %134 : vector<16x32xf32> to vector<16x32xbf16>
    %c0_42 = arith.constant 0 : index
    %c0_43 = arith.constant 0 : index
    %136 = vector.load %arg10[%c0_42, %c0_43] : memref<32x128xbf16, #tpu.memory_space<vmem>>, vector<32x128xbf16>
    %cst_44 = arith.constant dense<0.000000e+00> : vector<16x128xf32>
    %137 = tpu.matmul %135, %136, %cst_44 {dimension_numbers = #tpu.dot_dimension_numbers<[1], [0], [0], [1], [0, 0, 1, 1], [], []>} : vector<16x32xbf16>, vector<32x128xbf16>, vector<16x128xf32> -> vector<16x128xf32>
    %c0_45 = arith.constant 0 : index
    %c0_46 = arith.constant 0 : index
    %138 = vector.load %arg11[%c0_45, %c0_46] : memref<1x128xf32, #tpu.memory_space<vmem>>, vector<1x128xf32>
    %139 = vector.broadcast %138 : vector<1x128xf32> to vector<16x128xf32>
    %140 = arith.addf %137, %139 : vector<16x128xf32>
    %cst_47 = arith.constant 1.702000e+00 : f32
    %141 = vector.broadcast %cst_47 : f32 to vector<16x128xf32>
    %142 = arith.mulf %141, %140 : vector<16x128xf32>
    %143 = arith.negf %142 : vector<16x128xf32>
    %144 = math.exp %143 : vector<16x128xf32>
    %cst_48 = arith.constant 1.000000e+00 : f32
    %145 = vector.broadcast %cst_48 : f32 to vector<16x128xf32>
    %146 = arith.addf %145, %144 : vector<16x128xf32>
    %147 = arith.divf %145, %146 : vector<16x128xf32>
    %148 = arith.mulf %140, %147 : vector<16x128xf32>
    %149 = arith.truncf %148 : vector<16x128xf32> to vector<16x128xbf16>
    %c0_49 = arith.constant 0 : index
    %c0_50 = arith.constant 0 : index
    %150 = vector.load %arg12[%c0_49, %c0_50] : memref<128x32xbf16, #tpu.memory_space<vmem>>, vector<128x32xbf16>
    %cst_51 = arith.constant dense<0.000000e+00> : vector<16x32xf32>
    %151 = tpu.matmul %149, %150, %cst_51 {dimension_numbers = #tpu.dot_dimension_numbers<[1], [0], [0], [1], [0, 0, 1, 1], [], []>} : vector<16x128xbf16>, vector<128x32xbf16>, vector<16x32xf32> -> vector<16x32xf32>
    %c0_52 = arith.constant 0 : index
    %c0_53 = arith.constant 0 : index
    %152 = vector.load %arg13[%c0_52, %c0_53] : memref<1x32xf32, #tpu.memory_space<vmem>>, vector<1x32xf32>
    %153 = vector.broadcast %152 : vector<1x32xf32> to vector<16x32xf32>
    %154 = arith.addf %151, %153 : vector<16x32xf32>
    %155 = arith.addf %110, %154 : vector<16x32xf32>
    %156 = vector.shape_cast %155 : vector<16x32xf32> to vector<2x8x32xf32>
    %c0_54 = arith.constant 0 : index
    %c0_55 = arith.constant 0 : index
    %c0_56 = arith.constant 0 : index
    %157 = vector.load %arg14[%c0_54, %c0_55, %c0_56] : memref<2x8x32xf32, #tpu.memory_space<vmem>>, vector<2x8x32xf32>
    tpu.vector_store %arg14[%c0_54, %c0_55, %c0_56], %156 {strides = array<i32>} : memref<2x8x32xf32, #tpu.memory_space<vmem>>, vector<2x8x32xf32>,
    return
  }
  func.func @transform_0(%arg0: i32) -> (i32, i32, i32) {
    %c0_i32 = arith.constant 0 : i32
    %c0_i32_0 = arith.constant 0 : i32
    %c0_i32_1 = arith.constant 0 : i32
    return %arg0, %c0_i32, %c0_i32_0 : i32, i32, i32
  }
  func.func @transform_1(%arg0: i32) -> (i32, i32) {
    %c0_i32 = arith.constant 0 : i32
    %c0_i32_0 = arith.constant 0 : i32
    %c0_i32_1 = arith.constant 0 : i32
    return %c0_i32, %c0_i32_0 : i32, i32
  }
  func.func @transform_2(%arg0: i32) -> (i32, i32) {
    %c0_i32 = arith.constant 0 : i32
    %c0_i32_0 = arith.constant 0 : i32
    %c0_i32_1 = arith.constant 0 : i32
    return %c0_i32, %c0_i32_0 : i32, i32
  }
  func.func @transform_3(%arg0: i32) -> (i32, i32) {
    %c0_i32 = arith.constant 0 : i32
    %c0_i32_0 = arith.constant 0 : i32
    %c0_i32_1 = arith.constant 0 : i32
    return %c0_i32, %c0_i32_0 : i32, i32
  }
  func.func @transform_4(%arg0: i32) -> (i32, i32) {
    %c0_i32 = arith.constant 0 : i32
    %c0_i32_0 = arith.constant 0 : i32
    %c0_i32_1 = arith.constant 0 : i32
    return %c0_i32, %c0_i32_0 : i32, i32
  }
  func.func @transform_5(%arg0: i32) -> (i32, i32, i32) {
    %c0_i32 = arith.constant 0 : i32
    %c0_i32_0 = arith.constant 0 : i32
    %c0_i32_1 = arith.constant 0 : i32
    %c0_i32_2 = arith.constant 0 : i32
    return %c0_i32, %c0_i32_0, %c0_i32_1 : i32, i32, i32
  }
  func.func @transform_6(%arg0: i32) -> (i32, i32) {
    %c0_i32 = arith.constant 0 : i32
    %c0_i32_0 = arith.constant 0 : i32
    %c0_i32_1 = arith.constant 0 : i32
    return %c0_i32, %c0_i32_0 : i32, i32
  }
  func.func @transform_7(%arg0: i32) -> (i32, i32) {
    %c0_i32 = arith.constant 0 : i32
    %c0_i32_0 = arith.constant 0 : i32
    %c0_i32_1 = arith.constant 0 : i32
    return %c0_i32, %c0_i32_0 : i32, i32
  }
  func.func @transform_8(%arg0: i32) -> (i32, i32) {
    %c0_i32 = arith.constant 0 : i32
    %c0_i32_0 = arith.constant 0 : i32
    %c0_i32_1 = arith.constant 0 : i32
    return %c0_i32, %c0_i32_0 : i32, i32
  }
  func.func @transform_9(%arg0: i32) -> (i32, i32) {
    %c0_i32 = arith.constant 0 : i32
    %c0_i32_0 = arith.constant 0 : i32
    %c0_i32_1 = arith.constant 0 : i32
    return %c0_i32, %c0_i32_0 : i32, i32
  }
  func.func @transform_10(%arg0: i32) -> (i32, i32) {
    %c0_i32 = arith.constant 0 : i32
    %c0_i32_0 = arith.constant 0 : i32
    %c0_i32_1 = arith.constant 0 : i32
    return %c0_i32, %c0_i32_0 : i32, i32
  }
  func.func @transform_11(%arg0: i32) -> (i32, i32) {
    %c0_i32 = arith.constant 0 : i32
    %c0_i32_0 = arith.constant 0 : i32
    %c0_i32_1 = arith.constant 0 : i32
    return %c0_i32, %c0_i32_0 : i32, i32
  }
  func.func @transform_12(%arg0: i32) -> (i32, i32) {
    %c0_i32 = arith.constant 0 : i32
    %c0_i32_0 = arith.constant 0 : i32
    %c0_i32_1 = arith.constant 0 : i32
    return %c0_i32, %c0_i32_0 : i32, i32
  }
  func.func @transform_13(%arg0: i32) -> (i32, i32, i32) {
    %c0_i32 = arith.constant 0 : i32
    %c0_i32_0 = arith.constant 0 : i32
    %c0_i32_1 = arith.constant 0 : i32
    return %arg0, %c0_i32, %c0_i32_0 : i32, i32, i32
  }
}

module attributes {stable_mosaic.version = 11 : i64} {
  func.func @resblock_kernel(%arg0: i32, %arg1: memref<2x8x32xf32, #tpu.memory_space<vmem>>, %arg2: memref<1x32xf32, #tpu.memory_space<vmem>>, %arg3: memref<1x32xf32, #tpu.memory_space<vmem>>, %arg4: memref<32x96xbf16, #tpu.memory_space<vmem>>, %arg5: memref<1x96xf32, #tpu.memory_space<vmem>>, %arg6: memref<4x8x32xbf16, #tpu.memory_space<vmem>>, %arg7: memref<1x32xf32, #tpu.memory_space<vmem>>, %arg8: memref<1x32xf32, #tpu.memory_space<vmem>>, %arg9: memref<1x32xf32, #tpu.memory_space<vmem>>, %arg10: memref<32x128xbf16, #tpu.memory_space<vmem>>, %arg11: memref<1x128xf32, #tpu.memory_space<vmem>>, %arg12: memref<128x32xbf16, #tpu.memory_space<vmem>>, %arg13: memref<1x32xf32, #tpu.memory_space<vmem>>, %arg14: memref<2x8x32xf32, #tpu.memory_space<vmem>>) attributes {dimension_semantics = [#tpu.dimension_semantics<parallel>], iteration_bounds = array<i64: 1>, scalar_prefetch = 0 : i64, scratch_operands = 0 : i64, tpu.core_type = #tpu.core_type<tc>, window_params = [{transform_indices = @transform_0, window_bounds = array<i64: 2, 8, 32>}, {pipeline_mode = #tpu.pipeline_mode<synchronous>, transform_indices = @transform_1, window_bounds = array<i64: 1, 32>}, {pipeline_mode = #tpu.pipeline_mode<synchronous>, transform_indices = @transform_2, window_bounds = array<i64: 1, 32>}, {pipeline_mode = #tpu.pipeline_mode<synchronous>, transform_indices = @transform_3, window_bounds = array<i64: 32, 96>}, {pipeline_mode = #tpu.pipeline_mode<synchronous>, transform_indices = @transform_4, window_bounds = array<i64: 1, 96>}, {pipeline_mode = #tpu.pipeline_mode<synchronous>, transform_indices = @transform_5, window_bounds = array<i64: 4, 8, 32>}, {pipeline_mode = #tpu.pipeline_mode<synchronous>, transform_indices = @transform_6, window_bounds = array<i64: 1, 32>}, {pipeline_mode = #tpu.pipeline_mode<synchronous>, transform_indices = @transform_7, window_bounds = array<i64: 1, 32>}, {pipeline_mode = #tpu.pipeline_mode<synchronous>, transform_indices = @transform_8, window_bounds = array<i64: 1, 32>}, {pipeline_mode = #tpu.pipeline_mode<synchronous>, transform_indices = @transform_9, window_bounds = array<i64: 32, 128>}, {pipeline_mode = #tpu.pipeline_mode<synchronous>, transform_indices = @transform_10, window_bounds = array<i64: 1, 128>}, {pipeline_mode = #tpu.pipeline_mode<synchronous>, transform_indices = @transform_11, window_bounds = array<i64: 128, 32>}, {pipeline_mode = #tpu.pipeline_mode<synchronous>, transform_indices = @transform_12, window_bounds = array<i64: 1, 32>}, {transform_indices = @transform_13, window_bounds = array<i64: 2, 8, 32>}]} {
    %c0 = arith.constant 0 : index
    %c0_0 = arith.constant 0 : index
    %c0_1 = arith.constant 0 : index
    %0 = vector.load %arg1[%c0, %c0_0, %c0_1] : memref<2x8x32xf32, #tpu.memory_space<vmem>>, vector<2x8x32xf32>
    %1 = vector.shape_cast %0 : vector<2x8x32xf32> to vector<16x32xf32>
    %c0_2 = arith.constant 0 : index
    %c0_3 = arith.constant 0 : index
    %2 = vector.load %arg2[%c0_2, %c0_3] : memref<1x32xf32, #tpu.memory_space<vmem>>, vector<1x32xf32>
    %c0_4 = arith.constant 0 : index
    %c0_5 = arith.constant 0 : index
    %3 = vector.load %arg3[%c0_4, %c0_5] : memref<1x32xf32, #tpu.memory_space<vmem>>, vector<1x32xf32>
    %cst = arith.constant dense<0.000000e+00> : vector<16xf32>
    %4 = vector.multi_reduction <add>, %1, %cst [1] : vector<16x32xf32> to vector<16xf32>
    %5 = vector.shape_cast %4 : vector<16xf32> to vector<16x1xf32>
    %cst_6 = arith.constant 3.200000e+01 : f32
    %6 = vector.broadcast %cst_6 : f32 to vector<16x1xf32>
    %7 = arith.divf %5, %6 : vector<16x1xf32>
    %8 = vector.broadcast %7 : vector<16x1xf32> to vector<16x32xf32>
    %9 = arith.subf %1, %8 : vector<16x32xf32>
    %10 = arith.mulf %9, %9 : vector<16x32xf32>
    %cst_7 = arith.constant dense<0.000000e+00> : vector<16xf32>
    %11 = vector.multi_reduction <add>, %10, %cst_7 [1] : vector<16x32xf32> to vector<16xf32>
    %12 = vector.shape_cast %11 : vector<16xf32> to vector<16x1xf32>
    %cst_8 = arith.constant 3.200000e+01 : f32
    %13 = vector.broadcast %cst_8 : f32 to vector<16x1xf32>
    %14 = arith.divf %12, %13 : vector<16x1xf32>
    %15 = vector.broadcast %7 : vector<16x1xf32> to vector<16x32xf32>
    %16 = arith.subf %1, %15 : vector<16x32xf32>
    %cst_9 = arith.constant 9.99999974E-6 : f32
    %17 = vector.broadcast %cst_9 : f32 to vector<16x1xf32>
    %18 = arith.addf %14, %17 : vector<16x1xf32>
    %19 = math.rsqrt %18 : vector<16x1xf32>
    %20 = vector.broadcast %19 : vector<16x1xf32> to vector<16x32xf32>
    %21 = arith.mulf %16, %20 : vector<16x32xf32>
    %22 = vector.broadcast %2 : vector<1x32xf32> to vector<16x32xf32>
    %23 = arith.mulf %21, %22 : vector<16x32xf32>
    %24 = vector.broadcast %3 : vector<1x32xf32> to vector<16x32xf32>
    %25 = arith.addf %23, %24 : vector<16x32xf32>
    %26 = arith.truncf %25 : vector<16x32xf32> to vector<16x32xbf16>
    %c0_10 = arith.constant 0 : index
    %c0_11 = arith.constant 0 : index
    %27 = vector.load %arg4[%c0_10, %c0_11] : memref<32x96xbf16, #tpu.memory_space<vmem>>, vector<32x96xbf16>
    %cst_12 = arith.constant dense<0.000000e+00> : vector<16x96xf32>
    %28 = tpu.matmul %26, %27, %cst_12 {dimension_numbers = #tpu.dot_dimension_numbers<[1], [0], [0], [1], [0, 0, 1, 1], [], []>} : vector<16x32xbf16>, vector<32x96xbf16>, vector<16x96xf32> -> vector<16x96xf32>
    %c0_13 = arith.constant 0 : index
    %c0_14 = arith.constant 0 : index
    %29 = vector.load %arg5[%c0_13, %c0_14] : memref<1x96xf32, #tpu.memory_space<vmem>>, vector<1x96xf32>
    %30 = vector.broadcast %29 : vector<1x96xf32> to vector<16x96xf32>
    %31 = arith.addf %28, %30 : vector<16x96xf32>
    %32 = vector.extract_strided_slice %31 {offsets = [0, 0], sizes = [16, 32], strides = [1, 1]} : vector<16x96xf32> to vector<16x32xf32>
    %cst_15 = arith.constant 0.353553385 : f32
    %33 = vector.broadcast %cst_15 : f32 to vector<16x32xf32>
    %34 = arith.mulf %32, %33 : vector<16x32xf32>
    %35 = vector.extract_strided_slice %31 {offsets = [0, 32], sizes = [16, 32], strides = [1, 1]} : vector<16x96xf32> to vector<16x32xf32>
    %36 = vector.extract_strided_slice %31 {offsets = [0, 64], sizes = [16, 32], strides = [1, 1]} : vector<16x96xf32> to vector<16x32xf32>
    %37 = vector.extract_strided_slice %34 {offsets = [0, 0], sizes = [16, 8], strides = [1, 1]} : vector<16x32xf32> to vector<16x8xf32>
    %38 = vector.extract_strided_slice %34 {offsets = [0, 8], sizes = [16, 8], strides = [1, 1]} : vector<16x32xf32> to vector<16x8xf32>
    %39 = vector.extract_strided_slice %34 {offsets = [0, 16], sizes = [16, 8], strides = [1, 1]} : vector<16x32xf32> to vector<16x8xf32>
    %40 = vector.extract_strided_slice %34 {offsets = [0, 24], sizes = [16, 8], strides = [1, 1]} : vector<16x32xf32> to vector<16x8xf32>
    %41 = vector.shape_cast %37 : vector<16x8xf32> to vector<1x16x8xf32>
    %42 = vector.shape_cast %38 : vector<16x8xf32> to vector<1x16x8xf32>
    %43 = vector.shape_cast %39 : vector<16x8xf32> to vector<1x16x8xf32>
    %44 = vector.shape_cast %40 : vector<16x8xf32> to vector<1x16x8xf32>
    %45 = tpu.concatenate %41, %42, %43, %44 in 0 : vector<1x16x8xf32>, vector<1x16x8xf32>, vector<1x16x8xf32>, vector<1x16x8xf32> -> vector<4x16x8xf32>
    %46 = arith.truncf %45 : vector<4x16x8xf32> to vector<4x16x8xbf16>
    %47 = vector.extract_strided_slice %35 {offsets = [0, 0], sizes = [16, 8], strides = [1, 1]} : vector<16x32xf32> to vector<16x8xf32>
    %48 = vector.extract_strided_slice %35 {offsets = [0, 8], sizes = [16, 8], strides = [1, 1]} : vector<16x32xf32> to vector<16x8xf32>
    %49 = vector.extract_strided_slice %35 {offsets = [0, 16], sizes = [16, 8], strides = [1, 1]} : vector<16x32xf32> to vector<16x8xf32>
    %50 = vector.extract_strided_slice %35 {offsets = [0, 24], sizes = [16, 8], strides = [1, 1]} : vector<16x32xf32> to vector<16x8xf32>
    %51 = vector.shape_cast %47 : vector<16x8xf32> to vector<1x16x8xf32>
    %52 = vector.shape_cast %48 : vector<16x8xf32> to vector<1x16x8xf32>
    %53 = vector.shape_cast %49 : vector<16x8xf32> to vector<1x16x8xf32>
    %54 = vector.shape_cast %50 : vector<16x8xf32> to vector<1x16x8xf32>
    %55 = tpu.concatenate %51, %52, %53, %54 in 0 : vector<1x16x8xf32>, vector<1x16x8xf32>, vector<1x16x8xf32>, vector<1x16x8xf32> -> vector<4x16x8xf32>
    %56 = arith.truncf %55 : vector<4x16x8xf32> to vector<4x16x8xbf16>
    %57 = vector.extract_strided_slice %36 {offsets = [0, 0], sizes = [16, 8], strides = [1, 1]} : vector<16x32xf32> to vector<16x8xf32>
    %58 = vector.extract_strided_slice %36 {offsets = [0, 8], sizes = [16, 8], strides = [1, 1]} : vector<16x32xf32> to vector<16x8xf32>
    %59 = vector.extract_strided_slice %36 {offsets = [0, 16], sizes = [16, 8], strides = [1, 1]} : vector<16x32xf32> to vector<16x8xf32>
    %60 = vector.extract_strided_slice %36 {offsets = [0, 24], sizes = [16, 8], strides = [1, 1]} : vector<16x32xf32> to vector<16x8xf32>
    %61 = vector.shape_cast %57 : vector<16x8xf32> to vector<1x16x8xf32>
    %62 = vector.shape_cast %58 : vector<16x8xf32> to vector<1x16x8xf32>
    %63 = vector.shape_cast %59 : vector<16x8xf32> to vector<1x16x8xf32>
    %64 = vector.shape_cast %60 : vector<16x8xf32> to vector<1x16x8xf32>
    %65 = tpu.concatenate %61, %62, %63, %64 in 0 : vector<1x16x8xf32>, vector<1x16x8xf32>, vector<1x16x8xf32>, vector<1x16x8xf32> -> vector<4x16x8xf32>
    %66 = arith.truncf %65 : vector<4x16x8xf32> to vector<4x16x8xbf16>
    %c0_16 = arith.constant 0 : index
    %c0_17 = arith.constant 0 : index
    %c0_18 = arith.constant 0 : index
    %67 = vector.load %arg6[%c0_16, %c0_17, %c0_18] : memref<4x8x32xbf16, #tpu.memory_space<vmem>>, vector<4x8x32xbf16>
    %68 = vector.extract_strided_slice %46 {offsets = [0, 0, 0], sizes = [4, 8, 8], strides = [1, 1, 1]} : vector<4x16x8xbf16> to vector<4x8x8xbf16>
    %69 = vector.extract_strided_slice %56 {offsets = [0, 0, 0], sizes = [4, 8, 8], strides = [1, 1, 1]} : vector<4x16x8xbf16> to vector<4x8x8xbf16>
    %70 = vector.extract_strided_slice %66 {offsets = [0, 0, 0], sizes = [4, 8, 8], strides = [1, 1, 1]} : vector<4x16x8xbf16> to vector<4x8x8xbf16>
    "tpu.trace_start"() <{level = 10 : i32, message = "hqd,hkd->hqk"}> : () -> ()
    %cst_19 = arith.constant dense<0.000000e+00> : vector<4x8x8xf32>
    %71 = tpu.matmul %68, %69, %cst_19 {dimension_numbers = #tpu.dot_dimension_numbers<[2], [2], [1], [1], [0, 0, 0, 1, 1, 1], [0], [0]>} : vector<4x8x8xbf16>, vector<4x8x8xbf16>, vector<4x8x8xf32> -> vector<4x8x8xf32>
    "tpu.trace_stop"() : () -> ()
    %cst_20 = arith.constant dense<0xFF800000> : vector<4x8xf32>
    %72 = vector.multi_reduction <maximumf>, %71, %cst_20 [2] : vector<4x8x8xf32> to vector<4x8xf32>
    %73 = vector.shape_cast %72 : vector<4x8xf32> to vector<4x8x1xf32>
    %74 = vector.broadcast %73 : vector<4x8x1xf32> to vector<4x8x8xf32>
    %75 = arith.subf %71, %74 : vector<4x8x8xf32>
    %76 = math.exp %75 : vector<4x8x8xf32>
    %cst_21 = arith.constant dense<0.000000e+00> : vector<4x8xf32>
    %77 = vector.multi_reduction <add>, %76, %cst_21 [2] : vector<4x8x8xf32> to vector<4x8xf32>
    %78 = vector.shape_cast %77 : vector<4x8xf32> to vector<4x8x1xf32>
    %79 = tpu.reciprocal %78 {approx = true} : vector<4x8x1xf32> -> vector<4x8x1xf32>
    %80 = vector.broadcast %79 : vector<4x8x1xf32> to vector<4x8x8xf32>
    %81 = arith.mulf %76, %80 : vector<4x8x8xf32>
    %82 = arith.truncf %81 : vector<4x8x8xf32> to vector<4x8x8xbf16>
    "tpu.trace_start"() <{level = 10 : i32, message = "hqk,hkd->hqd"}> : () -> ()
    %cst_22 = arith.constant dense<0.000000e+00> : vector<4x8x8xf32>
    %83 = tpu.matmul %82, %70, %cst_22 {dimension_numbers = #tpu.dot_dimension_numbers<[2], [1], [1], [2], [0, 0, 0, 1, 1, 2], [0], [0]>} : vector<4x8x8xbf16>, vector<4x8x8xbf16>, vector<4x8x8xf32> -> vector<4x8x8xf32>
    "tpu.trace_stop"() : () -> ()
    %84 = arith.truncf %83 : vector<4x8x8xf32> to vector<4x8x8xbf16>
    "tpu.trace_start"() <{level = 10 : i32, message = "hqd,hde->hqe"}> : () -> ()
    %cst_23 = arith.constant dense<0.000000e+00> : vector<4x8x32xf32>
    %85 = tpu.matmul %84, %67, %cst_23 {dimension_numbers = #tpu.dot_dimension_numbers<[2], [1], [1], [2], [0, 0, 0, 1, 1, 2], [0], [0]>} : vector<4x8x8xbf16>, vector<4x8x32xbf16>, vector<4x8x32xf32> -> vector<4x8x32xf32>
    "tpu.trace_stop"() : () -> ()
    %cst_24 = arith.constant dense<0.000000e+00> : vector<8x32xf32>
    %86 = vector.multi_reduction <add>, %85, %cst_24 [0] : vector<4x8x32xf32> to vector<8x32xf32>
    %87 = vector.extract_strided_slice %46 {offsets = [0, 8, 0], sizes = [4, 8, 8], strides = [1, 1, 1]} : vector<4x16x8xbf16> to vector<4x8x8xbf16>
    %88 = vector.extract_strided_slice %56 {offsets = [0, 8, 0], sizes = [4, 8, 8], strides = [1, 1, 1]} : vector<4x16x8xbf16> to vector<4x8x8xbf16>
    %89 = vector.extract_strided_slice %66 {offsets = [0, 8, 0], sizes = [4, 8, 8], strides = [1, 1, 1]} : vector<4x16x8xbf16> to vector<4x8x8xbf16>
    "tpu.trace_start"() <{level = 10 : i32, message = "hqd,hkd->hqk"}> : () -> ()
    %cst_25 = arith.constant dense<0.000000e+00> : vector<4x8x8xf32>
    %90 = tpu.matmul %87, %88, %cst_25 {dimension_numbers = #tpu.dot_dimension_numbers<[2], [2], [1], [1], [0, 0, 0, 1, 1, 1], [0], [0]>} : vector<4x8x8xbf16>, vector<4x8x8xbf16>, vector<4x8x8xf32> -> vector<4x8x8xf32>
    "tpu.trace_stop"() : () -> ()
    %cst_26 = arith.constant dense<0xFF800000> : vector<4x8xf32>
    %91 = vector.multi_reduction <maximumf>, %90, %cst_26 [2] : vector<4x8x8xf32> to vector<4x8xf32>
    %92 = vector.shape_cast %91 : vector<4x8xf32> to vector<4x8x1xf32>
    %93 = vector.broadcast %92 : vector<4x8x1xf32> to vector<4x8x8xf32>
    %94 = arith.subf %90, %93 : vector<4x8x8xf32>
    %95 = math.exp %94 : vector<4x8x8xf32>
    %cst_27 = arith.constant dense<0.000000e+00> : vector<4x8xf32>
    %96 = vector.multi_reduction <add>, %95, %cst_27 [2] : vector<4x8x8xf32> to vector<4x8xf32>
    %97 = vector.shape_cast %96 : vector<4x8xf32> to vector<4x8x1xf32>
    %98 = tpu.reciprocal %97 {approx = true} : vector<4x8x1xf32> -> vector<4x8x1xf32>
    %99 = vector.broadcast %98 : vector<4x8x1xf32> to vector<4x8x8xf32>
    %100 = arith.mulf %95, %99 : vector<4x8x8xf32>
    %101 = arith.truncf %100 : vector<4x8x8xf32> to vector<4x8x8xbf16>
    "tpu.trace_start"() <{level = 10 : i32, message = "hqk,hkd->hqd"}> : () -> ()
    %cst_28 = arith.constant dense<0.000000e+00> : vector<4x8x8xf32>
    %102 = tpu.matmul %101, %89, %cst_28 {dimension_numbers = #tpu.dot_dimension_numbers<[2], [1], [1], [2], [0, 0, 0, 1, 1, 2], [0], [0]>} : vector<4x8x8xbf16>, vector<4x8x8xbf16>, vector<4x8x8xf32> -> vector<4x8x8xf32>
    "tpu.trace_stop"() : () -> ()
    %103 = arith.truncf %102 : vector<4x8x8xf32> to vector<4x8x8xbf16>
    "tpu.trace_start"() <{level = 10 : i32, message = "hqd,hde->hqe"}> : () -> ()
    %cst_29 = arith.constant dense<0.000000e+00> : vector<4x8x32xf32>
    %104 = tpu.matmul %103, %67, %cst_29 {dimension_numbers = #tpu.dot_dimension_numbers<[2], [1], [1], [2], [0, 0, 0, 1, 1, 2], [0], [0]>} : vector<4x8x8xbf16>, vector<4x8x32xbf16>, vector<4x8x32xf32> -> vector<4x8x32xf32>
    "tpu.trace_stop"() : () -> ()
    %cst_30 = arith.constant dense<0.000000e+00> : vector<8x32xf32>
    %105 = vector.multi_reduction <add>, %104, %cst_30 [0] : vector<4x8x32xf32> to vector<8x32xf32>
    %106 = tpu.concatenate %86, %105 in 0 : vector<8x32xf32>, vector<8x32xf32> -> vector<16x32xf32>
    %107 = arith.addf %1, %106 : vector<16x32xf32>
    %c0_31 = arith.constant 0 : index
    %c0_32 = arith.constant 0 : index
    %108 = vector.load %arg7[%c0_31, %c0_32] : memref<1x32xf32, #tpu.memory_space<vmem>>, vector<1x32xf32>
    %109 = vector.broadcast %108 : vector<1x32xf32> to vector<16x32xf32>
    %110 = arith.addf %107, %109 : vector<16x32xf32>
    %c0_33 = arith.constant 0 : index
    %c0_34 = arith.constant 0 : index
    %111 = vector.load %arg8[%c0_33, %c0_34] : memref<1x32xf32, #tpu.memory_space<vmem>>, vector<1x32xf32>
    %c0_35 = arith.constant 0 : index
    %c0_36 = arith.constant 0 : index
    %112 = vector.load %arg9[%c0_35, %c0_36] : memref<1x32xf32, #tpu.memory_space<vmem>>, vector<1x32xf32>
    %cst_37 = arith.constant dense<0.000000e+00> : vector<16xf32>
    %113 = vector.multi_reduction <add>, %110, %cst_37 [1] : vector<16x32xf32> to vector<16xf32>
    %114 = vector.shape_cast %113 : vector<16xf32> to vector<16x1xf32>
    %cst_38 = arith.constant 3.200000e+01 : f32
    %115 = vector.broadcast %cst_38 : f32 to vector<16x1xf32>
    %116 = arith.divf %114, %115 : vector<16x1xf32>
    %117 = vector.broadcast %116 : vector<16x1xf32> to vector<16x32xf32>
    %118 = arith.subf %110, %117 : vector<16x32xf32>
    %119 = arith.mulf %118, %118 : vector<16x32xf32>
    %cst_39 = arith.constant dense<0.000000e+00> : vector<16xf32>
    %120 = vector.multi_reduction <add>, %119, %cst_39 [1] : vector<16x32xf32> to vector<16xf32>
    %121 = vector.shape_cast %120 : vector<16xf32> to vector<16x1xf32>
    %cst_40 = arith.constant 3.200000e+01 : f32
    %122 = vector.broadcast %cst_40 : f32 to vector<16x1xf32>
    %123 = arith.divf %121, %122 : vector<16x1xf32>
    %124 = vector.broadcast %116 : vector<16x1xf32> to vector<16x32xf32>
    %125 = arith.subf %110, %124 : vector<16x32xf32>
    %cst_41 = arith.constant 9.99999974E-6 : f32
    %126 = vector.broadcast %cst_41 : f32 to vector<16x1xf32>
    %127 = arith.addf %123, %126 : vector<16x1xf32>
    %128 = math.rsqrt %127 : vector<16x1xf32>
    %129 = vector.broadcast %128 : vector<16x1xf32> to vector<16x32xf32>
    %130 = arith.mulf %125, %129 : vector<16x32xf32>
    %131 = vector.broadcast %111 : vector<1x32xf32> to vector<16x32xf32>
    %132 = arith.mulf %130, %131 : vector<16x32xf32>
    %133 = vector.broadcast %112 : vector<1x32xf32> to vector<16x32xf32>
    %134 = arith.addf %132, %133 : vector<16x32xf32>
    %135 = arith.truncf %134 : vector<16x32xf32> to vector<16x32xbf16>
    %c0_42 = arith.constant 0 : index
    %c0_43 = arith.constant 0 : index
    %136 = vector.load %arg10[%c0_42, %c0_43] : memref<32x128xbf16, #tpu.memory_space<vmem>>, vector<32x128xbf16>
    %cst_44 = arith.constant dense<0.000000e+00> : vector<16x128xf32>
    %137 = tpu.matmul %135, %136, %cst_44 {dimension_numbers = #tpu.dot_dimension_numbers<[1], [0], [0], [1], [0, 0, 1, 1], [], []>} : vector<16x32xbf16>, vector<32x128xbf16>, vector<16x128xf32> -> vector<16x128xf32>
    %c0_45 = arith.constant 0 : index
    %c0_46 = arith.constant 0 : index
    %138 = vector.load %arg11[%c0_45, %c0_46] : memref<1x128xf32, #tpu.memory_space<vmem>>, vector<1x128xf32>
    %139 = vector.broadcast %138 : vector<1x128xf32> to vector<16x128xf32>
    %140 = arith.addf %137, %139 : vector<16x128xf32>
    %cst_47 = arith.constant 1.702000e+00 : f32
    %141 = vector.broadcast %cst_47 : f32 to vector<16x128xf32>
    %142 = arith.mulf %141, %140 : vector<16x128xf32>
    %143 = arith.negf %142 : vector<16x128xf32>
    %144 = math.exp %143 : vector<16x128xf32>
    %cst_48 = arith.constant 1.000000e+00 : f32
    %145 = vector.broadcast %cst_48 : f32 to vector<16x128xf32>
    %146 = arith.addf %145, %144 : vector<16x128xf32>
    %147 = arith.divf %145, %146 : vector<16x128xf32>
    %148 = arith.mulf %140, %147 : vector<16x128xf32>
    %149 = arith.truncf %148 : vector<16x128xf32> to vector<16x128xbf16>
    %c0_49 = arith.constant 0 : index
    %c0_50 = arith.constant 0 : index
    %150 = vector.load %arg12[%c0_49, %c0_50] : memref<128x32xbf16, #tpu.memory_space<vmem>>, vector<128x32xbf16>
    %cst_51 = arith.constant dense<0.000000e+00> : vector<16x32xf32>
    %151 = tpu.matmul %149, %150, %cst_51 {dimension_numbers = #tpu.dot_dimension_numbers<[1], [0], [0], [1], [0, 0, 1, 1], [], []>} : vector<16x128xbf16>, vector<128x32xbf16>, vector<16x32xf32> -> vector<16x32xf32>
    %c0_52 = arith.constant 0 : index
    %c0_53 = arith.constant 0 : index
    %152 = vector.load %arg13[%c0_52, %c0_53] : memref<1x32xf32, #tpu.memory_space<vmem>>, vector<1x32xf32>
    %153 = vector.broadcast %152 : vector<1x32xf32> to vector<16x32xf32>
    %154 = arith.addf %151, %153 : vector<16x32xf32>
    %155 = arith.addf %110, %154 : vector<16x32xf32>
    %156 = vector.shape_cast %155 : vector<16x32xf32> to vector<2x8x32xf32>
    %c0_54 = arith.constant 0 : index
    %c0_55 = arith.constant 0 : index
    %c0_56 = arith.constant 0 : index
    %157 = vector.load %arg14[%c0_54, %c0_55, %c0_56] : memref<2x8x32xf32, #tpu.memory_space<vmem>>, vector<2x8x32xf32>
    tpu.vector_store %arg14[%c0_54, %c0_55, %c0_56], %156 {strides = array<i32>} : memref<2x8x32xf32, #tpu.memory_space<vmem>>, vector<2x8x32xf32>,
    return
  }
  func.func @transform_0(%arg0: i32) -> (i32, i32, i32) {
    %c0_i32 = arith.constant 0 : i32
    %c0_i32_0 = arith.constant 0 : i32
    %c0_i32_1 = arith.constant 0 : i32
    return %arg0, %c0_i32, %c0_i32_0 : i32, i32, i32
  }
  func.func @transform_1(%arg0: i32) -> (i32, i32) {
    %c0_i32 = arith.constant 0 : i32
    %c0_i32_0 = arith.constant 0 : i32
    %c0_i32_1 = arith.constant 0 : i32
    return %c0_i32, %c0_i32_0 : i32, i32
  }
  func.func @transform_2(%arg0: i32) -> (i32, i32) {
    %c0_i32 = arith.constant 0 : i32
    %c0_i32_0 = arith.constant 0 : i32
    %c0_i32_1 = arith.constant 0 : i32
    return %c0_i32, %c0_i32_0 : i32, i32
  }
  func.func @transform_3(%arg0: i32) -> (i32, i32) {
    %c0_i32 = arith.constant 0 : i32
    %c0_i32_0 = arith.constant 0 : i32
    %c0_i32_1 = arith.constant 0 : i32
    return %c0_i32, %c0_i32_0 : i32, i32
  }
  func.func @transform_4(%arg0: i32) -> (i32, i32) {
    %c0_i32 = arith.constant 0 : i32
    %c0_i32_0 = arith.constant 0 : i32
    %c0_i32_1 = arith.constant 0 : i32
    return %c0_i32, %c0_i32_0 : i32, i32
  }
  func.func @transform_5(%arg0: i32) -> (i32, i32, i32) {
    %c0_i32 = arith.constant 0 : i32
    %c0_i32_0 = arith.constant 0 : i32
    %c0_i32_1 = arith.constant 0 : i32
    %c0_i32_2 = arith.constant 0 : i32
    return %c0_i32, %c0_i32_0, %c0_i32_1 : i32, i32, i32
  }
  func.func @transform_6(%arg0: i32) -> (i32, i32) {
    %c0_i32 = arith.constant 0 : i32
    %c0_i32_0 = arith.constant 0 : i32
    %c0_i32_1 = arith.constant 0 : i32
    return %c0_i32, %c0_i32_0 : i32, i32
  }
  func.func @transform_7(%arg0: i32) -> (i32, i32) {
    %c0_i32 = arith.constant 0 : i32
    %c0_i32_0 = arith.constant 0 : i32
    %c0_i32_1 = arith.constant 0 : i32
    return %c0_i32, %c0_i32_0 : i32, i32
  }
  func.func @transform_8(%arg0: i32) -> (i32, i32) {
    %c0_i32 = arith.constant 0 : i32
    %c0_i32_0 = arith.constant 0 : i32
    %c0_i32_1 = arith.constant 0 : i32
    return %c0_i32, %c0_i32_0 : i32, i32
  }
  func.func @transform_9(%arg0: i32) -> (i32, i32) {
    %c0_i32 = arith.constant 0 : i32
    %c0_i32_0 = arith.constant 0 : i32
    %c0_i32_1 = arith.constant 0 : i32
    return %c0_i32, %c0_i32_0 : i32, i32
  }
  func.func @transform_10(%arg0: i32) -> (i32, i32) {
    %c0_i32 = arith.constant 0 : i32
    %c0_i32_0 = arith.constant 0 : i32
    %c0_i32_1 = arith.constant 0 : i32
    return %c0_i32, %c0_i32_0 : i32, i32
  }
  func.func @transform_11(%arg0: i32) -> (i32, i32) {
    %c0_i32 = arith.constant 0 : i32
    %c0_i32_0 = arith.constant 0 : i32
    %c0_i32_1 = arith.constant 0 : i32
    return %c0_i32, %c0_i32_0 : i32, i32
  }
  func.func @transform_12(%arg0: i32) -> (i32, i32) {
    %c0_i32 = arith.constant 0 : i32
    %c0_i32_0 = arith.constant 0 : i32
    %c0_i32_1 = arith.constant 0 : i32
    return %c0_i32, %c0_i32_0 : i32, i32
  }
  func.func @transform_13(%arg0: i32) -> (i32, i32, i32) {
    %c0_i32 = arith.constant 0 : i32
    %c0_i32_0 = arith.constant 0 : i32
    %c0_i32_1 = arith.constant 0 : i32
    return %arg0, %c0_i32, %c0_i32_0 : i32, i32, i32
  }
}

</mosaic_0001>

<bundles_post_ra>
// kernel: tpu_custom_call.1
= control target key start
LH: loop header
LB: loop body
LE: loop exit
PB: predicated region body
PF: predicated region fallthrough
CT: control target
= control target key end

     0   :  { %18 = vsyncpa [#allocation3], 0  ;;  %s3219_s0 = inlined_call_operand.hbm [shape: f32[2,8,32], index: 0, kind: input, shape index: {}]   ;;  %s3220_s1 = inlined_call_operand.hbm [shape: f32[1,32], index: 1, kind: input, shape index: {}]   ;;  %s3221_s2 = inlined_call_operand.hbm [shape: f32[1,32], index: 2, kind: input, shape index: {}]   ;;  %s3222_s3 = inlined_call_operand.hbm [shape: bf16[32,96], index: 3, kind: input, shape index: {}]   ;;  %s3223_s4 = inlined_call_operand.hbm [shape: f32[1,96], index: 4, kind: input, shape index: {}]   ;;  %s3224_s5 = inlined_call_operand.hbm [shape: bf16[4,8,32], index: 5, kind: input, shape index: {}]   ;;  %s3225_s6 = inlined_call_operand.hbm [shape: f32[1,32], index: 6, kind: input, shape index: {}]   ;;  %s3226_s7 = inlined_call_operand.hbm [shape: f32[1,32], index: 7, kind: input, shape index: {}]   ;;  %s3227_s8 = inlined_call_operand.hbm [shape: f32[1,32], index: 8, kind: input, shape index: {}]   ;;  %s3228_s9 = inlined_call_operand.hbm [shape: bf16[32,128], index: 9, kind: input, shape index: {}]   ;;  %s3229_s10 = inlined_call_operand.hbm [shape: f32[1,128], index: 10, kind: input, shape index: {}]   ;;  %s3230_s11 = inlined_call_operand.hbm [shape: bf16[128,32], index: 11, kind: input, shape index: {}]   ;;  %s3231_s12 = inlined_call_operand.hbm [shape: f32[1,32], index: 12, kind: input, shape index: {}]   ;;  %s3232_s13 = inlined_call_operand.hbm [shape: f32[2,8,32], index: 13, kind: output, shape index: {}]  }
   0x1   :  { %19 = vsyncpa [#allocation6], 0 }
   0x2   :  { %20 = vsyncpa [#allocation9], 0 }
   0x3   :  { %21 = vsyncpa [#allocation12], 0 }
   0x4   :  { %22 = vsyncpa [#allocation15], 0 }
   0x5   :  { %23 = vsyncpa [#allocation18], 0 }
   0x6   :  { %24 = vsyncpa [#allocation21], 0 }
   0x7   :  { %25 = vsyncpa [#allocation4], 0  ;;  %s2645_s25 = smov [#allocation5]   ;;  %s2646_s27 = smov [#allocation8]  }
   0x8   :  { %s44_s26 = sshll.u32 %s2645_s25, 4  ;;  %s63_s28 = sshll.u32 %s2646_s27, 4  ;;  %s45_s26 = int_to_ptr.vmem [resolvable:$true] %s44_s26  ;;  %s2739_s28 = int_to_ptr.vmem [resolvable:$true] %s63_s28 }
   0x9   :  { %s2321_s14 = scalar_lea.hbm %s3220_s1, 16 }
   0xa   :  { %p2322_p0 = scmp.ne.s32.totalorder %s3220_s1, %s2321_s14  ;;  %p2325_p1 = scmp.lt.u32.totalorder %s2321_s14, %s3220_s1 }
   0xc   :  { %p2327_p2 = pnand %p2325_p1, %p2322_p0 }
   0xe   :  { %2330 = shalt.err (!%p2327_p2)
}
   0xf   :  { %s2331_s19 = scalar_lea.vmem %s45_s26, 16  ;;  %s2335_s20 = scalar_lea.vmem %s45_s26, 32 }
  0x10   :  { %p2332_p3 = scmp.ne.s32.totalorder %s45_s26, %s2331_s19  ;;  %p2336_p4 = scmp.lt.s32.totalorder %s45_s26, %s45_s26 }
  0x11   :  { %p2337_p5 = scmp.lt.s32.totalorder %s2335_s20, %s2331_s19 }
  0x13   :  { %p2338_p6 = por %p2337_p5, %p2336_p4 }
  0x15   :  { %p2339_p7 = pnand %p2338_p6, %p2332_p3 }
  0x17   :  { %2342 = shalt.err (!%p2339_p7)
}
  0x18   :  { %47 = dma.hbm_to_vmem [thread:$0]  %s3220_s1, 16, %s45_s26, [#allocation6]  }
  0x19   :  { %s2343_s25 = scalar_lea.hbm %s3222_s3, 256 }
  0x1a   :  { %p2344_p8 = scmp.ne.s32.totalorder %s3222_s3, %s2343_s25  ;;  %p2347_p9 = scmp.lt.u32.totalorder %s2343_s25, %s3222_s3 }
  0x1c   :  { %p2349_p10 = pnand %p2347_p9, %p2344_p8 }
  0x1e   :  { %2352 = shalt.err (!%p2349_p10)
}
  0x1f   :  { %s2353_s15 = scalar_lea.vmem %s2739_s28, 256  ;;  %p2358_p12 = scmp.lt.s32.totalorder %s2739_s28, %s2739_s28 }
  0x20   :  { %p2354_p11 = scmp.ne.s32.totalorder %s2739_s28, %s2353_s15  ;;  %p2359_p13 = scmp.lt.s32.totalorder %s2353_s15, %s2353_s15 }
  0x22   :  { %p2360_p0 = por %p2359_p13, %p2358_p12 }
  0x24   :  { %p2361_p1 = pnand %p2360_p0, %p2354_p11 }
  0x26   :  { %2364 = shalt.err (!%p2361_p1)
}
  0x27   :  { %s2647_s1 = smov 64   ;;  %s2648_s26 = smov 4  }
  0x28   :  { %69 = dma.hbm_to_vmem [thread:$0]  %s3222_s3, 256, %s2739_s28, [#allocation9], %s2647_s1, %s2647_s1, %s2648_s26  }
  0x29   :  { %s2649_s18 = smov [#allocation11]   ;;  %s2650_s20 = smov [#allocation14]  }
  0x2a   :  { %s85_s19 = sshll.u32 %s2649_s18, 4  ;;  %s108_s21 = sshll.u32 %s2650_s20, 4  ;;  %s86_s19 = int_to_ptr.vmem [resolvable:$true] %s85_s19  ;;  %s109_s21 = int_to_ptr.vmem [resolvable:$true] %s108_s21 }
  0x2b   :  { %s2365_s24 = scalar_lea.hbm %s3224_s5, 256 }
  0x2c   :  { %p2366_p2 = scmp.ne.s32.totalorder %s3224_s5, %s2365_s24  ;;  %p2369_p3 = scmp.lt.u32.totalorder %s2365_s24, %s3224_s5 }
  0x2e   :  { %p2371_p4 = pnand %p2369_p3, %p2366_p2 }
  0x30   :  { %2374 = shalt.err (!%p2371_p4)
}
  0x31   :  { %s2375_s3 = scalar_lea.vmem %s86_s19, 256  ;;  %p2380_p6 = scmp.lt.s32.totalorder %s86_s19, %s86_s19 }
  0x32   :  { %p2376_p5 = scmp.ne.s32.totalorder %s86_s19, %s2375_s3  ;;  %p2381_p7 = scmp.lt.s32.totalorder %s2375_s3, %s2375_s3 }
  0x34   :  { %p2382_p8 = por %p2381_p7, %p2380_p6 }
  0x36   :  { %p2383_p9 = pnand %p2382_p8, %p2376_p5 }
  0x38   :  { %2386 = shalt.err (!%p2383_p9)
}
  0x39   :  { %91 = dma.hbm_to_vmem [thread:$0]  %s3224_s5, 256, %s86_s19, [#allocation12], %s2647_s1, %s2647_s1, %s2648_s26  }
  0x3a   :  { %s2387_s17 = scalar_lea.hbm %s3226_s7, 16 }
  0x3b   :  { %p2388_p10 = scmp.ne.s32.totalorder %s3226_s7, %s2387_s17  ;;  %p2391_p11 = scmp.lt.u32.totalorder %s2387_s17, %s3226_s7 }
  0x3d   :  { %p2393_p12 = pnand %p2391_p11, %p2388_p10 }
  0x3f   :  { %2396 = shalt.err (!%p2393_p12)
}
  0x40   :  { %s2397_s24 = scalar_lea.vmem %s109_s21, 16  ;;  %s2401_s25 = scalar_lea.vmem %s109_s21, 32 }
  0x41   :  { %p2398_p13 = scmp.ne.s32.totalorder %s109_s21, %s2397_s24  ;;  %p2402_p0 = scmp.lt.s32.totalorder %s109_s21, %s109_s21 }
  0x42   :  { %p2403_p1 = scmp.lt.s32.totalorder %s2401_s25, %s2397_s24 }
  0x44   :  { %p2404_p2 = por %p2403_p1, %p2402_p0 }
  0x46   :  { %p2405_p3 = pnand %p2404_p2, %p2398_p13 }
  0x48   :  { %2408 = shalt.err (!%p2405_p3)
}
  0x49   :  { %111 = dma.hbm_to_vmem [thread:$0]  %s3226_s7, 16, %s109_s21, [#allocation15]  }
  0x4a   :  { %s2651_s27 = smov [#allocation17]   ;;  %s2652_s30 = smov [#allocation20]  }
  0x4b   :  { %s127_s29 = sshll.u32 %s2651_s27, 4  ;;  %s149_s3 = sshll.u32 %s2652_s30, 4  ;;  %s128_s29 = int_to_ptr.vmem [resolvable:$true] %s127_s29  ;;  %s2800_s3 = int_to_ptr.vmem [resolvable:$true] %s149_s3 }
  0x4c   :  { %s2409_s15 = scalar_lea.hbm %s3228_s9, 256 }
  0x4d   :  { %p2410_p4 = scmp.ne.s32.totalorder %s3228_s9, %s2409_s15  ;;  %p2413_p5 = scmp.lt.u32.totalorder %s2409_s15, %s3228_s9 }
  0x4f   :  { %p2415_p6 = pnand %p2413_p5, %p2410_p4 }
  0x51   :  { %2418 = shalt.err (!%p2415_p6)
}
  0x52   :  { %s2419_s7 = scalar_lea.vmem %s128_s29, 256  ;;  %p2424_p8 = scmp.lt.s32.totalorder %s128_s29, %s128_s29 }
  0x53   :  { %p2420_p7 = scmp.ne.s32.totalorder %s128_s29, %s2419_s7  ;;  %p2425_p9 = scmp.lt.s32.totalorder %s2419_s7, %s2419_s7 }
  0x55   :  { %p2426_p10 = por %p2425_p9, %p2424_p8 }
  0x57   :  { %p2427_p11 = pnand %p2426_p10, %p2420_p7 }
  0x59   :  { %2430 = shalt.err (!%p2427_p11)
}
  0x5a   :  { %133 = dma.hbm_to_vmem [thread:$0]  %s3228_s9, 256, %s128_s29, [#allocation18], %s2647_s1, %s2647_s1, %s2648_s26  }
  0x5b   :  { %s2431_s25 = scalar_lea.hbm %s3230_s11, 1024 }
  0x5c   :  { %p2432_p12 = scmp.ne.s32.totalorder %s3230_s11, %s2431_s25  ;;  %p2435_p13 = scmp.lt.u32.totalorder %s2431_s25, %s3230_s11 }
  0x5e   :  { %p2437_p0 = pnand %p2435_p13, %p2432_p12 }
  0x60   :  { %2440 = shalt.err (!%p2437_p0)
}
  0x61   :  { %s2441_s28 = scalar_lea.vmem %s2800_s3, 1024  ;;  %p2446_p2 = scmp.lt.s32.totalorder %s2800_s3, %s2800_s3 }
  0x62   :  { %p2442_p1 = scmp.ne.s32.totalorder %s2800_s3, %s2441_s28  ;;  %p2447_p3 = scmp.lt.s32.totalorder %s2441_s28, %s2441_s28 }
  0x64   :  { %p2448_p4 = por %p2447_p3, %p2446_p2 }
  0x66   :  { %p2449_p5 = pnand %p2448_p4, %p2442_p1 }
  0x68   :  { %2452 = shalt.err (!%p2449_p5)
}
  0x69   :  { %155 = dma.hbm_to_vmem [thread:$0]  %s3230_s11, 1024, %s2800_s3, [#allocation21], %s2647_s1, %s2647_s1, %s2648_s26  }
  0x6a   :  { %s2653_s14 = smov [#allocation2]   ;;  %s2453_s18 = scalar_lea.hbm %s3219_s0, 256 }
  0x6b   :  { %s31_s15 = sshll.u32 %s2653_s14, 4  ;;  %p2454_p6 = scmp.ne.s32.totalorder %s3219_s0, %s2453_s18  ;;  %s32_s15 = int_to_ptr.vmem [resolvable:$true] %s31_s15 }
  0x6c   :  { %p2457_p7 = scmp.lt.u32.totalorder %s2453_s18, %s3219_s0 }
  0x6e   :  { %p2459_p8 = pnand %p2457_p7, %p2454_p6 }
  0x70   :  { %2462 = shalt.err (!%p2459_p8)
}
  0x71   :  { %s2463_s23 = scalar_lea.vmem %s32_s15, 256  ;;  %p2468_p10 = scmp.lt.s32.totalorder %s32_s15, %s32_s15 }
  0x72   :  { %p2464_p9 = scmp.ne.s32.totalorder %s32_s15, %s2463_s23  ;;  %p2469_p11 = scmp.lt.s32.totalorder %s2463_s23, %s2463_s23 }
  0x74   :  { %p2470_p12 = por %p2469_p11, %p2468_p10 }
  0x76   :  { %p2471_p13 = pnand %p2470_p12, %p2464_p9 }
  0x78   :  { %2474 = shalt.err (!%p2471_p13)
}
  0x79   :  { %s2654_s11 = smov 128   ;;  %s2655_s26 = smov 8  }
  0x7a   :  { %37 = dma.hbm_to_vmem [thread:$0]  %s3219_s0, 256, %s32_s15, [#allocation3], %s2654_s11, %s2654_s11, %s2655_s26  }
  0x7b   :  { %s2656_s25 = smov [#allocation7]   ;;  %s2657_s19 = smov [#allocation10]  }
  0x7c   :  { %s54_s5 = sshll.u32 %s2656_s25, 4  ;;  %s76_s27 = sshll.u32 %s2657_s19, 4  ;;  %s55_s5 = int_to_ptr.vmem [resolvable:$true] %s54_s5  ;;  %s77_s27 = int_to_ptr.vmem [resolvable:$true] %s76_s27 }
  0x7d   :  { %s2475_s9 = scalar_lea.hbm %s3221_s2, 16 }
  0x7e   :  { %p2476_p0 = scmp.ne.s32.totalorder %s3221_s2, %s2475_s9  ;;  %p2479_p1 = scmp.lt.u32.totalorder %s2475_s9, %s3221_s2 }
  0x80   :  { %p2481_p2 = pnand %p2479_p1, %p2476_p0 }
  0x82   :  { %2484 = shalt.err (!%p2481_p2)
}
  0x83   :  { %s2485_s0 = scalar_lea.vmem %s55_s5, 16  ;;  %s2489_s15 = scalar_lea.vmem %s55_s5, 32 }
  0x84   :  { %p2486_p3 = scmp.ne.s32.totalorder %s55_s5, %s2485_s0  ;;  %p2490_p4 = scmp.lt.s32.totalorder %s55_s5, %s55_s5 }
  0x85   :  { %p2491_p5 = scmp.lt.s32.totalorder %s2489_s15, %s2485_s0 }
  0x87   :  { %p2492_p6 = por %p2491_p5, %p2490_p4 }
  0x89   :  { %p2493_p7 = pnand %p2492_p6, %p2486_p3 }
  0x8b   :  { %2496 = shalt.err (!%p2493_p7)
}
  0x8c   :  { %57 = dma.hbm_to_vmem [thread:$0]  %s3221_s2, 16, %s55_s5, [#allocation6]  }
  0x8d   :  { %s2497_s22 = scalar_lea.hbm %s3223_s4, 16 }
  0x8e   :  { %p2498_p8 = scmp.ne.s32.totalorder %s3223_s4, %s2497_s22  ;;  %p2501_p9 = scmp.lt.u32.totalorder %s2497_s22, %s3223_s4 }
  0x90   :  { %p2503_p10 = pnand %p2501_p9, %p2498_p8 }
  0x92   :  { %2506 = shalt.err (!%p2503_p10)
}
  0x93   :  { %s2507_s19 = scalar_lea.vmem %s77_s27, 16  ;;  %s2511_s30 = scalar_lea.vmem %s77_s27, 32 }
  0x94   :  { %p2508_p11 = scmp.ne.s32.totalorder %s77_s27, %s2507_s19  ;;  %p2512_p12 = scmp.lt.s32.totalorder %s77_s27, %s77_s27 }
  0x95   :  { %p2513_p13 = scmp.lt.s32.totalorder %s2511_s30, %s2507_s19 }
  0x97   :  { %p2514_p0 = por %p2513_p13, %p2512_p12 }
  0x99   :  { %p2515_p1 = pnand %p2514_p0, %p2508_p11 }
  0x9b   :  { %2518 = shalt.err (!%p2515_p1)
}
  0x9c   :  { %79 = dma.hbm_to_vmem [thread:$0]  %s3223_s4, 16, %s77_s27, [#allocation9]  }
  0x9d   :  { %s2658_s28 = smov [#allocation13]   ;;  %s2659_s29 = smov [#allocation16]  }
  0x9e   :  { %s98_s9 = sshll.u32 %s2658_s28, 4  ;;  %s118_s14 = sshll.u32 %s2659_s29, 4  ;;  %s99_s9 = int_to_ptr.vmem [resolvable:$true] %s98_s9  ;;  %s119_s14 = int_to_ptr.vmem [resolvable:$true] %s118_s14 }
  0x9f   :  { %s2519_s0 = scalar_lea.hbm %s3225_s6, 16 }
  0xa0   :  { %p2520_p2 = scmp.ne.s32.totalorder %s3225_s6, %s2519_s0  ;;  %p2523_p3 = scmp.lt.u32.totalorder %s2519_s0, %s3225_s6 }
  0xa2   :  { %p2525_p4 = pnand %p2523_p3, %p2520_p2 }
  0xa4   :  { %2528 = shalt.err (!%p2525_p4)
}
  0xa5   :  { %s2529_s4 = scalar_lea.vmem %s99_s9, 16  ;;  %s2533_s27 = scalar_lea.vmem %s99_s9, 32 }
  0xa6   :  { %p2530_p5 = scmp.ne.s32.totalorder %s99_s9, %s2529_s4  ;;  %p2534_p6 = scmp.lt.s32.totalorder %s99_s9, %s99_s9 }
  0xa7   :  { %p2535_p7 = scmp.lt.s32.totalorder %s2533_s27, %s2529_s4 }
  0xa9   :  { %p2536_p8 = por %p2535_p7, %p2534_p6 }
  0xab   :  { %p2537_p9 = pnand %p2536_p8, %p2530_p5 }
  0xad   :  { %2540 = shalt.err (!%p2537_p9)
}
  0xae   :  { %101 = dma.hbm_to_vmem [thread:$0]  %s3225_s6, 16, %s99_s9, [#allocation12]  }
  0xaf   :  { %s2541_s24 = scalar_lea.hbm %s3227_s8, 16 }
  0xb0   :  { %p2542_p10 = scmp.ne.s32.totalorder %s3227_s8, %s2541_s24  ;;  %p2545_p11 = scmp.lt.u32.totalorder %s2541_s24, %s3227_s8 }
  0xb2   :  { %p2547_p12 = pnand %p2545_p11, %p2542_p10 }
  0xb4   :  { %2550 = shalt.err (!%p2547_p12)
}
  0xb5   :  { %s2551_s5 = scalar_lea.vmem %s119_s14, 16  ;;  %s2555_s28 = scalar_lea.vmem %s119_s14, 32 }
  0xb6   :  { %p2552_p13 = scmp.ne.s32.totalorder %s119_s14, %s2551_s5  ;;  %p2556_p0 = scmp.lt.s32.totalorder %s119_s14, %s119_s14 }
  0xb7   :  { %p2557_p1 = scmp.lt.s32.totalorder %s2555_s28, %s2551_s5 }
  0xb9   :  { %p2558_p2 = por %p2557_p1, %p2556_p0 }
  0xbb   :  { %p2559_p3 = pnand %p2558_p2, %p2552_p13 }
  0xbd   :  { %2562 = shalt.err (!%p2559_p3)
}
  0xbe   :  { %121 = dma.hbm_to_vmem [thread:$0]  %s3227_s8, 16, %s119_s14, [#allocation15]  }
  0xbf   :  { %s2660_s29 = smov [#allocation19]   ;;  %s2661_s17 = smov [#allocation22]  }
  0xc0   :  { %s140_s16 = sshll.u32 %s2660_s29, 4  ;;  %s162_s0 = sshll.u32 %s2661_s17, 4  ;;  %s141_s16 = int_to_ptr.vmem [resolvable:$true] %s140_s16  ;;  %s163_s0 = int_to_ptr.vmem [resolvable:$true] %s162_s0 }
  0xc1   :  { %s2563_s20 = scalar_lea.hbm %s3229_s10, 16 }
  0xc2   :  { %p2564_p4 = scmp.ne.s32.totalorder %s3229_s10, %s2563_s20  ;;  %p2567_p5 = scmp.lt.u32.totalorder %s2563_s20, %s3229_s10 }
  0xc4   :  { %p2569_p6 = pnand %p2567_p5, %p2564_p4 }
  0xc6   :  { %2572 = shalt.err (!%p2569_p6)
}
  0xc7   :  { %s2573_s8 = scalar_lea.vmem %s141_s16, 16  ;;  %s2577_s14 = scalar_lea.vmem %s141_s16, 32 }
  0xc8   :  { %p2574_p7 = scmp.ne.s32.totalorder %s141_s16, %s2573_s8  ;;  %p2578_p8 = scmp.lt.s32.totalorder %s141_s16, %s141_s16 }
  0xc9   :  { %p2579_p9 = scmp.lt.s32.totalorder %s2577_s14, %s2573_s8 }
  0xcb   :  { %p2580_p10 = por %p2579_p9, %p2578_p8 }
  0xcd   :  { %p2581_p11 = pnand %p2580_p10, %p2574_p7 }
  0xcf   :  { %2584 = shalt.err (!%p2581_p11)
}
  0xd0   :  { %143 = dma.hbm_to_vmem [thread:$0]  %s3229_s10, 16, %s141_s16, [#allocation18]  }
  0xd1   :  { %s2585_s25 = scalar_lea.hbm %s3231_s12, 16 }
  0xd2   :  { %p2586_p12 = scmp.ne.s32.totalorder %s3231_s12, %s2585_s25  ;;  %p2589_p13 = scmp.lt.u32.totalorder %s2585_s25, %s3231_s12 }
  0xd4   :  { %p2591_p0 = pnand %p2589_p13, %p2586_p12 }
  0xd6   :  { %2594 = shalt.err (!%p2591_p0)
}
  0xd7   :  { %s2595_s28 = scalar_lea.vmem %s163_s0, 16  ;;  %s2599_s6 = scalar_lea.vmem %s163_s0, 32 }
  0xd8   :  { %p2596_p1 = scmp.ne.s32.totalorder %s163_s0, %s2595_s28  ;;  %p2600_p2 = scmp.lt.s32.totalorder %s163_s0, %s163_s0 }
  0xd9   :  { %p2601_p3 = scmp.lt.s32.totalorder %s2599_s6, %s2595_s28 }
  0xdb   :  { %p2602_p4 = por %p2601_p3, %p2600_p2 }
  0xdd   :  { %p2603_p5 = pnand %p2602_p4, %p2596_p1 }
  0xdf   :  { %2606 = shalt.err (!%p2603_p5)
}
  0xe0   :  { %165 = dma.hbm_to_vmem [thread:$0]  %s3231_s12, 16, %s163_s0, [#allocation21]  }
  0xe1   :  { %2629 = dma.done.wait [#allocation3], 256  }
  0xe2   :  { %2630 = vsyncadd [#allocation3], 4294967040 }
  0xe3   :  { %2631 = dma.done.wait [#allocation6], 32  }
  0xe4   :  { %2632 = vsyncadd [#allocation6], 4294967264 }
  0xe5   :  { %2633 = dma.done.wait [#allocation9], 272  }
  0xe6   :  { %2634 = vsyncadd [#allocation9], 4294967024 }
  0xe7   :  { %2635 = dma.done.wait [#allocation12], 272  }
  0xe8   :  { %2636 = vsyncadd [#allocation12], 4294967024 }
  0xe9   :  { %2637 = dma.done.wait [#allocation15], 32  }
  0xea   :  { %2638 = vsyncadd [#allocation15], 4294967264 }
  0xeb   :  { %2639 = dma.done.wait [#allocation18], 272  }
  0xec   :  { %2640 = vsyncadd [#allocation18], 4294967024 }
  0xed   :  { %2641 = dma.done.wait [#allocation21], 1040  }
  0xee   :  { %2642 = vsyncadd [#allocation21], 4294966256  ;;  %vm210_vm0 = vcmask 261120   ;;  %v2924_v0 = vld [vmem:[#allocation2] sm:$0xff]  ;;  %v207_v1 = vld [vmem:[#allocation2 + $0x8] sm:$0xff]  ;;  %v2662_v15 = vmov 0.0  }
  0xef   :  { %v211_v2 = vsel %vm210_vm0, %v2924_v0, 0.0  ;;  %v214_v3 = vsel %vm210_vm0, %v207_v1, 0.0  ;;  %v2260_v14 = vld [vmem:[#allocation8] sm:$0xff]   ;;  %2026 = vmatprep.subr.bf16.mxu1 %v2662_v15  ;;  %2052 = vmatprep.subr.bf16.mxu0 %v2662_v15  ;;  %v2261_v16 = vld [vmem:[#allocation8 + $0x8] sm:$0xff]   ;;  %vm2663_vm1 = vmmov 0   ;;  %s2664_s12 = smov 112  }
  0xf0   :  { %212 = vadd.xlane.f32.xlu0 %v211_v2  ;;  %2027 = vmatpush3.bf16.msra.mxu1 %v2260_v14  ;;  %v1915_v25 = vld [vmem:[#allocation5] ss:$0 sm:$0xff]  ;;  %v1916_v29 = vld [vmem:[#allocation7] ss:$0 sm:$0xff]  ;;  %v1917_v34 = vld [vmem:[#allocation10] ss:$0 sm:$0xff] }
  0xf1   :  { %2030 = vmatprep.mubr.msk.bf16.mxu1 %vm2663_vm1, %v2662_v15  ;;  %2028 = vmatprep.subr.bf16.mxu1 %v2662_v15  ;;  %s2665_s29 = smov 120   ;;  %s2666_s16 = smov 104   ;;  %vm379_vm2 = vcmask 64512   ;;  %vm626_vm3 = vcmask 1043456  }
  0xf2   :  { %2054 = vmatprep.mubr.msk.bf16.mxu0 %vm2663_vm1, %v2662_v15  ;;  %s2667_s17 = smov 96  }
  0xf4   :  { %215 = vadd.xlane.f32.xlu0 %v214_v3  ;;  %2029 = vmatpush3.bf16.msra.mxu1 %v2261_v16 }
  0xf5   :  { %2034 = vmatprep.subr.bf16.mxu1 %v2662_v15 }
 0x17d   :  { %v213_v4 = vpop.xlane.xlu0 %212 }
 0x17e   :  { %v218_v5 = vmul.f32 0.03125, %v213_v4 }
 0x180   :  { %v220_v6 = vsub.f32 %v2924_v0, %v218_v5 }
 0x181   :  { %v216_v7 = vpop.xlane.xlu0 %215 }
 0x182   :  { %v219_v8 = vmul.f32 0.03125, %v216_v7  ;;  %v222_v9 = vmul.f32 %v220_v6, %v220_v6 }
 0x184   :  { %v221_v10 = vsub.f32 %v207_v1, %v219_v8  ;;  %v224_v11 = vsel %vm210_vm0, %v222_v9, 0.0 }
 0x185   :  { %225 = vadd.xlane.f32.xlu1 %v224_v11 }
 0x186   :  { %v223_v12 = vmul.f32 %v221_v10, %v221_v10 }
 0x188   :  { %v227_v13 = vsel %vm210_vm0, %v223_v12, 0.0 }
 0x189   :  { %228 = vadd.xlane.f32.xlu1 %v227_v13 }
 0x212   :  { %v226_v17 = vpop.xlane.xlu1 %225 }
 0x213   :  { %v230_v18 = vmul.f32 0.03125, %v226_v17 }
 0x215   :  { %v232_v19 = vadd.f32 1e-05, %v230_v18 }
 0x216   :  { %v229_v20 = vpop.xlane.xlu1 %228 }
 0x217   :  { %2272 = vrsqrt.f32 %v232_v19  ;;  %v231_v21 = vmul.f32 0.03125, %v229_v20 }
 0x219   :  { %v233_v22 = vadd.f32 1e-05, %v231_v21 }
 0x21b   :  { %2274 = vrsqrt.f32 %v233_v22 }
 0x221   :  { %v2273_v23 = vpop.eup %2272 }
 0x222   :  { %v236_v24 = vmul.f32 %v2273_v23, %v220_v6 }
 0x224   :  { %v244_v28 = vmul.f32 %v1915_v25, %v236_v24 }
 0x225   :  { %v2275_v26 = vpop.eup %2274 }
 0x226   :  { %v237_v27 = vmul.f32 %v2275_v26, %v221_v10  ;;  %v252_v31 = vadd.f32 %v1916_v29, %v244_v28 }
 0x228   :  { %v245_v30 = vmul.f32 %v1915_v25, %v237_v27 }
 0x22a   :  { %v253_v32 = vadd.f32 %v1916_v29, %v245_v30 }
 0x22c   :  { %v254_v33 = vpack.c.bf16 %v253_v32, %v252_v31 }
 0x22e   :  { %2031 = vmatmul.mubr.msk.bf16.vlgmr.msra.gmra.mrb[0].mxu1 %vm210_vm0, %v254_v33 }
 0x22f   :  { %2036 = vmatprep.mubr.msk.bf16.mxu1 %vm2663_vm1, %v2662_v15 }
 0x301   :  { %v315_v35 = vpop.f32.mrb[0].mxu1 }
 0x302   :  { %v2032_v36 = vpop.f32.mrb[1].mxu1  ;;  %v316_v37 = vadd.f32 %v1917_v34, %v315_v35 }
 0x303   :  { %v318_v38 = vpop.f32.mrb[2].mxu1 }
 0x304   :  { %v319_v39 = vadd.f32 %v1917_v34, %v318_v38  ;;  %v2033_v40 = vpop.f32.mrb[3].mxu1  ;;  %v322_v43 = vmul.f32 0.35355338, %v316_v37 }
 0x306   :  { %v2235_v41 = vpack.i.bf16 %v319_v39, %v316_v37  ;;  %v2943_v42 = vpack.c.bf16 %v319_v39, %v316_v37  ;;  %v323_v44 = vmul.f32 0.35355338, %v319_v39 }
 0x308   :  { %2236 = vrot.lane.b32.xlu1 %v2235_v41, %s2664_s12  ;;  %2231 = vrot.lane.b32.xlu0 %v2235_v41, %s2665_s29  ;;  %v2245_v45 = vpack.i.bf16 %v323_v44, %v322_v43  ;;  %v2946_v46 = vpack.c.bf16 %v323_v44, %v322_v43 }
 0x30c   :  { %2241 = vrot.lane.b32.xlu1 %v2235_v41, %s2666_s16 }
 0x310   :  { %377 = vrot.lane.b32.xlu1 %v2943_v42, %s2667_s17 }
 0x314   :  { %2246 = vrot.lane.b32.xlu1 %v2245_v45, %s2665_s29 }
 0x37a   :  { %v2237_v47 = vpop.permute.xlu1 %2236  ;;  %v2232_v48 = vpop.permute.xlu0 %2231 }
 0x37b   :  { %v2234_v49 = vunpack.i.h.bf16 %v2232_v48  ;;  %v2233_v50 = vunpack.i.l.bf16 %v2232_v48  ;;  %v2239_v51 = vunpack.i.h.bf16 %v2237_v47  ;;  %v2238_v52 = vunpack.i.l.bf16 %v2237_v47 }
 0x37d   :  { %v2950_v53 = vpack.c.bf16 %v2234_v49, %v2233_v50  ;;  %v2954_v57 = vpack.c.bf16 %v2239_v51, %v2238_v52 }
 0x37e   :  { %v2242_v54 = vpop.permute.xlu1 %2241 }
 0x37f   :  { %v2244_v55 = vunpack.i.h.bf16 %v2242_v54  ;;  %v2243_v56 = vunpack.i.l.bf16 %v2242_v54  ;;  %427 = vrot.lane.b32.xlu0 %v2950_v53, %s2667_s17 }
 0x381   :  { %v2956_v58 = vpack.c.bf16 %v2244_v55, %v2243_v56 }
 0x382   :  { %v378_v59 = vpop.permute.xlu1 %377 }
 0x383   :  { %v384_v60 = vsel %vm379_vm2, %v378_v59, 0  ;;  %476 = vrot.lane.b32.xlu0 %v2954_v57, %s2667_s17  ;;  %525 = vrot.lane.b32.xlu1 %v2956_v58, %s2667_s17 }
 0x384   :  { %2035 = vmatpush3.bf16.xpose.msra.mxu1 %v384_v60 }
 0x385   :  { %2040 = vmatprep.subr.bf16.mxu1 %v2662_v15 }
 0x386   :  { %v2247_v61 = vpop.permute.xlu1 %2246 }
 0x387   :  { %2251 = vrot.lane.b32.xlu0 %v2245_v45, %s2664_s12  ;;  %2256 = vrot.lane.b32.xlu1 %v2245_v45, %s2666_s16  ;;  %v2249_v1 = vunpack.i.h.bf16 %v2247_v61  ;;  %v2248_v2 = vunpack.i.l.bf16 %v2247_v61 }
 0x389   :  { %v2972_v6 = vpack.c.bf16 %v2249_v1, %v2248_v2  ;;  %v1062_v1 = vrot.slane %v2950_v53, 4  ;;  %v1164_v2 = vrot.slane %v2956_v58, 4 }
 0x38b   :  { %2037 = vmatmul.mubr.msk.bf16.vlgmr.msra.gmra.mrb[4].mxu1 %vm379_vm2, %v2946_v46 }
 0x38c   :  { %2042 = vmatprep.mubr.msk.bf16.mxu1 %vm2663_vm1, %v2662_v15 }
 0x3f1   :  { %v428_v62 = vpop.permute.xlu0 %427 }
 0x3f2   :  { %v433_v63 = vsel %vm379_vm2, %v428_v62, 0  ;;  %v1011_v62 = vrot.slane %v2943_v42, 4 }
 0x3f3   :  { %2041 = vmatpush3.bf16.xpose.msra.mxu1 %v433_v63  ;;  %v1113_v63 = vrot.slane %v2954_v57, 4 }
 0x3f4   :  { %2046 = vmatprep.subr.bf16.mxu1 %v2662_v15 }
 0x3f5   :  { %v477_v3 = vpop.permute.xlu0 %476  ;;  %v526_v4 = vpop.permute.xlu1 %525 }
 0x3f6   :  { %v531_v5 = vsel %vm379_vm2, %v526_v4, 0  ;;  %v482_v9 = vsel %vm379_vm2, %v477_v3, 0 }
 0x3f7   :  { %2053 = vmatpush3.bf16.xpose.msra.mxu0 %v531_v5 }
 0x3f8   :  { %2064 = vmatprep.subr.bf16.mxu0 %v2662_v15 }
 0x3f9   :  { %v2252_v7 = vpop.permute.xlu0 %2251  ;;  %v2257_v8 = vpop.permute.xlu1 %2256 }
 0x3fa   :  { %v2259_v10 = vunpack.i.h.bf16 %v2257_v8  ;;  %v2258_v11 = vunpack.i.l.bf16 %v2257_v8  ;;  %2043 = vmatmul.mubr.msk.bf16.vlgmr.msra.gmra.mrb[8].mxu1 %vm379_vm2, %v2972_v6  ;;  %v2254_v12 = vunpack.i.h.bf16 %v2252_v7  ;;  %v2253_v13 = vunpack.i.l.bf16 %v2252_v7 }
 0x3fb   :  { %2047 = vmatpush3.bf16.xpose.msra.mxu1 %v482_v9  ;;  %2048 = vmatprep.mubr.msk.bf16.mxu1 %vm2663_vm1, %v2662_v15 }
 0x3fc   :  { %v2980_v14 = vpack.c.bf16 %v2259_v10, %v2258_v11  ;;  %2058 = vmatprep.subr.bf16.mxu1 %v2662_v15  ;;  %v2987_v16 = vpack.c.bf16 %v2254_v12, %v2253_v13 }
 0x3fe   :  { %2055 = vmatmul.mubr.msk.bf16.vlgmr.msra.gmra.mrb[0].mxu0 %vm379_vm2, %v2980_v14 }
 0x3ff   :  { %2066 = vmatprep.mubr.msk.bf16.mxu0 %vm2663_vm1, %v2662_v15 }
 0x402   :  { %2049 = vmatmul.mubr.msk.bf16.vlgmr.msra.gmra.mrb[12].mxu1 %vm379_vm2, %v2987_v16 }
 0x403   :  { %2060 = vmatprep.mubr.msk.bf16.mxu1 %vm2663_vm1, %v2662_v15 }
 0x45e   :  { %v420_v17 = vpop.f32.mrb[4].mxu1 }
 0x45f   :  { %v2038_v18 = vpop.f32.mrb[5].mxu1  ;;  %v573_v19 = vsel %vm379_vm2, %v420_v17, -inf }
 0x460   :  { %574 = vmax.xlane.f32.xlu0 %v573_v19  ;;  %v423_v20 = vpop.f32.mrb[6].mxu1 }
 0x461   :  { %v2039_v21 = vpop.f32.mrb[7].mxu1 }
 0x4cd   :  { %v469_v22 = vpop.f32.mrb[8].mxu1 }
 0x4ce   :  { %v2044_v23 = vpop.f32.mrb[9].mxu1  ;;  %v576_v24 = vsel %vm379_vm2, %v469_v22, -inf }
 0x4cf   :  { %577 = vmax.xlane.f32.xlu1 %v576_v24  ;;  %v472_v25 = vpop.f32.mrb[10].mxu1  ;;  %v372_v24 = vld [vmem:[#allocation11] sm:$0xf] }
 0x4d0   :  { %v2045_v26 = vpop.f32.mrb[11].mxu1 }
 0x4d1   :  { %v567_v27 = vpop.f32.mrb[0].mxu0 }
 0x4d2   :  { %v2056_v28 = vpop.f32.mrb[1].mxu0  ;;  %v582_v36 = vsel %vm379_vm2, %v567_v27, -inf }
 0x4d3   :  { %v570_v29 = vpop.f32.mrb[2].mxu0  ;;  %v3038_v28 = vsel %vm626_vm3, %v372_v24, 0 }
 0x4d4   :  { %v2057_v30 = vpop.f32.mrb[3].mxu0 }
 0x4d5   :  { %v518_v31 = vpop.f32.mrb[12].mxu1 }
 0x4d6   :  { %v2050_v32 = vpop.f32.mrb[13].mxu1  ;;  %v579_v33 = vsel %vm379_vm2, %v518_v31, -inf }
 0x4d7   :  { %580 = vmax.xlane.f32.xlu0 %v579_v33  ;;  %v521_v34 = vpop.f32.mrb[14].mxu1  ;;  %v373_v33 = vld [vmem:[#allocation11 + $0x4] sm:$0xf] }
 0x4d8   :  { %v2051_v35 = vpop.f32.mrb[15].mxu1  ;;  %v3051_v34 = vsel %vm626_vm3, %v373_v33, 0 }
 0x4d9   :  { %v374_v35 = vld [vmem:[#allocation11 + $0x8] sm:$0xf] }
 0x4db   :  { %583 = vmax.xlane.f32.xlu0 %v582_v36 }
 0x4ed   :  { %v575_v37 = vpop.xlane.xlu0 %574 }
 0x4ee   :  { %v585_v38 = vsub.f32 %v420_v17, %v575_v37 }
 0x4f0   :  { %v589_v39 = vmul.f32 1.442695, %v585_v38 }
 0x4f2   :  { %2276 = vpow2.f32 %v589_v39  ;;  %v3056_v39 = vsel %vm626_vm3, %v374_v35, 0 }
 0x4fc   :  { %v2277_v40 = vpop.eup %2276 }
 0x4fd   :  { %v597_v41 = vsel %vm379_vm2, %v2277_v40, 0.0 }
 0x4fe   :  { %598 = vadd.xlane.f32.xlu0 %v597_v41  ;;  %v375_v41 = vld [vmem:[#allocation11 + $0xc] sm:$0xf] }
 0x55c   :  { %v578_v43 = vpop.xlane.xlu1 %577 }
 0x55d   :  { %v586_v44 = vsub.f32 %v469_v22, %v578_v43 }
 0x55f   :  { %v591_v45 = vmul.f32 1.442695, %v586_v44 }
 0x561   :  { %2278 = vpow2.f32 %v591_v45 }
 0x564   :  { %v581_v47 = vpop.xlane.xlu0 %580 }
 0x565   :  { %v587_v48 = vsub.f32 %v518_v31, %v581_v47 }
 0x567   :  { %v593_v49 = vmul.f32 1.442695, %v587_v48  ;;  %v3063_v48 = vsel %vm626_vm3, %v375_v41, 0 }
 0x568   :  { %v584_v50 = vpop.xlane.xlu0 %583 }
 0x569   :  { %2280 = vpow2.f32 %v593_v49  ;;  %v588_v51 = vsub.f32 %v567_v27, %v584_v50 }
 0x56b   :  { %v2279_v52 = vpop.eup %2278  ;;  %v595_v54 = vmul.f32 1.442695, %v588_v51 }
 0x56c   :  { %v600_v55 = vsel %vm379_vm2, %v2279_v52, 0.0 }
 0x56d   :  { %2282 = vpow2.f32 %v595_v54  ;;  %601 = vadd.xlane.f32.xlu1 %v600_v55 }
 0x573   :  { %v2281_v56 = vpop.eup %2280 }
 0x574   :  { %v603_v59 = vsel %vm379_vm2, %v2281_v56, 0.0 }
 0x575   :  { %604 = vadd.xlane.f32.xlu0 %v603_v59 }
 0x577   :  { %v2283_v60 = vpop.eup %2282 }
 0x578   :  { %v606_v61 = vsel %vm379_vm2, %v2283_v60, 0.0 }
 0x579   :  { %607 = vadd.xlane.f32.xlu1 %v606_v61 }
 0x58a   :  { %670 = vrot.lane.b32.xlu1 %v2950_v53, %s2647_s1 }
 0x58b   :  { %621 = vrot.lane.b32.xlu0 %v2943_v42, %s2647_s1  ;;  %v599_v3 = vpop.xlane.xlu0 %598 }
 0x58c   :  { %2284 = vrcp.f32 %v599_v3 }
 0x58e   :  { %718 = vrot.lane.b32.xlu1 %v2954_v57, %s2647_s1 }
 0x58f   :  { %1012 = vrot.lane.b32.xlu0 %v1011_v62, %s2667_s17 }
 0x592   :  { %766 = vrot.lane.b32.xlu1 %v2956_v58, %s2647_s1 }
 0x593   :  { %1114 = vrot.lane.b32.xlu0 %v1113_v63, %s2667_s17 }
 0x596   :  { %1063 = vrot.lane.b32.xlu1 %v1062_v1, %s2667_s17  ;;  %v2285_v5 = vpop.eup %2284 }
 0x597   :  { %v613_v8 = vmul.f32 %v2285_v5, %v2277_v40 }
 0x599   :  { %v617_v17 = vpack.c.bf16 %v613_v8, %v613_v8 }
 0x59a   :  { %1165 = vrot.lane.b32.xlu1 %v1164_v2, %s2667_s17 }
 0x5fa   :  { %v602_v4 = vpop.xlane.xlu1 %601 }
 0x5fb   :  { %2286 = vrcp.f32 %v602_v4 }
 0x602   :  { %v605_v7 = vpop.xlane.xlu0 %604 }
 0x603   :  { %2288 = vrcp.f32 %v605_v7 }
 0x605   :  { %v2287_v9 = vpop.eup %2286 }
 0x606   :  { %v608_v10 = vpop.xlane.xlu1 %607  ;;  %v622_v11 = vpop.permute.xlu0 %621  ;;  %v614_v13 = vmul.f32 %v2287_v9, %v2279_v52 }
 0x607   :  { %2290 = vrcp.f32 %v608_v10  ;;  %v628_v12 = vsel %vm626_vm3, %v622_v11, 0  ;;  %v1010_v11 = vrot.slane %v2946_v46, 4  ;;  %v1112_v46 = vrot.slane %v2987_v16, 4 }
 0x608   :  { %2059 = vmatpush3.bf16.msra.mxu1 %v628_v12  ;;  %v618_v21 = vpack.c.bf16 %v614_v13, %v614_v13 }
 0x609   :  { %2070 = vmatprep.subr.bf16.mxu1 %v2662_v15 }
 0x60a   :  { %v671_v18 = vpop.permute.xlu1 %670  ;;  %v1013_v52 = vpop.permute.xlu0 %1012 }
 0x60b   :  { %v676_v19 = vsel %vm626_vm3, %v671_v18, 0  ;;  %2061 = vmatmul.mubr.msk.bf16.vlgmr.msra.gmra.mrb[16].mxu1 %vm379_vm2, %v617_v17  ;;  %v1061_v17 = vrot.slane %v2972_v6, 4  ;;  %v1163_v6 = vrot.slane %v2980_v14, 4 }
 0x60c   :  { %2065 = vmatpush3.bf16.msra.mxu0 %v676_v19  ;;  %2072 = vmatprep.mubr.msk.bf16.mxu1 %vm2663_vm1, %v2662_v15 }
 0x60d   :  { %v2289_v20 = vpop.eup %2288  ;;  %2076 = vmatprep.subr.bf16.mxu0 %v2662_v15 }
 0x60e   :  { %v615_v22 = vmul.f32 %v2289_v20, %v2281_v56  ;;  %v719_v23 = vpop.permute.xlu1 %718  ;;  %v1115_v10 = vpop.permute.xlu0 %1114 }
 0x60f   :  { %v724_v25 = vsel %vm626_vm3, %v719_v23, 0  ;;  %2067 = vmatmul.mubr.msk.bf16.vlgmr.msra.gmra.mrb[4].mxu0 %vm379_vm2, %v618_v21  ;;  %v1120_v12 = vsel %vm379_vm2, %v1115_v10, 0 }
 0x610   :  { %2071 = vmatpush3.bf16.msra.mxu1 %v724_v25  ;;  %v619_v26 = vpack.c.bf16 %v615_v22, %v615_v22  ;;  %2078 = vmatprep.mubr.msk.bf16.mxu0 %vm2663_vm1, %v2662_v15 }
 0x611   :  { %v2291_v27 = vpop.eup %2290  ;;  %2082 = vmatprep.subr.bf16.mxu1 %v2662_v15 }
 0x612   :  { %v616_v29 = vmul.f32 %v2291_v27, %v2283_v60  ;;  %v767_v30 = vpop.permute.xlu1 %766  ;;  %v1018_v60 = vsel %vm379_vm2, %v1013_v52, 0 }
 0x613   :  { %v772_v31 = vsel %vm626_vm3, %v767_v30, 0  ;;  %2073 = vmatmul.mubr.msk.bf16.vlgmr.msra.gmra.mrb[20].mxu1 %vm379_vm2, %v619_v26 }
 0x614   :  { %2077 = vmatpush3.bf16.msra.mxu0 %v772_v31  ;;  %v620_v32 = vpack.c.bf16 %v616_v29, %v616_v29  ;;  %2083 = vmatpush3.bf16.msra.mxu1 %v3038_v28 }
 0x615   :  { %2084 = vmatprep.mubr.msk.bf16.mxu1 %vm2663_vm1, %v2662_v15  ;;  %2088 = vmatprep.subr.bf16.mxu0 %v2662_v15 }
 0x616   :  { %2094 = vmatprep.subr.bf16.mxu1 %v2662_v15  ;;  %v1064_v3 = vpop.permute.xlu1 %1063 }
 0x617   :  { %2079 = vmatmul.mubr.msk.bf16.vlgmr.msra.gmra.mrb[8].mxu0 %vm379_vm2, %v620_v32  ;;  %v1069_v9 = vsel %vm379_vm2, %v1064_v3, 0 }
 0x618   :  { %2090 = vmatprep.mubr.msk.bf16.mxu0 %vm2663_vm1, %v2662_v15  ;;  %2089 = vmatpush3.bf16.msra.mxu0 %v3051_v34 }
 0x619   :  { %2100 = vmatprep.subr.bf16.mxu0 %v2662_v15 }
 0x61a   :  { %v1166_v13 = vpop.permute.xlu1 %1165 }
 0x61b   :  { %v1171_v18 = vsel %vm379_vm2, %v1166_v13, 0 }
 0x6de   :  { %v664_v36 = vpop.f32.mrb[16].mxu1 }
 0x6df   :  { %v814_v37 = vpack.c.bf16 %v664_v36, %v664_v36  ;;  %v2062_v38 = vpop.f32.mrb[17].mxu1 }
 0x6e0   :  { %v667_v40 = vpop.f32.mrb[18].mxu1 }
 0x6e1   :  { %v2063_v43 = vpop.f32.mrb[19].mxu1  ;;  %2085 = vmatmul.mubr.msk.bf16.vlgmr.msra.gmra.mrb[24].mxu1 %vm379_vm2, %v814_v37 }
 0x6e2   :  { %2095 = vmatpush3.bf16.msra.mxu1 %v3056_v39  ;;  %v712_v44 = vpop.f32.mrb[4].mxu0  ;;  %2096 = vmatprep.mubr.msk.bf16.mxu1 %vm2663_vm1, %v2662_v15 }
 0x6e3   :  { %v815_v45 = vpack.c.bf16 %v712_v44, %v712_v44  ;;  %v2068_v47 = vpop.f32.mrb[5].mxu0  ;;  %2106 = vmatprep.subr.bf16.mxu1 %v2662_v15 }
 0x6e4   :  { %v715_v49 = vpop.f32.mrb[6].mxu0 }
 0x6e5   :  { %v2069_v50 = vpop.f32.mrb[7].mxu0  ;;  %2091 = vmatmul.mubr.msk.bf16.vlgmr.msra.gmra.mrb[12].mxu0 %vm379_vm2, %v815_v45 }
 0x6e6   :  { %2101 = vmatpush3.bf16.msra.mxu0 %v3063_v48  ;;  %v760_v51 = vpop.f32.mrb[20].mxu1  ;;  %2102 = vmatprep.mubr.msk.bf16.mxu0 %vm2663_vm1, %v2662_v15 }
 0x6e7   :  { %v816_v54 = vpack.c.bf16 %v760_v51, %v760_v51  ;;  %v2074_v55 = vpop.f32.mrb[21].mxu1  ;;  %2112 = vmatprep.subr.bf16.mxu0 %v2662_v15 }
 0x6e8   :  { %v763_v56 = vpop.f32.mrb[22].mxu1 }
 0x6e9   :  { %v2075_v59 = vpop.f32.mrb[23].mxu1  ;;  %2097 = vmatmul.mubr.msk.bf16.vlgmr.msra.gmra.mrb[28].mxu1 %vm379_vm2, %v816_v54 }
 0x6ea   :  { %v808_v61 = vpop.f32.mrb[8].mxu0  ;;  %2108 = vmatprep.mubr.msk.bf16.mxu1 %vm2663_vm1, %v2662_v15 }
 0x6eb   :  { %v817_v4 = vpack.c.bf16 %v808_v61, %v808_v61  ;;  %2107 = vmatpush3.bf16.xpose.msra.mxu1 %v1018_v60  ;;  %v2080_v5 = vpop.f32.mrb[9].mxu0 }
 0x6ec   :  { %v811_v7 = vpop.f32.mrb[10].mxu0  ;;  %2118 = vmatprep.subr.bf16.mxu1 %v2662_v15 }
 0x6ed   :  { %v2081_v8 = vpop.f32.mrb[11].mxu0  ;;  %2103 = vmatmul.mubr.msk.bf16.vlgmr.msra.gmra.mrb[16].mxu0 %vm379_vm2, %v817_v4 }
 0x6ee   :  { %2114 = vmatprep.mubr.msk.bf16.mxu0 %vm2663_vm1, %v2662_v15 }
 0x6ef   :  { %2113 = vmatpush3.bf16.xpose.msra.mxu0 %v1069_v9 }
 0x6f0   :  { %2124 = vmatprep.subr.bf16.mxu0 %v2662_v15 }
 0x6f2   :  { %2109 = vmatmul.mubr.msk.bf16.vlgmr.msra.gmra.mrb[32].mxu1 %vm379_vm2, %v1010_v11 }
 0x6f3   :  { %2119 = vmatpush3.bf16.xpose.msra.mxu1 %v1120_v12  ;;  %2120 = vmatprep.mubr.msk.bf16.mxu1 %vm2663_vm1, %v2662_v15 }
 0x6f4   :  { %2130 = vmatprep.subr.bf16.mxu1 %v2662_v15 }
 0x6f6   :  { %2115 = vmatmul.mubr.msk.bf16.vlgmr.msra.gmra.mrb[20].mxu0 %vm379_vm2, %v1061_v17 }
 0x6f7   :  { %2125 = vmatpush3.bf16.xpose.msra.mxu0 %v1171_v18  ;;  %2126 = vmatprep.mubr.msk.bf16.mxu0 %vm2663_vm1, %v2662_v15 }
 0x6f8   :  { %2136 = vmatprep.subr.bf16.mxu0 %v2662_v15 }
 0x6fa   :  { %2121 = vmatmul.mubr.msk.bf16.vlgmr.msra.gmra.mrb[36].mxu1 %vm379_vm2, %v1112_v46 }
 0x6fb   :  { %2132 = vmatprep.mubr.msk.bf16.mxu1 %vm2663_vm1, %v2662_v15 }
 0x6fe   :  { %2127 = vmatmul.mubr.msk.bf16.vlgmr.msra.gmra.mrb[24].mxu0 %vm379_vm2, %v1163_v6 }
 0x6ff   :  { %2138 = vmatprep.mubr.msk.bf16.mxu0 %vm2663_vm1, %v2662_v15 }
 0x7b4   :  { %v858_v19 = vpop.f32.mrb[24].mxu1 }
 0x7b5   :  { %v2086_v20 = vpop.f32.mrb[25].mxu1  ;;  %v1002_v16 = vsel %vm210_vm0, %v858_v19, 0.0 }
 0x7b6   :  { %v861_v21 = vpop.f32.mrb[26].mxu1 }
 0x7b7   :  { %v2087_v22 = vpop.f32.mrb[27].mxu1 }
 0x7b8   :  { %v904_v23 = vpop.f32.mrb[12].mxu0 }
 0x7b9   :  { %v1003_v24 = vsel %vm210_vm0, %v904_v23, 0.0  ;;  %v2092_v25 = vpop.f32.mrb[13].mxu0 }
 0x7ba   :  { %v1004_v26 = vadd.f32 %v1003_v24, %v1002_v16  ;;  %v907_v27 = vpop.f32.mrb[14].mxu0 }
 0x7bb   :  { %v2093_v29 = vpop.f32.mrb[15].mxu0 }
 0x7bc   :  { %v950_v30 = vpop.f32.mrb[28].mxu1 }
 0x7bd   :  { %v1005_v14 = vsel %vm210_vm0, %v950_v30, 0.0  ;;  %v2098_v31 = vpop.f32.mrb[29].mxu1 }
 0x7be   :  { %v1006_v32 = vadd.f32 %v1005_v14, %v1004_v26  ;;  %v953_v33 = vpop.f32.mrb[30].mxu1  ;;  %v3122_v14 = vld [vmem:[#allocation13] ss:$0 sm:$0xff] }
 0x7bf   :  { %v2099_v35 = vpop.f32.mrb[31].mxu1 }
 0x7c0   :  { %v996_v36 = vpop.f32.mrb[16].mxu0 }
 0x7c1   :  { %v1007_v37 = vsel %vm210_vm0, %v996_v36, 0.0  ;;  %v2104_v38 = vpop.f32.mrb[17].mxu0 }
 0x7c2   :  { %v1008_v40 = vadd.f32 %v1007_v37, %v1006_v32  ;;  %v999_v41 = vpop.f32.mrb[18].mxu0 }
 0x7c3   :  { %v2105_v43 = vpop.f32.mrb[19].mxu0 }
 0x7c4   :  { %v1636_v30 = vadd.f32 %v1008_v40, %v2924_v0 }
 0x7c5   :  { %v1054_v44 = vpop.f32.mrb[32].mxu1 }
 0x7c6   :  { %v2110_v45 = vpop.f32.mrb[33].mxu1  ;;  %v1213_v47 = vsel %vm379_vm2, %v1054_v44, -inf  ;;  %v3125_v31 = vadd.f32 %v3122_v14, %v1636_v30 }
 0x7c7   :  { %1214 = vmax.xlane.f32.xlu0 %v1213_v47  ;;  %v1057_v49 = vpop.f32.mrb[34].mxu1 }
 0x7c8   :  { %v2111_v50 = vpop.f32.mrb[35].mxu1  ;;  %v1649_v57 = vsel %vm210_vm0, %v3125_v31, 0.0 }
 0x7c9   :  { %v1105_v51 = vpop.f32.mrb[20].mxu0 }
 0x7ca   :  { %v2116_v52 = vpop.f32.mrb[21].mxu0  ;;  %v1216_v54 = vsel %vm379_vm2, %v1105_v51, -inf }
 0x7cb   :  { %1217 = vmax.xlane.f32.xlu1 %v1216_v54  ;;  %v1108_v55 = vpop.f32.mrb[22].mxu0 }
 0x7cc   :  { %v2117_v56 = vpop.f32.mrb[23].mxu0 }
 0x7cd   :  { %v1156_v59 = vpop.f32.mrb[36].mxu1 }
 0x7ce   :  { %v2122_v60 = vpop.f32.mrb[37].mxu1  ;;  %v1219_v61 = vsel %vm379_vm2, %v1156_v59, -inf }
 0x7cf   :  { %1220 = vmax.xlane.f32.xlu0 %v1219_v61  ;;  %v1159_v3 = vpop.f32.mrb[38].mxu1 }
 0x7d0   :  { %v2123_v4 = vpop.f32.mrb[39].mxu1 }
 0x7d1   :  { %v1207_v5 = vpop.f32.mrb[24].mxu0 }
 0x7d2   :  { %v2128_v7 = vpop.f32.mrb[25].mxu0  ;;  %v1222_v8 = vsel %vm379_vm2, %v1207_v5, -inf }
 0x7d3   :  { %v1210_v9 = vpop.f32.mrb[26].mxu0  ;;  %1223 = vmax.xlane.f32.xlu0 %v1222_v8 }
 0x7d4   :  { %v2129_v10 = vpop.f32.mrb[27].mxu0 }
 0x854   :  { %v1215_v11 = vpop.xlane.xlu0 %1214 }
 0x855   :  { %v1225_v12 = vsub.f32 %v1054_v44, %v1215_v11 }
 0x857   :  { %v1229_v13 = vmul.f32 1.442695, %v1225_v12 }
 0x858   :  { %v1218_v17 = vpop.xlane.xlu1 %1217 }
 0x859   :  { %2292 = vpow2.f32 %v1229_v13  ;;  %v1226_v18 = vsub.f32 %v1105_v51, %v1218_v17 }
 0x85b   :  { %v1231_v46 = vmul.f32 1.442695, %v1226_v18 }
 0x85c   :  { %v1221_v6 = vpop.xlane.xlu0 %1220 }
 0x85d   :  { %2294 = vpow2.f32 %v1231_v46  ;;  %v1227_v19 = vsub.f32 %v1156_v59, %v1221_v6 }
 0x85f   :  { %v1233_v20 = vmul.f32 1.442695, %v1227_v19 }
 0x860   :  { %v1224_v26 = vpop.xlane.xlu0 %1223 }
 0x861   :  { %2296 = vpow2.f32 %v1233_v20  ;;  %v1228_v27 = vsub.f32 %v1207_v5, %v1224_v26 }
 0x863   :  { %v2293_v21 = vpop.eup %2292  ;;  %v1235_v29 = vmul.f32 1.442695, %v1228_v27 }
 0x864   :  { %v1237_v22 = vsel %vm379_vm2, %v2293_v21, 0.0 }
 0x865   :  { %1238 = vadd.xlane.f32.xlu0 %v1237_v22  ;;  %2298 = vpow2.f32 %v1235_v29 }
 0x867   :  { %v2295_v23 = vpop.eup %2294 }
 0x868   :  { %v1240_v16 = vsel %vm379_vm2, %v2295_v23, 0.0 }
 0x869   :  { %1241 = vadd.xlane.f32.xlu1 %v1240_v16 }
 0x86b   :  { %v2297_v24 = vpop.eup %2296 }
 0x86c   :  { %v1243_v25 = vsel %vm379_vm2, %v2297_v24, 0.0 }
 0x86d   :  { %1244 = vadd.xlane.f32.xlu0 %v1243_v25 }
 0x86f   :  { %v2299_v53 = vpop.eup %2298 }
 0x87a   :  { %1309 = vrot.lane.b32.xlu1 %v1062_v1, %s2647_s1 }
 0x87e   :  { %1357 = vrot.lane.b32.xlu1 %v1113_v63, %s2647_s1  ;;  %v1246_v63 = vsel %vm379_vm2, %v2299_v53, 0.0 }
 0x883   :  { %1261 = vrot.lane.b32.xlu0 %v1011_v62, %s2647_s1 }
 0x8a2   :  { %1650 = vadd.xlane.f32.xlu0 %v1649_v57  ;;  %1247 = vadd.xlane.f32.xlu1 %v1246_v63 }
 0x8b3   :  { %1405 = vrot.lane.b32.xlu1 %v1164_v2, %s2647_s1  ;;  %s2668_s1 = smov [#allocation23]  }
 0x8b4   :  { %s1897_s0 = sshll.u32 %s2668_s1, 4  ;;  %s1898_s0 = int_to_ptr.vmem [resolvable:$true] %s1897_s0 }
 0x8b5   :  { %s2607_s15 = scalar_lea.vmem %s1898_s0, 256  ;;  %p2612_p7 = scmp.lt.s32.totalorder %s1898_s0, %s1898_s0 }
 0x8b6   :  { %p2608_p6 = scmp.ne.s32.totalorder %s1898_s0, %s2607_s15  ;;  %p2613_p8 = scmp.lt.s32.totalorder %s2607_s15, %s2607_s15 }
 0x8b8   :  { %p2614_p9 = por %p2613_p8, %p2612_p7 }
 0x8ba   :  { %p2615_p10 = pnand %p2614_p9, %p2608_p6 }
 0x8f2   :  { %v1239_v42 = vpop.xlane.xlu0 %1238 }
 0x8f3   :  { %2300 = vrcp.f32 %v1239_v42 }
 0x8f6   :  { %v1242_v0 = vpop.xlane.xlu1 %1241 }
 0x8f7   :  { %2302 = vrcp.f32 %v1242_v0 }
 0x8fa   :  { %v1310_v62 = vpop.permute.xlu1 %1309  ;;  %v1245_v1 = vpop.xlane.xlu0 %1244 }
 0x8fb   :  { %v1315_v32 = vsel %vm626_vm3, %v1310_v62, 0  ;;  %2304 = vrcp.f32 %v1245_v1 }
 0x8fc   :  { %2137 = vmatpush3.bf16.msra.mxu0 %v1315_v32 }
 0x8fd   :  { %v2301_v33 = vpop.eup %2300  ;;  %2148 = vmatprep.subr.bf16.mxu0 %v2662_v15 }
 0x8fe   :  { %v1253_v35 = vmul.f32 %v2301_v33, %v2293_v21  ;;  %v1262_v36 = vpop.permute.xlu0 %1261  ;;  %v1358_v38 = vpop.permute.xlu1 %1357 }
 0x8ff   :  { %v1267_v37 = vsel %vm626_vm3, %v1262_v36, 0  ;;  %v1363_v41 = vsel %vm626_vm3, %v1358_v38, 0 }
 0x900   :  { %2131 = vmatpush3.bf16.msra.mxu1 %v1267_v37  ;;  %v1257_v58 = vpack.c.bf16 %v1253_v35, %v1253_v35 }
 0x901   :  { %v2303_v2 = vpop.eup %2302  ;;  %2142 = vmatprep.subr.bf16.mxu1 %v2662_v15 }
 0x902   :  { %v1254_v40 = vmul.f32 %v2303_v2, %v2295_v23  ;;  %v2320_v2 = vld [vmem:[#allocation2 + $0x8] sm:$0xff] }
 0x903   :  { %2133 = vmatmul.mubr.msk.bf16.vlgmr.msra.gmra.mrb[40].mxu1 %vm379_vm2, %v1257_v58 }
 0x904   :  { %2143 = vmatpush3.bf16.msra.mxu1 %v1363_v41  ;;  %v1258_v43 = vpack.c.bf16 %v1254_v40, %v1254_v40  ;;  %2144 = vmatprep.mubr.msk.bf16.mxu1 %vm2663_vm1, %v2662_v15 }
 0x905   :  { %v2305_v44 = vpop.eup %2304  ;;  %2154 = vmatprep.subr.bf16.mxu1 %v2662_v15 }
 0x906   :  { %v1255_v45 = vmul.f32 %v2305_v44, %v2297_v24  ;;  %2139 = vmatmul.mubr.msk.bf16.vlgmr.msra.gmra.mrb[28].mxu0 %vm379_vm2, %v1258_v43 }
 0x907   :  { %2150 = vmatprep.mubr.msk.bf16.mxu0 %vm2663_vm1, %v2662_v15 }
 0x908   :  { %v1259_v47 = vpack.c.bf16 %v1255_v45, %v1255_v45 }
 0x90b   :  { %2145 = vmatmul.mubr.msk.bf16.vlgmr.msra.gmra.mrb[44].mxu1 %vm379_vm2, %v1259_v47 }
 0x90c   :  { %2155 = vmatpush3.bf16.msra.mxu1 %v3038_v28  ;;  %2156 = vmatprep.mubr.msk.bf16.mxu1 %vm2663_vm1, %v2662_v15 }
 0x90d   :  { %2166 = vmatprep.subr.bf16.mxu1 %v2662_v15 }
 0x92f   :  { %v1248_v49 = vpop.xlane.xlu1 %1247  ;;  %v1651_v50 = vpop.xlane.xlu0 %1650 }
 0x930   :  { %2306 = vrcp.f32 %v1248_v49  ;;  %v1655_v51 = vmul.f32 0.03125, %v1651_v50 }
 0x932   :  { %v3151_v52 = vsub.f32 %v3125_v31, %v1655_v51  ;;  %v2262_v51 = vld [vmem:[#allocation17] sm:$0xff]  }
 0x933   :  { %v1406_v54 = vpop.permute.xlu1 %1405 }
 0x934   :  { %v1411_v55 = vsel %vm626_vm3, %v1406_v54, 0  ;;  %v1659_v56 = vmul.f32 %v3151_v52, %v3151_v52  ;;  %v2263_v54 = vld [vmem:[#allocation17 + $0x8] sm:$0xff]  }
 0x935   :  { %2149 = vmatpush3.bf16.msra.mxu0 %v1411_v55 }
 0x936   :  { %v1661_v28 = vsel %vm210_vm0, %v1659_v56, 0.0  ;;  %2160 = vmatprep.subr.bf16.mxu0 %v2662_v15 }
 0x937   :  { %1662 = vadd.xlane.f32.xlu0 %v1661_v28 }
 0x93a   :  { %v2307_v59 = vpop.eup %2306 }
 0x93b   :  { %v1256_v60 = vmul.f32 %v2307_v59, %v2299_v53 }
 0x93d   :  { %v1260_v61 = vpack.c.bf16 %v1256_v60, %v1256_v60 }
 0x93f   :  { %2151 = vmatmul.mubr.msk.bf16.vlgmr.msra.gmra.mrb[32].mxu0 %vm379_vm2, %v1260_v61 }
 0x940   :  { %2161 = vmatpush3.bf16.msra.mxu0 %v3051_v34  ;;  %2162 = vmatprep.mubr.msk.bf16.mxu0 %vm2663_vm1, %v2662_v15 }
 0x941   :  { %2172 = vmatprep.subr.bf16.mxu0 %v2662_v15 }
 0x9d6   :  { %v1303_v3 = vpop.f32.mrb[40].mxu1 }
 0x9d7   :  { %v1453_v4 = vpack.c.bf16 %v1303_v3, %v1303_v3  ;;  %v2134_v5 = vpop.f32.mrb[41].mxu1 }
 0x9d8   :  { %v1306_v7 = vpop.f32.mrb[42].mxu1 }
 0x9d9   :  { %v2135_v8 = vpop.f32.mrb[43].mxu1  ;;  %v1351_v9 = vpop.f32.mrb[28].mxu0  ;;  %2157 = vmatmul.mubr.msk.bf16.vlgmr.msra.gmra.mrb[48].mxu1 %vm379_vm2, %v1453_v4  ;;  %v1946_v4 = vld [vmem:[#allocation14] ss:$0 sm:$0xff] }
 0x9da   :  { %v1454_v10 = vpack.c.bf16 %v1351_v9, %v1351_v9  ;;  %v2140_v11 = vpop.f32.mrb[29].mxu0  ;;  %2167 = vmatpush3.bf16.msra.mxu1 %v3056_v39  ;;  %2168 = vmatprep.mubr.msk.bf16.mxu1 %vm2663_vm1, %v2662_v15  ;;  %v1947_v9 = vld [vmem:[#allocation16] ss:$0 sm:$0xff] }
 0x9db   :  { %v1354_v34 = vpop.f32.mrb[30].mxu0  ;;  %2178 = vmatprep.subr.bf16.mxu1 %v2662_v15 }
 0x9dc   :  { %v2141_v12 = vpop.f32.mrb[31].mxu0  ;;  %2163 = vmatmul.mubr.msk.bf16.vlgmr.msra.gmra.mrb[36].mxu0 %vm379_vm2, %v1454_v10 }
 0x9dd   :  { %2173 = vmatpush3.bf16.msra.mxu0 %v3063_v48  ;;  %2174 = vmatprep.mubr.msk.bf16.mxu0 %vm2663_vm1, %v2662_v15 }
 0x9de   :  { %v1399_v13 = vpop.f32.mrb[44].mxu1  ;;  %2186 = vmatprep.subr.bf16.mxu0 %v2662_v15 }
 0x9df   :  { %v1455_v17 = vpack.c.bf16 %v1399_v13, %v1399_v13  ;;  %v2146_v18 = vpop.f32.mrb[45].mxu1  ;;  %v2264_v13 = vld [vmem:[#allocation20] sm:$0xff]  }
 0x9e0   :  { %v1402_v39 = vpop.f32.mrb[46].mxu1  ;;  %v2267_v18 = vld [vmem:[#allocation20 + $0x18] sm:$0xff]  }
 0x9e1   :  { %v2147_v46 = vpop.f32.mrb[47].mxu1  ;;  %2169 = vmatmul.mubr.msk.bf16.vlgmr.msra.gmra.mrb[52].mxu1 %vm379_vm2, %v1455_v17  ;;  %v2265_v17 = vld [vmem:[#allocation20 + $0x8] sm:$0xff]   ;;  %v2268_v39 = vld [vmem:[#allocation20 + $0x20] sm:$0xff]  }
 0x9e2   :  { %2182 = vmatprep.mubr.msk.bf16.mxu1 %vm2663_vm1, %v2662_v15  ;;  %2179 = vmatpush3.bf16.msra.mxu1 %v2262_v51  ;;  %v2269_v46 = vld [vmem:[#allocation20 + $0x28] sm:$0xff]  }
 0x9e3   :  { %2180 = vmatprep.subr.bf16.mxu1 %v2662_v15 }
 0x9e6   :  { %2181 = vmatpush3.bf16.msra.mxu1 %v2263_v54 }
 0xa12   :  { %v1447_v6 = vpop.f32.mrb[32].mxu0 }
 0xa13   :  { %v1456_v19 = vpack.c.bf16 %v1447_v6, %v1447_v6  ;;  %v2152_v20 = vpop.f32.mrb[33].mxu0  ;;  %v2270_v6 = vld [vmem:[#allocation20 + $0x30] sm:$0xff]  }
 0xa14   :  { %v1450_v21 = vpop.f32.mrb[34].mxu0  ;;  %v1948_v20 = vld [vmem:[#allocation19] ss:$0 sm:$0xff] }
 0xa15   :  { %v2153_v48 = vpop.f32.mrb[35].mxu0  ;;  %2175 = vmatmul.mubr.msk.bf16.vlgmr.msra.gmra.mrb[40].mxu0 %vm379_vm2, %v1456_v19  ;;  %v2271_v19 = vld [vmem:[#allocation20 + $0x38] sm:$0xff]  }
 0xa16   :  { %2202 = vmatprep.mubr.msk.bf16.mxu0 %vm2663_vm1, %v2662_v15  ;;  %2187 = vmatpush3.bf16.msra.mxu0 %v2264_v13 }
 0xa17   :  { %2188 = vmatprep.subr.bf16.mxu0 %v2662_v15 }
 0xa1a   :  { %2189 = vmatpush3.bf16.msra.mxu0 %v2265_v17 }
 0xa1b   :  { %2190 = vmatprep.subr.bf16.mxu0 %v2662_v15 }
 0xaac   :  { %v1494_v22 = vpop.f32.mrb[48].mxu1 }
 0xaad   :  { %v2158_v23 = vpop.f32.mrb[49].mxu1  ;;  %v1629_v26 = vsel %vm210_vm0, %v1494_v22, 0.0 }
 0xaae   :  { %v1497_v16 = vpop.f32.mrb[50].mxu1 }
 0xaaf   :  { %v2159_v24 = vpop.f32.mrb[51].mxu1  ;;  %v1537_v25 = vpop.f32.mrb[36].mxu0 }
 0xab0   :  { %v1630_v27 = vsel %vm210_vm0, %v1537_v25, 0.0  ;;  %v2164_v29 = vpop.f32.mrb[37].mxu0 }
 0xab1   :  { %v1631_v30 = vadd.f32 %v1630_v27, %v1629_v26  ;;  %v1540_v53 = vpop.f32.mrb[38].mxu0 }
 0xab2   :  { %v2165_v57 = vpop.f32.mrb[39].mxu0 }
 0xab4   :  { %v1580_v63 = vpop.f32.mrb[52].mxu1 }
 0xab5   :  { %v1632_v42 = vsel %vm210_vm0, %v1580_v63, 0.0  ;;  %v2170_v0 = vpop.f32.mrb[53].mxu1 }
 0xab6   :  { %v1633_v62 = vadd.f32 %v1632_v42, %v1631_v30  ;;  %v1583_v1 = vpop.f32.mrb[54].mxu1 }
 0xab7   :  { %v2171_v32 = vpop.f32.mrb[55].mxu1 }
 0xab8   :  { %v1954_v32 = vld [vmem:[#allocation22] ss:$0 sm:$0xff] }
 0xae8   :  { %v1623_v33 = vpop.f32.mrb[40].mxu0 }
 0xae9   :  { %v1634_v35 = vsel %vm210_vm0, %v1623_v33, 0.0  ;;  %v2176_v36 = vpop.f32.mrb[41].mxu0 }
 0xaea   :  { %v1635_v37 = vadd.f32 %v1634_v35, %v1633_v62  ;;  %v1626_v38 = vpop.f32.mrb[42].mxu0 }
 0xaeb   :  { %v2177_v58 = vpop.f32.mrb[43].mxu0 }
 0xaec   :  { %v1637_v40 = vadd.f32 %v2320_v2, %v1635_v37 }
 0xaee   :  { %v3184_v41 = vadd.f32 %v3122_v14, %v1637_v40  ;;  %v1663_v14 = vpop.xlane.xlu0 %1662 }
 0xaef   :  { %v1667_v55 = vmul.f32 0.03125, %v1663_v14 }
 0xaf0   :  { %v1652_v43 = vsel %vm210_vm0, %v3184_v41, 0.0 }
 0xaf1   :  { %1653 = vadd.xlane.f32.xlu1 %v1652_v43  ;;  %v1669_v56 = vadd.f32 1e-05, %v1667_v55 }
 0xaf3   :  { %2308 = vrsqrt.f32 %v1669_v56 }
 0xafd   :  { %v2309_v61 = vpop.eup %2308 }
 0xafe   :  { %v1673_v3 = vmul.f32 %v2309_v61, %v3151_v52  ;;  %v2266_v52 = vld [vmem:[#allocation20 + $0x10] sm:$0xff]  }
 0xaff   :  { %2191 = vmatpush3.bf16.msra.mxu0 %v2266_v52 }
 0xb00   :  { %v1681_v7 = vmul.f32 %v1946_v4, %v1673_v3  ;;  %2192 = vmatprep.subr.bf16.mxu0 %v2662_v15 }
 0xb02   :  { %v1689_v11 = vadd.f32 %v1947_v9, %v1681_v7 }
 0xb03   :  { %2193 = vmatpush3.bf16.msra.mxu0 %v2267_v18 }
 0xb04   :  { %2194 = vmatprep.subr.bf16.mxu0 %v2662_v15 }
 0xb07   :  { %2195 = vmatpush3.bf16.msra.mxu0 %v2268_v39 }
 0xb08   :  { %2196 = vmatprep.subr.bf16.mxu0 %v2662_v15 }
 0xb0b   :  { %2197 = vmatpush3.bf16.msra.mxu0 %v2269_v46 }
 0xb0c   :  { %2198 = vmatprep.subr.bf16.mxu0 %v2662_v15 }
 0xb0f   :  { %2199 = vmatpush3.bf16.msra.mxu0 %v2270_v6 }
 0xb10   :  { %2200 = vmatprep.subr.bf16.mxu0 %v2662_v15 }
 0xb13   :  { %2201 = vmatpush3.bf16.msra.mxu0 %v2271_v19 }
 0xb7e   :  { %v1654_v44 = vpop.xlane.xlu1 %1653 }
 0xb7f   :  { %v1656_v45 = vmul.f32 0.03125, %v1654_v44 }
 0xb81   :  { %v1658_v47 = vsub.f32 %v3184_v41, %v1656_v45 }
 0xb83   :  { %v1660_v49 = vmul.f32 %v1658_v47, %v1658_v47 }
 0xb85   :  { %v1664_v50 = vsel %vm210_vm0, %v1660_v49, 0.0 }
 0xb86   :  { %1665 = vadd.xlane.f32.xlu0 %v1664_v50 }
 0xc13   :  { %v1666_v28 = vpop.xlane.xlu0 %1665 }
 0xc14   :  { %v1668_v59 = vmul.f32 0.03125, %v1666_v28 }
 0xc16   :  { %v1670_v60 = vadd.f32 1e-05, %v1668_v59 }
 0xc18   :  { %2310 = vrsqrt.f32 %v1670_v60 }
 0xc22   :  { %v2311_v5 = vpop.eup %2310 }
 0xc23   :  { %v1674_v8 = vmul.f32 %v2311_v5, %v1658_v47 }
 0xc25   :  { %v1682_v10 = vmul.f32 %v1946_v4, %v1674_v8 }
 0xc27   :  { %v1690_v34 = vadd.f32 %v1947_v9, %v1682_v10 }
 0xc29   :  { %v1691_v12 = vpack.c.bf16 %v1690_v34, %v1689_v11 }
 0xc2b   :  { %2183 = vmatmul.mubr.msk.bf16.vlgmr.msra.gmra.mrb[56].mxu1 %vm210_vm0, %v1691_v12 }
 0xcfe   :  { %v1752_v21 = vpop.f32.mrb[56].mxu1 }
 0xcff   :  { %v1753_v48 = vadd.f32 %v1948_v20, %v1752_v21  ;;  %v2184_v22 = vpop.f32.mrb[57].mxu1 }
 0xd00   :  { %v1755_v23 = vpop.f32.mrb[58].mxu1 }
 0xd01   :  { %v1952_v16 = vmul.f32 -1.702, %v1753_v48  ;;  %v1756_v24 = vadd.f32 %v1948_v20, %v1755_v23  ;;  %v2185_v25 = vpop.f32.mrb[59].mxu1 }
 0xd03   :  { %v1763_v26 = vmul.f32 1.442695, %v1952_v16  ;;  %v1953_v27 = vmul.f32 -1.702, %v1756_v24 }
 0xd05   :  { %2312 = vpow2.f32 %v1763_v26  ;;  %v1765_v29 = vmul.f32 1.442695, %v1953_v27 }
 0xd07   :  { %2314 = vpow2.f32 %v1765_v29 }
 0xd0f   :  { %v2313_v30 = vpop.eup %2312 }
 0xd10   :  { %v1767_v53 = vadd.f32 1.0, %v2313_v30 }
 0xd11   :  { %v2315_v57 = vpop.eup %2314 }
 0xd12   :  { %2316 = vrcp.f32 %v1767_v53  ;;  %v1768_v15 = vadd.f32 1.0, %v2315_v57 }
 0xd14   :  { %2318 = vrcp.f32 %v1768_v15 }
 0xd1c   :  { %v2317_v63 = vpop.eup %2316 }
 0xd1d   :  { %v1773_v0 = vmul.f32 %v2317_v63, %v1753_v48 }
 0xd1e   :  { %v2319_v42 = vpop.eup %2318 }
 0xd1f   :  { %v1774_v62 = vmul.f32 %v2319_v42, %v1756_v24 }
 0xd21   :  { %v1775_v1 = vpack.c.bf16 %v1774_v62, %v1773_v0 }
 0xd23   :  { %2203 = vmatmul.mubr.bf16.vlgmr.msra.gmra.mrb[44].mxu0 %v1775_v1 }
 0xdf6   :  { %v1881_v33 = vpop.f32.mrb[44].mxu0 }
 0xdf7   :  { %v1882_v35 = vadd.f32 %v1954_v32, %v1881_v33  ;;  %v2204_v36 = vpop.f32.mrb[45].mxu0 }
 0xdf8   :  { %v1884_v37 = vpop.f32.mrb[46].mxu0 }
 0xdf9   :  { %v1888_v38 = vadd.f32 %v1882_v35, %v3125_v31  ;;  %v1885_v58 = vadd.f32 %v1954_v32, %v1884_v37  ;;  %v2205_v2 = vpop.f32.mrb[47].mxu0 }
 0xdfb   :  { %1890 = vst.msk [vmem:[#allocation23] sm:$0xff] %vm210_vm0, %v1888_v38  ;;  %v1889_v40 = vadd.f32 %v1885_v58, %v3184_v41 }
 0xdfd   :  { %1891 = vst.msk [vmem:[#allocation23 + $0x8] sm:$0xff] %vm210_vm0, %v1889_v40 }
 0xdfe   :  { %2618 = shalt.err (!%p2615_p10)
}
 0xdff   :  { %s2619_s7 = scalar_lea.hbm %s3232_s13, 256 }
 0xe00   :  { %p2620_p11 = scmp.ne.s32.totalorder %s3232_s13, %s2619_s7  ;;  %p2623_p12 = scmp.lt.u32.totalorder %s2619_s7, %s3232_s13 }
 0xe02   :  { %p2625_p13 = pnand %p2623_p12, %p2620_p11 }
 0xe04   :  { %2628 = shalt.err (!%p2625_p13)
}
 0xe05   :  { %1903 = dma.vmem_to_hbm [thread:$0]  %s1898_s0, 256, %s3232_s13, [#allocation4], %s2654_s11, %s2654_s11, %s2655_s26  }
 0xe06   :  { %2643 = dma.done.wait [#allocation4], 256  }
 0xe07   :  { %2644 = vsyncadd [#allocation4], 4294967040 }
 0xe08   :  { %1907 = vsyncpa [#allocation3], 1 }
 0xe09   :  { %1908 = vsyncpa [#allocation6], 1 }
 0xe0a   :  { %1909 = vsyncpa [#allocation9], 1 }
 0xe0b   :  { %1910 = vsyncpa [#allocation12], 1 }
 0xe0c   :  { %1911 = vsyncpa [#allocation15], 1 }
 0xe0d   :  { %1912 = vsyncpa [#allocation18], 1 }
 0xe0e   :  { %1913 = vsyncpa [#allocation21], 1 }
 0xe0f   :  { %1914 = vsyncpa [#allocation4], 1 }

// kernel: tpu_custom_call.1
= control target key start
LH: loop header
LB: loop body
LE: loop exit
PB: predicated region body
PF: predicated region fallthrough
CT: control target
= control target key end

     0   :  { %18 = vsyncpa [#allocation3], 0  ;;  %s3219_s0 = inlined_call_operand.hbm [shape: f32[2,8,32], index: 0, kind: input, shape index: {}]   ;;  %s3220_s1 = inlined_call_operand.hbm [shape: f32[1,32], index: 1, kind: input, shape index: {}]   ;;  %s3221_s2 = inlined_call_operand.hbm [shape: f32[1,32], index: 2, kind: input, shape index: {}]   ;;  %s3222_s3 = inlined_call_operand.hbm [shape: bf16[32,96], index: 3, kind: input, shape index: {}]   ;;  %s3223_s4 = inlined_call_operand.hbm [shape: f32[1,96], index: 4, kind: input, shape index: {}]   ;;  %s3224_s5 = inlined_call_operand.hbm [shape: bf16[4,8,32], index: 5, kind: input, shape index: {}]   ;;  %s3225_s6 = inlined_call_operand.hbm [shape: f32[1,32], index: 6, kind: input, shape index: {}]   ;;  %s3226_s7 = inlined_call_operand.hbm [shape: f32[1,32], index: 7, kind: input, shape index: {}]   ;;  %s3227_s8 = inlined_call_operand.hbm [shape: f32[1,32], index: 8, kind: input, shape index: {}]   ;;  %s3228_s9 = inlined_call_operand.hbm [shape: bf16[32,128], index: 9, kind: input, shape index: {}]   ;;  %s3229_s10 = inlined_call_operand.hbm [shape: f32[1,128], index: 10, kind: input, shape index: {}]   ;;  %s3230_s11 = inlined_call_operand.hbm [shape: bf16[128,32], index: 11, kind: input, shape index: {}]   ;;  %s3231_s12 = inlined_call_operand.hbm [shape: f32[1,32], index: 12, kind: input, shape index: {}]   ;;  %s3232_s13 = inlined_call_operand.hbm [shape: f32[2,8,32], index: 13, kind: output, shape index: {}]  }
   0x1   :  { %19 = vsyncpa [#allocation6], 0 }
   0x2   :  { %20 = vsyncpa [#allocation9], 0 }
   0x3   :  { %21 = vsyncpa [#allocation12], 0 }
   0x4   :  { %22 = vsyncpa [#allocation15], 0 }
   0x5   :  { %23 = vsyncpa [#allocation18], 0 }
   0x6   :  { %24 = vsyncpa [#allocation21], 0 }
   0x7   :  { %25 = vsyncpa [#allocation4], 0  ;;  %s2645_s25 = smov [#allocation5]   ;;  %s2646_s27 = smov [#allocation8]  }
   0x8   :  { %s44_s26 = sshll.u32 %s2645_s25, 4  ;;  %s63_s28 = sshll.u32 %s2646_s27, 4  ;;  %s45_s26 = int_to_ptr.vmem [resolvable:$true] %s44_s26  ;;  %s2739_s28 = int_to_ptr.vmem [resolvable:$true] %s63_s28 }
   0x9   :  { %s2321_s14 = scalar_lea.hbm %s3220_s1, 16 }
   0xa   :  { %p2322_p0 = scmp.ne.s32.totalorder %s3220_s1, %s2321_s14  ;;  %p2325_p1 = scmp.lt.u32.totalorder %s2321_s14, %s3220_s1 }
   0xc   :  { %p2327_p2 = pnand %p2325_p1, %p2322_p0 }
   0xe   :  { %2330 = shalt.err (!%p2327_p2)
}
   0xf   :  { %s2331_s19 = scalar_lea.vmem %s45_s26, 16  ;;  %s2335_s20 = scalar_lea.vmem %s45_s26, 32 }
  0x10   :  { %p2332_p3 = scmp.ne.s32.totalorder %s45_s26, %s2331_s19  ;;  %p2336_p4 = scmp.lt.s32.totalorder %s45_s26, %s45_s26 }
  0x11   :  { %p2337_p5 = scmp.lt.s32.totalorder %s2335_s20, %s2331_s19 }
  0x13   :  { %p2338_p6 = por %p2337_p5, %p2336_p4 }
  0x15   :  { %p2339_p7 = pnand %p2338_p6, %p2332_p3 }
  0x17   :  { %2342 = shalt.err (!%p2339_p7)
}
  0x18   :  { %47 = dma.hbm_to_vmem [thread:$0]  %s3220_s1, 16, %s45_s26, [#allocation6]  }
  0x19   :  { %s2343_s25 = scalar_lea.hbm %s3222_s3, 256 }
  0x1a   :  { %p2344_p8 = scmp.ne.s32.totalorder %s3222_s3, %s2343_s25  ;;  %p2347_p9 = scmp.lt.u32.totalorder %s2343_s25, %s3222_s3 }
  0x1c   :  { %p2349_p10 = pnand %p2347_p9, %p2344_p8 }
  0x1e   :  { %2352 = shalt.err (!%p2349_p10)
}
  0x1f   :  { %s2353_s15 = scalar_lea.vmem %s2739_s28, 256  ;;  %p2358_p12 = scmp.lt.s32.totalorder %s2739_s28, %s2739_s28 }
  0x20   :  { %p2354_p11 = scmp.ne.s32.totalorder %s2739_s28, %s2353_s15  ;;  %p2359_p13 = scmp.lt.s32.totalorder %s2353_s15, %s2353_s15 }
  0x22   :  { %p2360_p0 = por %p2359_p13, %p2358_p12 }
  0x24   :  { %p2361_p1 = pnand %p2360_p0, %p2354_p11 }
  0x26   :  { %2364 = shalt.err (!%p2361_p1)
}
  0x27   :  { %s2647_s1 = smov 64   ;;  %s2648_s26 = smov 4  }
  0x28   :  { %69 = dma.hbm_to_vmem [thread:$0]  %s3222_s3, 256, %s2739_s28, [#allocation9], %s2647_s1, %s2647_s1, %s2648_s26  }
  0x29   :  { %s2649_s18 = smov [#allocation11]   ;;  %s2650_s20 = smov [#allocation14]  }
  0x2a   :  { %s85_s19 = sshll.u32 %s2649_s18, 4  ;;  %s108_s21 = sshll.u32 %s2650_s20, 4  ;;  %s86_s19 = int_to_ptr.vmem [resolvable:$true] %s85_s19  ;;  %s109_s21 = int_to_ptr.vmem [resolvable:$true] %s108_s21 }
  0x2b   :  { %s2365_s24 = scalar_lea.hbm %s3224_s5, 256 }
  0x2c   :  { %p2366_p2 = scmp.ne.s32.totalorder %s3224_s5, %s2365_s24  ;;  %p2369_p3 = scmp.lt.u32.totalorder %s2365_s24, %s3224_s5 }
  0x2e   :  { %p2371_p4 = pnand %p2369_p3, %p2366_p2 }
  0x30   :  { %2374 = shalt.err (!%p2371_p4)
}
  0x31   :  { %s2375_s3 = scalar_lea.vmem %s86_s19, 256  ;;  %p2380_p6 = scmp.lt.s32.totalorder %s86_s19, %s86_s19 }
  0x32   :  { %p2376_p5 = scmp.ne.s32.totalorder %s86_s19, %s2375_s3  ;;  %p2381_p7 = scmp.lt.s32.totalorder %s2375_s3, %s2375_s3 }
  0x34   :  { %p2382_p8 = por %p2381_p7, %p2380_p6 }
  0x36   :  { %p2383_p9 = pnand %p2382_p8, %p2376_p5 }
  0x38   :  { %2386 = shalt.err (!%p2383_p9)
}
  0x39   :  { %91 = dma.hbm_to_vmem [thread:$0]  %s3224_s5, 256, %s86_s19, [#allocation12], %s2647_s1, %s2647_s1, %s2648_s26  }
  0x3a   :  { %s2387_s17 = scalar_lea.hbm %s3226_s7, 16 }
  0x3b   :  { %p2388_p10 = scmp.ne.s32.totalorder %s3226_s7, %s2387_s17  ;;  %p2391_p11 = scmp.lt.u32.totalorder %s2387_s17, %s3226_s7 }
  0x3d   :  { %p2393_p12 = pnand %p2391_p11, %p2388_p10 }
  0x3f   :  { %2396 = shalt.err (!%p2393_p12)
}
  0x40   :  { %s2397_s24 = scalar_lea.vmem %s109_s21, 16  ;;  %s2401_s25 = scalar_lea.vmem %s109_s21, 32 }
  0x41   :  { %p2398_p13 = scmp.ne.s32.totalorder %s109_s21, %s2397_s24  ;;  %p2402_p0 = scmp.lt.s32.totalorder %s109_s21, %s109_s21 }
  0x42   :  { %p2403_p1 = scmp.lt.s32.totalorder %s2401_s25, %s2397_s24 }
  0x44   :  { %p2404_p2 = por %p2403_p1, %p2402_p0 }
  0x46   :  { %p2405_p3 = pnand %p2404_p2, %p2398_p13 }
  0x48   :  { %2408 = shalt.err (!%p2405_p3)
}
  0x49   :  { %111 = dma.hbm_to_vmem [thread:$0]  %s3226_s7, 16, %s109_s21, [#allocation15]  }
  0x4a   :  { %s2651_s27 = smov [#allocation17]   ;;  %s2652_s30 = smov [#allocation20]  }
  0x4b   :  { %s127_s29 = sshll.u32 %s2651_s27, 4  ;;  %s149_s3 = sshll.u32 %s2652_s30, 4  ;;  %s128_s29 = int_to_ptr.vmem [resolvable:$true] %s127_s29  ;;  %s2800_s3 = int_to_ptr.vmem [resolvable:$true] %s149_s3 }
  0x4c   :  { %s2409_s15 = scalar_lea.hbm %s3228_s9, 256 }
  0x4d   :  { %p2410_p4 = scmp.ne.s32.totalorder %s3228_s9, %s2409_s15  ;;  %p2413_p5 = scmp.lt.u32.totalorder %s2409_s15, %s3228_s9 }
  0x4f   :  { %p2415_p6 = pnand %p2413_p5, %p2410_p4 }
  0x51   :  { %2418 = shalt.err (!%p2415_p6)
}
  0x52   :  { %s2419_s7 = scalar_lea.vmem %s128_s29, 256  ;;  %p2424_p8 = scmp.lt.s32.totalorder %s128_s29, %s128_s29 }
  0x53   :  { %p2420_p7 = scmp.ne.s32.totalorder %s128_s29, %s2419_s7  ;;  %p2425_p9 = scmp.lt.s32.totalorder %s2419_s7, %s2419_s7 }
  0x55   :  { %p2426_p10 = por %p2425_p9, %p2424_p8 }
  0x57   :  { %p2427_p11 = pnand %p2426_p10, %p2420_p7 }
  0x59   :  { %2430 = shalt.err (!%p2427_p11)
}
  0x5a   :  { %133 = dma.hbm_to_vmem [thread:$0]  %s3228_s9, 256, %s128_s29, [#allocation18], %s2647_s1, %s2647_s1, %s2648_s26  }
  0x5b   :  { %s2431_s25 = scalar_lea.hbm %s3230_s11, 1024 }
  0x5c   :  { %p2432_p12 = scmp.ne.s32.totalorder %s3230_s11, %s2431_s25  ;;  %p2435_p13 = scmp.lt.u32.totalorder %s2431_s25, %s3230_s11 }
  0x5e   :  { %p2437_p0 = pnand %p2435_p13, %p2432_p12 }
  0x60   :  { %2440 = shalt.err (!%p2437_p0)
}
  0x61   :  { %s2441_s28 = scalar_lea.vmem %s2800_s3, 1024  ;;  %p2446_p2 = scmp.lt.s32.totalorder %s2800_s3, %s2800_s3 }
  0x62   :  { %p2442_p1 = scmp.ne.s32.totalorder %s2800_s3, %s2441_s28  ;;  %p2447_p3 = scmp.lt.s32.totalorder %s2441_s28, %s2441_s28 }
  0x64   :  { %p2448_p4 = por %p2447_p3, %p2446_p2 }
  0x66   :  { %p2449_p5 = pnand %p2448_p4, %p2442_p1 }
  0x68   :  { %2452 = shalt.err (!%p2449_p5)
}
  0x69   :  { %155 = dma.hbm_to_vmem [thread:$0]  %s3230_s11, 1024, %s2800_s3, [#allocation21], %s2647_s1, %s2647_s1, %s2648_s26  }
  0x6a   :  { %s2653_s14 = smov [#allocation2]   ;;  %s2453_s18 = scalar_lea.hbm %s3219_s0, 256 }
  0x6b   :  { %s31_s15 = sshll.u32 %s2653_s14, 4  ;;  %p2454_p6 = scmp.ne.s32.totalorder %s3219_s0, %s2453_s18  ;;  %s32_s15 = int_to_ptr.vmem [resolvable:$true] %s31_s15 }
  0x6c   :  { %p2457_p7 = scmp.lt.u32.totalorder %s2453_s18, %s3219_s0 }
  0x6e   :  { %p2459_p8 = pnand %p2457_p7, %p2454_p6 }
  0x70   :  { %2462 = shalt.err (!%p2459_p8)
}
  0x71   :  { %s2463_s23 = scalar_lea.vmem %s32_s15, 256  ;;  %p2468_p10 = scmp.lt.s32.totalorder %s32_s15, %s32_s15 }
  0x72   :  { %p2464_p9 = scmp.ne.s32.totalorder %s32_s15, %s2463_s23  ;;  %p2469_p11 = scmp.lt.s32.totalorder %s2463_s23, %s2463_s23 }
  0x74   :  { %p2470_p12 = por %p2469_p11, %p2468_p10 }
  0x76   :  { %p2471_p13 = pnand %p2470_p12, %p2464_p9 }
  0x78   :  { %2474 = shalt.err (!%p2471_p13)
}
  0x79   :  { %s2654_s11 = smov 128   ;;  %s2655_s26 = smov 8  }
  0x7a   :  { %37 = dma.hbm_to_vmem [thread:$0]  %s3219_s0, 256, %s32_s15, [#allocation3], %s2654_s11, %s2654_s11, %s2655_s26  }
  0x7b   :  { %s2656_s25 = smov [#allocation7]   ;;  %s2657_s19 = smov [#allocation10]  }
  0x7c   :  { %s54_s5 = sshll.u32 %s2656_s25, 4  ;;  %s76_s27 = sshll.u32 %s2657_s19, 4  ;;  %s55_s5 = int_to_ptr.vmem [resolvable:$true] %s54_s5  ;;  %s77_s27 = int_to_ptr.vmem [resolvable:$true] %s76_s27 }
  0x7d   :  { %s2475_s9 = scalar_lea.hbm %s3221_s2, 16 }
  0x7e   :  { %p2476_p0 = scmp.ne.s32.totalorder %s3221_s2, %s2475_s9  ;;  %p2479_p1 = scmp.lt.u32.totalorder %s2475_s9, %s3221_s2 }
  0x80   :  { %p2481_p2 = pnand %p2479_p1, %p2476_p0 }
  0x82   :  { %2484 = shalt.err (!%p2481_p2)
}
  0x83   :  { %s2485_s0 = scalar_lea.vmem %s55_s5, 16  ;;  %s2489_s15 = scalar_lea.vmem %s55_s5, 32 }
  0x84   :  { %p2486_p3 = scmp.ne.s32.totalorder %s55_s5, %s2485_s0  ;;  %p2490_p4 = scmp.lt.s32.totalorder %s55_s5, %s55_s5 }
  0x85   :  { %p2491_p5 = scmp.lt.s32.totalorder %s2489_s15, %s2485_s0 }
  0x87   :  { %p2492_p6 = por %p2491_p5, %p2490_p4 }
  0x89   :  { %p2493_p7 = pnand %p2492_p6, %p2486_p3 }
  0x8b   :  { %2496 = shalt.err (!%p2493_p7)
}
  0x8c   :  { %57 = dma.hbm_to_vmem [thread:$0]  %s3221_s2, 16, %s55_s5, [#allocation6]  }
  0x8d   :  { %s2497_s22 = scalar_lea.hbm %s3223_s4, 16 }
  0x8e   :  { %p2498_p8 = scmp.ne.s32.totalorder %s3223_s4, %s2497_s22  ;;  %p2501_p9 = scmp.lt.u32.totalorder %s2497_s22, %s3223_s4 }
  0x90   :  { %p2503_p10 = pnand %p2501_p9, %p2498_p8 }
  0x92   :  { %2506 = shalt.err (!%p2503_p10)
}
  0x93   :  { %s2507_s19 = scalar_lea.vmem %s77_s27, 16  ;;  %s2511_s30 = scalar_lea.vmem %s77_s27, 32 }
  0x94   :  { %p2508_p11 = scmp.ne.s32.totalorder %s77_s27, %s2507_s19  ;;  %p2512_p12 = scmp.lt.s32.totalorder %s77_s27, %s77_s27 }
  0x95   :  { %p2513_p13 = scmp.lt.s32.totalorder %s2511_s30, %s2507_s19 }
  0x97   :  { %p2514_p0 = por %p2513_p13, %p2512_p12 }
  0x99   :  { %p2515_p1 = pnand %p2514_p0, %p2508_p11 }
  0x9b   :  { %2518 = shalt.err (!%p2515_p1)
}
  0x9c   :  { %79 = dma.hbm_to_vmem [thread:$0]  %s3223_s4, 16, %s77_s27, [#allocation9]  }
  0x9d   :  { %s2658_s28 = smov [#allocation13]   ;;  %s2659_s29 = smov [#allocation16]  }
  0x9e   :  { %s98_s9 = sshll.u32 %s2658_s28, 4  ;;  %s118_s14 = sshll.u32 %s2659_s29, 4  ;;  %s99_s9 = int_to_ptr.vmem [resolvable:$true] %s98_s9  ;;  %s119_s14 = int_to_ptr.vmem [resolvable:$true] %s118_s14 }
  0x9f   :  { %s2519_s0 = scalar_lea.hbm %s3225_s6, 16 }
  0xa0   :  { %p2520_p2 = scmp.ne.s32.totalorder %s3225_s6, %s2519_s0  ;;  %p2523_p3 = scmp.lt.u32.totalorder %s2519_s0, %s3225_s6 }
  0xa2   :  { %p2525_p4 = pnand %p2523_p3, %p2520_p2 }
  0xa4   :  { %2528 = shalt.err (!%p2525_p4)
}
  0xa5   :  { %s2529_s4 = scalar_lea.vmem %s99_s9, 16  ;;  %s2533_s27 = scalar_lea.vmem %s99_s9, 32 }
  0xa6   :  { %p2530_p5 = scmp.ne.s32.totalorder %s99_s9, %s2529_s4  ;;  %p2534_p6 = scmp.lt.s32.totalorder %s99_s9, %s99_s9 }
  0xa7   :  { %p2535_p7 = scmp.lt.s32.totalorder %s2533_s27, %s2529_s4 }
  0xa9   :  { %p2536_p8 = por %p2535_p7, %p2534_p6 }
  0xab   :  { %p2537_p9 = pnand %p2536_p8, %p2530_p5 }
  0xad   :  { %2540 = shalt.err (!%p2537_p9)
}
  0xae   :  { %101 = dma.hbm_to_vmem [thread:$0]  %s3225_s6, 16, %s99_s9, [#allocation12]  }
  0xaf   :  { %s2541_s24 = scalar_lea.hbm %s3227_s8, 16 }
  0xb0   :  { %p2542_p10 = scmp.ne.s32.totalorder %s3227_s8, %s2541_s24  ;;  %p2545_p11 = scmp.lt.u32.totalorder %s2541_s24, %s3227_s8 }
  0xb2   :  { %p2547_p12 = pnand %p2545_p11, %p2542_p10 }
  0xb4   :  { %2550 = shalt.err (!%p2547_p12)
}
  0xb5   :  { %s2551_s5 = scalar_lea.vmem %s119_s14, 16  ;;  %s2555_s28 = scalar_lea.vmem %s119_s14, 32 }
  0xb6   :  { %p2552_p13 = scmp.ne.s32.totalorder %s119_s14, %s2551_s5  ;;  %p2556_p0 = scmp.lt.s32.totalorder %s119_s14, %s119_s14 }
  0xb7   :  { %p2557_p1 = scmp.lt.s32.totalorder %s2555_s28, %s2551_s5 }
  0xb9   :  { %p2558_p2 = por %p2557_p1, %p2556_p0 }
  0xbb   :  { %p2559_p3 = pnand %p2558_p2, %p2552_p13 }
  0xbd   :  { %2562 = shalt.err (!%p2559_p3)
}
  0xbe   :  { %121 = dma.hbm_to_vmem [thread:$0]  %s3227_s8, 16, %s119_s14, [#allocation15]  }
  0xbf   :  { %s2660_s29 = smov [#allocation19]   ;;  %s2661_s17 = smov [#allocation22]  }
  0xc0   :  { %s140_s16 = sshll.u32 %s2660_s29, 4  ;;  %s162_s0 = sshll.u32 %s2661_s17, 4  ;;  %s141_s16 = int_to_ptr.vmem [resolvable:$true] %s140_s16  ;;  %s163_s0 = int_to_ptr.vmem [resolvable:$true] %s162_s0 }
  0xc1   :  { %s2563_s20 = scalar_lea.hbm %s3229_s10, 16 }
  0xc2   :  { %p2564_p4 = scmp.ne.s32.totalorder %s3229_s10, %s2563_s20  ;;  %p2567_p5 = scmp.lt.u32.totalorder %s2563_s20, %s3229_s10 }
  0xc4   :  { %p2569_p6 = pnand %p2567_p5, %p2564_p4 }
  0xc6   :  { %2572 = shalt.err (!%p2569_p6)
}
  0xc7   :  { %s2573_s8 = scalar_lea.vmem %s141_s16, 16  ;;  %s2577_s14 = scalar_lea.vmem %s141_s16, 32 }
  0xc8   :  { %p2574_p7 = scmp.ne.s32.totalorder %s141_s16, %s2573_s8  ;;  %p2578_p8 = scmp.lt.s32.totalorder %s141_s16, %s141_s16 }
  0xc9   :  { %p2579_p9 = scmp.lt.s32.totalorder %s2577_s14, %s2573_s8 }
  0xcb   :  { %p2580_p10 = por %p2579_p9, %p2578_p8 }
  0xcd   :  { %p2581_p11 = pnand %p2580_p10, %p2574_p7 }
  0xcf   :  { %2584 = shalt.err (!%p2581_p11)
}
  0xd0   :  { %143 = dma.hbm_to_vmem [thread:$0]  %s3229_s10, 16, %s141_s16, [#allocation18]  }
  0xd1   :  { %s2585_s25 = scalar_lea.hbm %s3231_s12, 16 }
  0xd2   :  { %p2586_p12 = scmp.ne.s32.totalorder %s3231_s12, %s2585_s25  ;;  %p2589_p13 = scmp.lt.u32.totalorder %s2585_s25, %s3231_s12 }
  0xd4   :  { %p2591_p0 = pnand %p2589_p13, %p2586_p12 }
  0xd6   :  { %2594 = shalt.err (!%p2591_p0)
}
  0xd7   :  { %s2595_s28 = scalar_lea.vmem %s163_s0, 16  ;;  %s2599_s6 = scalar_lea.vmem %s163_s0, 32 }
  0xd8   :  { %p2596_p1 = scmp.ne.s32.totalorder %s163_s0, %s2595_s28  ;;  %p2600_p2 = scmp.lt.s32.totalorder %s163_s0, %s163_s0 }
  0xd9   :  { %p2601_p3 = scmp.lt.s32.totalorder %s2599_s6, %s2595_s28 }
  0xdb   :  { %p2602_p4 = por %p2601_p3, %p2600_p2 }
  0xdd   :  { %p2603_p5 = pnand %p2602_p4, %p2596_p1 }
  0xdf   :  { %2606 = shalt.err (!%p2603_p5)
}
  0xe0   :  { %165 = dma.hbm_to_vmem [thread:$0]  %s3231_s12, 16, %s163_s0, [#allocation21]  }
  0xe1   :  { %2629 = dma.done.wait [#allocation3], 256  }
  0xe2   :  { %2630 = vsyncadd [#allocation3], 4294967040 }
  0xe3   :  { %2631 = dma.done.wait [#allocation6], 32  }
  0xe4   :  { %2632 = vsyncadd [#allocation6], 4294967264 }
  0xe5   :  { %2633 = dma.done.wait [#allocation9], 272  }
  0xe6   :  { %2634 = vsyncadd [#allocation9], 4294967024 }
  0xe7   :  { %2635 = dma.done.wait [#allocation12], 272  }
  0xe8   :  { %2636 = vsyncadd [#allocation12], 4294967024 }
  0xe9   :  { %2637 = dma.done.wait [#allocation15], 32  }
  0xea   :  { %2638 = vsyncadd [#allocation15], 4294967264 }
  0xeb   :  { %2639 = dma.done.wait [#allocation18], 272  }
  0xec   :  { %2640 = vsyncadd [#allocation18], 4294967024 }
  0xed   :  { %2641 = dma.done.wait [#allocation21], 1040  }
  0xee   :  { %2642 = vsyncadd [#allocation21], 4294966256  ;;  %vm210_vm0 = vcmask 261120   ;;  %v2924_v0 = vld [vmem:[#allocation2] sm:$0xff]  ;;  %v207_v1 = vld [vmem:[#allocation2 + $0x8] sm:$0xff]  ;;  %v2662_v15 = vmov 0.0  }
  0xef   :  { %v211_v2 = vsel %vm210_vm0, %v2924_v0, 0.0  ;;  %v214_v3 = vsel %vm210_vm0, %v207_v1, 0.0  ;;  %v2260_v14 = vld [vmem:[#allocation8] sm:$0xff]   ;;  %2026 = vmatprep.subr.bf16.mxu1 %v2662_v15  ;;  %2052 = vmatprep.subr.bf16.mxu0 %v2662_v15  ;;  %v2261_v16 = vld [vmem:[#allocation8 + $0x8] sm:$0xff]   ;;  %vm2663_vm1 = vmmov 0   ;;  %s2664_s12 = smov 112  }
  0xf0   :  { %212 = vadd.xlane.f32.xlu0 %v211_v2  ;;  %2027 = vmatpush3.bf16.msra.mxu1 %v2260_v14  ;;  %v1915_v25 = vld [vmem:[#allocation5] ss:$0 sm:$0xff]  ;;  %v1916_v29 = vld [vmem:[#allocation7] ss:$0 sm:$0xff]  ;;  %v1917_v34 = vld [vmem:[#allocation10] ss:$0 sm:$0xff] }
  0xf1   :  { %2030 = vmatprep.mubr.msk.bf16.mxu1 %vm2663_vm1, %v2662_v15  ;;  %2028 = vmatprep.subr.bf16.mxu1 %v2662_v15  ;;  %s2665_s29 = smov 120   ;;  %s2666_s16 = smov 104   ;;  %vm379_vm2 = vcmask 64512   ;;  %vm626_vm3 = vcmask 1043456  }
  0xf2   :  { %2054 = vmatprep.mubr.msk.bf16.mxu0 %vm2663_vm1, %v2662_v15  ;;  %s2667_s17 = smov 96  }
  0xf4   :  { %215 = vadd.xlane.f32.xlu0 %v214_v3  ;;  %2029 = vmatpush3.bf16.msra.mxu1 %v2261_v16 }
  0xf5   :  { %2034 = vmatprep.subr.bf16.mxu1 %v2662_v15 }
 0x17d   :  { %v213_v4 = vpop.xlane.xlu0 %212 }
 0x17e   :  { %v218_v5 = vmul.f32 0.03125, %v213_v4 }
 0x180   :  { %v220_v6 = vsub.f32 %v2924_v0, %v218_v5 }
 0x181   :  { %v216_v7 = vpop.xlane.xlu0 %215 }
 0x182   :  { %v219_v8 = vmul.f32 0.03125, %v216_v7  ;;  %v222_v9 = vmul.f32 %v220_v6, %v220_v6 }
 0x184   :  { %v221_v10 = vsub.f32 %v207_v1, %v219_v8  ;;  %v224_v11 = vsel %vm210_vm0, %v222_v9, 0.0 }
 0x185   :  { %225 = vadd.xlane.f32.xlu1 %v224_v11 }
 0x186   :  { %v223_v12 = vmul.f32 %v221_v10, %v221_v10 }
 0x188   :  { %v227_v13 = vsel %vm210_vm0, %v223_v12, 0.0 }
 0x189   :  { %228 = vadd.xlane.f32.xlu1 %v227_v13 }
 0x212   :  { %v226_v17 = vpop.xlane.xlu1 %225 }
 0x213   :  { %v230_v18 = vmul.f32 0.03125, %v226_v17 }
 0x215   :  { %v232_v19 = vadd.f32 1e-05, %v230_v18 }
 0x216   :  { %v229_v20 = vpop.xlane.xlu1 %228 }
 0x217   :  { %2272 = vrsqrt.f32 %v232_v19  ;;  %v231_v21 = vmul.f32 0.03125, %v229_v20 }
 0x219   :  { %v233_v22 = vadd.f32 1e-05, %v231_v21 }
 0x21b   :  { %2274 = vrsqrt.f32 %v233_v22 }
 0x221   :  { %v2273_v23 = vpop.eup %2272 }
 0x222   :  { %v236_v24 = vmul.f32 %v2273_v23, %v220_v6 }
 0x224   :  { %v244_v28 = vmul.f32 %v1915_v25, %v236_v24 }
 0x225   :  { %v2275_v26 = vpop.eup %2274 }
 0x226   :  { %v237_v27 = vmul.f32 %v2275_v26, %v221_v10  ;;  %v252_v31 = vadd.f32 %v1916_v29, %v244_v28 }
 0x228   :  { %v245_v30 = vmul.f32 %v1915_v25, %v237_v27 }
 0x22a   :  { %v253_v32 = vadd.f32 %v1916_v29, %v245_v30 }
 0x22c   :  { %v254_v33 = vpack.c.bf16 %v253_v32, %v252_v31 }
 0x22e   :  { %2031 = vmatmul.mubr.msk.bf16.vlgmr.msra.gmra.mrb[0].mxu1 %vm210_vm0, %v254_v33 }
 0x22f   :  { %2036 = vmatprep.mubr.msk.bf16.mxu1 %vm2663_vm1, %v2662_v15 }
 0x301   :  { %v315_v35 = vpop.f32.mrb[0].mxu1 }
 0x302   :  { %v2032_v36 = vpop.f32.mrb[1].mxu1  ;;  %v316_v37 = vadd.f32 %v1917_v34, %v315_v35 }
 0x303   :  { %v318_v38 = vpop.f32.mrb[2].mxu1 }
 0x304   :  { %v319_v39 = vadd.f32 %v1917_v34, %v318_v38  ;;  %v2033_v40 = vpop.f32.mrb[3].mxu1  ;;  %v322_v43 = vmul.f32 0.35355338, %v316_v37 }
 0x306   :  { %v2235_v41 = vpack.i.bf16 %v319_v39, %v316_v37  ;;  %v2943_v42 = vpack.c.bf16 %v319_v39, %v316_v37  ;;  %v323_v44 = vmul.f32 0.35355338, %v319_v39 }
 0x308   :  { %2236 = vrot.lane.b32.xlu1 %v2235_v41, %s2664_s12  ;;  %2231 = vrot.lane.b32.xlu0 %v2235_v41, %s2665_s29  ;;  %v2245_v45 = vpack.i.bf16 %v323_v44, %v322_v43  ;;  %v2946_v46 = vpack.c.bf16 %v323_v44, %v322_v43 }
 0x30c   :  { %2241 = vrot.lane.b32.xlu1 %v2235_v41, %s2666_s16 }
 0x310   :  { %377 = vrot.lane.b32.xlu1 %v2943_v42, %s2667_s17 }
 0x314   :  { %2246 = vrot.lane.b32.xlu1 %v2245_v45, %s2665_s29 }
 0x37a   :  { %v2237_v47 = vpop.permute.xlu1 %2236  ;;  %v2232_v48 = vpop.permute.xlu0 %2231 }
 0x37b   :  { %v2234_v49 = vunpack.i.h.bf16 %v2232_v48  ;;  %v2233_v50 = vunpack.i.l.bf16 %v2232_v48  ;;  %v2239_v51 = vunpack.i.h.bf16 %v2237_v47  ;;  %v2238_v52 = vunpack.i.l.bf16 %v2237_v47 }
 0x37d   :  { %v2950_v53 = vpack.c.bf16 %v2234_v49, %v2233_v50  ;;  %v2954_v57 = vpack.c.bf16 %v2239_v51, %v2238_v52 }
 0x37e   :  { %v2242_v54 = vpop.permute.xlu1 %2241 }
 0x37f   :  { %v2244_v55 = vunpack.i.h.bf16 %v2242_v54  ;;  %v2243_v56 = vunpack.i.l.bf16 %v2242_v54  ;;  %427 = vrot.lane.b32.xlu0 %v2950_v53, %s2667_s17 }
 0x381   :  { %v2956_v58 = vpack.c.bf16 %v2244_v55, %v2243_v56 }
 0x382   :  { %v378_v59 = vpop.permute.xlu1 %377 }
 0x383   :  { %v384_v60 = vsel %vm379_vm2, %v378_v59, 0  ;;  %476 = vrot.lane.b32.xlu0 %v2954_v57, %s2667_s17  ;;  %525 = vrot.lane.b32.xlu1 %v2956_v58, %s2667_s17 }
 0x384   :  { %2035 = vmatpush3.bf16.xpose.msra.mxu1 %v384_v60 }
 0x385   :  { %2040 = vmatprep.subr.bf16.mxu1 %v2662_v15 }
 0x386   :  { %v2247_v61 = vpop.permute.xlu1 %2246 }
 0x387   :  { %2251 = vrot.lane.b32.xlu0 %v2245_v45, %s2664_s12  ;;  %2256 = vrot.lane.b32.xlu1 %v2245_v45, %s2666_s16  ;;  %v2249_v1 = vunpack.i.h.bf16 %v2247_v61  ;;  %v2248_v2 = vunpack.i.l.bf16 %v2247_v61 }
 0x389   :  { %v2972_v6 = vpack.c.bf16 %v2249_v1, %v2248_v2  ;;  %v1062_v1 = vrot.slane %v2950_v53, 4  ;;  %v1164_v2 = vrot.slane %v2956_v58, 4 }
 0x38b   :  { %2037 = vmatmul.mubr.msk.bf16.vlgmr.msra.gmra.mrb[4].mxu1 %vm379_vm2, %v2946_v46 }
 0x38c   :  { %2042 = vmatprep.mubr.msk.bf16.mxu1 %vm2663_vm1, %v2662_v15 }
 0x3f1   :  { %v428_v62 = vpop.permute.xlu0 %427 }
 0x3f2   :  { %v433_v63 = vsel %vm379_vm2, %v428_v62, 0  ;;  %v1011_v62 = vrot.slane %v2943_v42, 4 }
 0x3f3   :  { %2041 = vmatpush3.bf16.xpose.msra.mxu1 %v433_v63  ;;  %v1113_v63 = vrot.slane %v2954_v57, 4 }
 0x3f4   :  { %2046 = vmatprep.subr.bf16.mxu1 %v2662_v15 }
 0x3f5   :  { %v477_v3 = vpop.permute.xlu0 %476  ;;  %v526_v4 = vpop.permute.xlu1 %525 }
 0x3f6   :  { %v531_v5 = vsel %vm379_vm2, %v526_v4, 0  ;;  %v482_v9 = vsel %vm379_vm2, %v477_v3, 0 }
 0x3f7   :  { %2053 = vmatpush3.bf16.xpose.msra.mxu0 %v531_v5 }
 0x3f8   :  { %2064 = vmatprep.subr.bf16.mxu0 %v2662_v15 }
 0x3f9   :  { %v2252_v7 = vpop.permute.xlu0 %2251  ;;  %v2257_v8 = vpop.permute.xlu1 %2256 }
 0x3fa   :  { %v2259_v10 = vunpack.i.h.bf16 %v2257_v8  ;;  %v2258_v11 = vunpack.i.l.bf16 %v2257_v8  ;;  %2043 = vmatmul.mubr.msk.bf16.vlgmr.msra.gmra.mrb[8].mxu1 %vm379_vm2, %v2972_v6  ;;  %v2254_v12 = vunpack.i.h.bf16 %v2252_v7  ;;  %v2253_v13 = vunpack.i.l.bf16 %v2252_v7 }
 0x3fb   :  { %2047 = vmatpush3.bf16.xpose.msra.mxu1 %v482_v9  ;;  %2048 = vmatprep.mubr.msk.bf16.mxu1 %vm2663_vm1, %v2662_v15 }
 0x3fc   :  { %v2980_v14 = vpack.c.bf16 %v2259_v10, %v2258_v11  ;;  %2058 = vmatprep.subr.bf16.mxu1 %v2662_v15  ;;  %v2987_v16 = vpack.c.bf16 %v2254_v12, %v2253_v13 }
 0x3fe   :  { %2055 = vmatmul.mubr.msk.bf16.vlgmr.msra.gmra.mrb[0].mxu0 %vm379_vm2, %v2980_v14 }
 0x3ff   :  { %2066 = vmatprep.mubr.msk.bf16.mxu0 %vm2663_vm1, %v2662_v15 }
 0x402   :  { %2049 = vmatmul.mubr.msk.bf16.vlgmr.msra.gmra.mrb[12].mxu1 %vm379_vm2, %v2987_v16 }
 0x403   :  { %2060 = vmatprep.mubr.msk.bf16.mxu1 %vm2663_vm1, %v2662_v15 }
 0x45e   :  { %v420_v17 = vpop.f32.mrb[4].mxu1 }
 0x45f   :  { %v2038_v18 = vpop.f32.mrb[5].mxu1  ;;  %v573_v19 = vsel %vm379_vm2, %v420_v17, -inf }
 0x460   :  { %574 = vmax.xlane.f32.xlu0 %v573_v19  ;;  %v423_v20 = vpop.f32.mrb[6].mxu1 }
 0x461   :  { %v2039_v21 = vpop.f32.mrb[7].mxu1 }
 0x4cd   :  { %v469_v22 = vpop.f32.mrb[8].mxu1 }
 0x4ce   :  { %v2044_v23 = vpop.f32.mrb[9].mxu1  ;;  %v576_v24 = vsel %vm379_vm2, %v469_v22, -inf }
 0x4cf   :  { %577 = vmax.xlane.f32.xlu1 %v576_v24  ;;  %v472_v25 = vpop.f32.mrb[10].mxu1  ;;  %v372_v24 = vld [vmem:[#allocation11] sm:$0xf] }
 0x4d0   :  { %v2045_v26 = vpop.f32.mrb[11].mxu1 }
 0x4d1   :  { %v567_v27 = vpop.f32.mrb[0].mxu0 }
 0x4d2   :  { %v2056_v28 = vpop.f32.mrb[1].mxu0  ;;  %v582_v36 = vsel %vm379_vm2, %v567_v27, -inf }
 0x4d3   :  { %v570_v29 = vpop.f32.mrb[2].mxu0  ;;  %v3038_v28 = vsel %vm626_vm3, %v372_v24, 0 }
 0x4d4   :  { %v2057_v30 = vpop.f32.mrb[3].mxu0 }
 0x4d5   :  { %v518_v31 = vpop.f32.mrb[12].mxu1 }
 0x4d6   :  { %v2050_v32 = vpop.f32.mrb[13].mxu1  ;;  %v579_v33 = vsel %vm379_vm2, %v518_v31, -inf }
 0x4d7   :  { %580 = vmax.xlane.f32.xlu0 %v579_v33  ;;  %v521_v34 = vpop.f32.mrb[14].mxu1  ;;  %v373_v33 = vld [vmem:[#allocation11 + $0x4] sm:$0xf] }
 0x4d8   :  { %v2051_v35 = vpop.f32.mrb[15].mxu1  ;;  %v3051_v34 = vsel %vm626_vm3, %v373_v33, 0 }
 0x4d9   :  { %v374_v35 = vld [vmem:[#allocation11 + $0x8] sm:$0xf] }
 0x4db   :  { %583 = vmax.xlane.f32.xlu0 %v582_v36 }
 0x4ed   :  { %v575_v37 = vpop.xlane.xlu0 %574 }
 0x4ee   :  { %v585_v38 = vsub.f32 %v420_v17, %v575_v37 }
 0x4f0   :  { %v589_v39 = vmul.f32 1.442695, %v585_v38 }
 0x4f2   :  { %2276 = vpow2.f32 %v589_v39  ;;  %v3056_v39 = vsel %vm626_vm3, %v374_v35, 0 }
 0x4fc   :  { %v2277_v40 = vpop.eup %2276 }
 0x4fd   :  { %v597_v41 = vsel %vm379_vm2, %v2277_v40, 0.0 }
 0x4fe   :  { %598 = vadd.xlane.f32.xlu0 %v597_v41  ;;  %v375_v41 = vld [vmem:[#allocation11 + $0xc] sm:$0xf] }
 0x55c   :  { %v578_v43 = vpop.xlane.xlu1 %577 }
 0x55d   :  { %v586_v44 = vsub.f32 %v469_v22, %v578_v43 }
 0x55f   :  { %v591_v45 = vmul.f32 1.442695, %v586_v44 }
 0x561   :  { %2278 = vpow2.f32 %v591_v45 }
 0x564   :  { %v581_v47 = vpop.xlane.xlu0 %580 }
 0x565   :  { %v587_v48 = vsub.f32 %v518_v31, %v581_v47 }
 0x567   :  { %v593_v49 = vmul.f32 1.442695, %v587_v48  ;;  %v3063_v48 = vsel %vm626_vm3, %v375_v41, 0 }
 0x568   :  { %v584_v50 = vpop.xlane.xlu0 %583 }
 0x569   :  { %2280 = vpow2.f32 %v593_v49  ;;  %v588_v51 = vsub.f32 %v567_v27, %v584_v50 }
 0x56b   :  { %v2279_v52 = vpop.eup %2278  ;;  %v595_v54 = vmul.f32 1.442695, %v588_v51 }
 0x56c   :  { %v600_v55 = vsel %vm379_vm2, %v2279_v52, 0.0 }
 0x56d   :  { %2282 = vpow2.f32 %v595_v54  ;;  %601 = vadd.xlane.f32.xlu1 %v600_v55 }
 0x573   :  { %v2281_v56 = vpop.eup %2280 }
 0x574   :  { %v603_v59 = vsel %vm379_vm2, %v2281_v56, 0.0 }
 0x575   :  { %604 = vadd.xlane.f32.xlu0 %v603_v59 }
 0x577   :  { %v2283_v60 = vpop.eup %2282 }
 0x578   :  { %v606_v61 = vsel %vm379_vm2, %v2283_v60, 0.0 }
 0x579   :  { %607 = vadd.xlane.f32.xlu1 %v606_v61 }
 0x58a   :  { %670 = vrot.lane.b32.xlu1 %v2950_v53, %s2647_s1 }
 0x58b   :  { %621 = vrot.lane.b32.xlu0 %v2943_v42, %s2647_s1  ;;  %v599_v3 = vpop.xlane.xlu0 %598 }
 0x58c   :  { %2284 = vrcp.f32 %v599_v3 }
 0x58e   :  { %718 = vrot.lane.b32.xlu1 %v2954_v57, %s2647_s1 }
 0x58f   :  { %1012 = vrot.lane.b32.xlu0 %v1011_v62, %s2667_s17 }
 0x592   :  { %766 = vrot.lane.b32.xlu1 %v2956_v58, %s2647_s1 }
 0x593   :  { %1114 = vrot.lane.b32.xlu0 %v1113_v63, %s2667_s17 }
 0x596   :  { %1063 = vrot.lane.b32.xlu1 %v1062_v1, %s2667_s17  ;;  %v2285_v5 = vpop.eup %2284 }
 0x597   :  { %v613_v8 = vmul.f32 %v2285_v5, %v2277_v40 }
 0x599   :  { %v617_v17 = vpack.c.bf16 %v613_v8, %v613_v8 }
 0x59a   :  { %1165 = vrot.lane.b32.xlu1 %v1164_v2, %s2667_s17 }
 0x5fa   :  { %v602_v4 = vpop.xlane.xlu1 %601 }
 0x5fb   :  { %2286 = vrcp.f32 %v602_v4 }
 0x602   :  { %v605_v7 = vpop.xlane.xlu0 %604 }
 0x603   :  { %2288 = vrcp.f32 %v605_v7 }
 0x605   :  { %v2287_v9 = vpop.eup %2286 }
 0x606   :  { %v608_v10 = vpop.xlane.xlu1 %607  ;;  %v622_v11 = vpop.permute.xlu0 %621  ;;  %v614_v13 = vmul.f32 %v2287_v9, %v2279_v52 }
 0x607   :  { %2290 = vrcp.f32 %v608_v10  ;;  %v628_v12 = vsel %vm626_vm3, %v622_v11, 0  ;;  %v1010_v11 = vrot.slane %v2946_v46, 4  ;;  %v1112_v46 = vrot.slane %v2987_v16, 4 }
 0x608   :  { %2059 = vmatpush3.bf16.msra.mxu1 %v628_v12  ;;  %v618_v21 = vpack.c.bf16 %v614_v13, %v614_v13 }
 0x609   :  { %2070 = vmatprep.subr.bf16.mxu1 %v2662_v15 }
 0x60a   :  { %v671_v18 = vpop.permute.xlu1 %670  ;;  %v1013_v52 = vpop.permute.xlu0 %1012 }
 0x60b   :  { %v676_v19 = vsel %vm626_vm3, %v671_v18, 0  ;;  %2061 = vmatmul.mubr.msk.bf16.vlgmr.msra.gmra.mrb[16].mxu1 %vm379_vm2, %v617_v17  ;;  %v1061_v17 = vrot.slane %v2972_v6, 4  ;;  %v1163_v6 = vrot.slane %v2980_v14, 4 }
 0x60c   :  { %2065 = vmatpush3.bf16.msra.mxu0 %v676_v19  ;;  %2072 = vmatprep.mubr.msk.bf16.mxu1 %vm2663_vm1, %v2662_v15 }
 0x60d   :  { %v2289_v20 = vpop.eup %2288  ;;  %2076 = vmatprep.subr.bf16.mxu0 %v2662_v15 }
 0x60e   :  { %v615_v22 = vmul.f32 %v2289_v20, %v2281_v56  ;;  %v719_v23 = vpop.permute.xlu1 %718  ;;  %v1115_v10 = vpop.permute.xlu0 %1114 }
 0x60f   :  { %v724_v25 = vsel %vm626_vm3, %v719_v23, 0  ;;  %2067 = vmatmul.mubr.msk.bf16.vlgmr.msra.gmra.mrb[4].mxu0 %vm379_vm2, %v618_v21  ;;  %v1120_v12 = vsel %vm379_vm2, %v1115_v10, 0 }
 0x610   :  { %2071 = vmatpush3.bf16.msra.mxu1 %v724_v25  ;;  %v619_v26 = vpack.c.bf16 %v615_v22, %v615_v22  ;;  %2078 = vmatprep.mubr.msk.bf16.mxu0 %vm2663_vm1, %v2662_v15 }
 0x611   :  { %v2291_v27 = vpop.eup %2290  ;;  %2082 = vmatprep.subr.bf16.mxu1 %v2662_v15 }
 0x612   :  { %v616_v29 = vmul.f32 %v2291_v27, %v2283_v60  ;;  %v767_v30 = vpop.permute.xlu1 %766  ;;  %v1018_v60 = vsel %vm379_vm2, %v1013_v52, 0 }
 0x613   :  { %v772_v31 = vsel %vm626_vm3, %v767_v30, 0  ;;  %2073 = vmatmul.mubr.msk.bf16.vlgmr.msra.gmra.mrb[20].mxu1 %vm379_vm2, %v619_v26 }
 0x614   :  { %2077 = vmatpush3.bf16.msra.mxu0 %v772_v31  ;;  %v620_v32 = vpack.c.bf16 %v616_v29, %v616_v29  ;;  %2083 = vmatpush3.bf16.msra.mxu1 %v3038_v28 }
 0x615   :  { %2084 = vmatprep.mubr.msk.bf16.mxu1 %vm2663_vm1, %v2662_v15  ;;  %2088 = vmatprep.subr.bf16.mxu0 %v2662_v15 }
 0x616   :  { %2094 = vmatprep.subr.bf16.mxu1 %v2662_v15  ;;  %v1064_v3 = vpop.permute.xlu1 %1063 }
 0x617   :  { %2079 = vmatmul.mubr.msk.bf16.vlgmr.msra.gmra.mrb[8].mxu0 %vm379_vm2, %v620_v32  ;;  %v1069_v9 = vsel %vm379_vm2, %v1064_v3, 0 }
 0x618   :  { %2090 = vmatprep.mubr.msk.bf16.mxu0 %vm2663_vm1, %v2662_v15  ;;  %2089 = vmatpush3.bf16.msra.mxu0 %v3051_v34 }
 0x619   :  { %2100 = vmatprep.subr.bf16.mxu0 %v2662_v15 }
 0x61a   :  { %v1166_v13 = vpop.permute.xlu1 %1165 }
 0x61b   :  { %v1171_v18 = vsel %vm379_vm2, %v1166_v13, 0 }
 0x6de   :  { %v664_v36 = vpop.f32.mrb[16].mxu1 }
 0x6df   :  { %v814_v37 = vpack.c.bf16 %v664_v36, %v664_v36  ;;  %v2062_v38 = vpop.f32.mrb[17].mxu1 }
 0x6e0   :  { %v667_v40 = vpop.f32.mrb[18].mxu1 }
 0x6e1   :  { %v2063_v43 = vpop.f32.mrb[19].mxu1  ;;  %2085 = vmatmul.mubr.msk.bf16.vlgmr.msra.gmra.mrb[24].mxu1 %vm379_vm2, %v814_v37 }
 0x6e2   :  { %2095 = vmatpush3.bf16.msra.mxu1 %v3056_v39  ;;  %v712_v44 = vpop.f32.mrb[4].mxu0  ;;  %2096 = vmatprep.mubr.msk.bf16.mxu1 %vm2663_vm1, %v2662_v15 }
 0x6e3   :  { %v815_v45 = vpack.c.bf16 %v712_v44, %v712_v44  ;;  %v2068_v47 = vpop.f32.mrb[5].mxu0  ;;  %2106 = vmatprep.subr.bf16.mxu1 %v2662_v15 }
 0x6e4   :  { %v715_v49 = vpop.f32.mrb[6].mxu0 }
 0x6e5   :  { %v2069_v50 = vpop.f32.mrb[7].mxu0  ;;  %2091 = vmatmul.mubr.msk.bf16.vlgmr.msra.gmra.mrb[12].mxu0 %vm379_vm2, %v815_v45 }
 0x6e6   :  { %2101 = vmatpush3.bf16.msra.mxu0 %v3063_v48  ;;  %v760_v51 = vpop.f32.mrb[20].mxu1  ;;  %2102 = vmatprep.mubr.msk.bf16.mxu0 %vm2663_vm1, %v2662_v15 }
 0x6e7   :  { %v816_v54 = vpack.c.bf16 %v760_v51, %v760_v51  ;;  %v2074_v55 = vpop.f32.mrb[21].mxu1  ;;  %2112 = vmatprep.subr.bf16.mxu0 %v2662_v15 }
 0x6e8   :  { %v763_v56 = vpop.f32.mrb[22].mxu1 }
 0x6e9   :  { %v2075_v59 = vpop.f32.mrb[23].mxu1  ;;  %2097 = vmatmul.mubr.msk.bf16.vlgmr.msra.gmra.mrb[28].mxu1 %vm379_vm2, %v816_v54 }
 0x6ea   :  { %v808_v61 = vpop.f32.mrb[8].mxu0  ;;  %2108 = vmatprep.mubr.msk.bf16.mxu1 %vm2663_vm1, %v2662_v15 }
 0x6eb   :  { %v817_v4 = vpack.c.bf16 %v808_v61, %v808_v61  ;;  %2107 = vmatpush3.bf16.xpose.msra.mxu1 %v1018_v60  ;;  %v2080_v5 = vpop.f32.mrb[9].mxu0 }
 0x6ec   :  { %v811_v7 = vpop.f32.mrb[10].mxu0  ;;  %2118 = vmatprep.subr.bf16.mxu1 %v2662_v15 }
 0x6ed   :  { %v2081_v8 = vpop.f32.mrb[11].mxu0  ;;  %2103 = vmatmul.mubr.msk.bf16.vlgmr.msra.gmra.mrb[16].mxu0 %vm379_vm2, %v817_v4 }
 0x6ee   :  { %2114 = vmatprep.mubr.msk.bf16.mxu0 %vm2663_vm1, %v2662_v15 }
 0x6ef   :  { %2113 = vmatpush3.bf16.xpose.msra.mxu0 %v1069_v9 }
 0x6f0   :  { %2124 = vmatprep.subr.bf16.mxu0 %v2662_v15 }
 0x6f2   :  { %2109 = vmatmul.mubr.msk.bf16.vlgmr.msra.gmra.mrb[32].mxu1 %vm379_vm2, %v1010_v11 }
 0x6f3   :  { %2119 = vmatpush3.bf16.xpose.msra.mxu1 %v1120_v12  ;;  %2120 = vmatprep.mubr.msk.bf16.mxu1 %vm2663_vm1, %v2662_v15 }
 0x6f4   :  { %2130 = vmatprep.subr.bf16.mxu1 %v2662_v15 }
 0x6f6   :  { %2115 = vmatmul.mubr.msk.bf16.vlgmr.msra.gmra.mrb[20].mxu0 %vm379_vm2, %v1061_v17 }
 0x6f7   :  { %2125 = vmatpush3.bf16.xpose.msra.mxu0 %v1171_v18  ;;  %2126 = vmatprep.mubr.msk.bf16.mxu0 %vm2663_vm1, %v2662_v15 }
 0x6f8   :  { %2136 = vmatprep.subr.bf16.mxu0 %v2662_v15 }
 0x6fa   :  { %2121 = vmatmul.mubr.msk.bf16.vlgmr.msra.gmra.mrb[36].mxu1 %vm379_vm2, %v1112_v46 }
 0x6fb   :  { %2132 = vmatprep.mubr.msk.bf16.mxu1 %vm2663_vm1, %v2662_v15 }
 0x6fe   :  { %2127 = vmatmul.mubr.msk.bf16.vlgmr.msra.gmra.mrb[24].mxu0 %vm379_vm2, %v1163_v6 }
 0x6ff   :  { %2138 = vmatprep.mubr.msk.bf16.mxu0 %vm2663_vm1, %v2662_v15 }
 0x7b4   :  { %v858_v19 = vpop.f32.mrb[24].mxu1 }
 0x7b5   :  { %v2086_v20 = vpop.f32.mrb[25].mxu1  ;;  %v1002_v16 = vsel %vm210_vm0, %v858_v19, 0.0 }
 0x7b6   :  { %v861_v21 = vpop.f32.mrb[26].mxu1 }
 0x7b7   :  { %v2087_v22 = vpop.f32.mrb[27].mxu1 }
 0x7b8   :  { %v904_v23 = vpop.f32.mrb[12].mxu0 }
 0x7b9   :  { %v1003_v24 = vsel %vm210_vm0, %v904_v23, 0.0  ;;  %v2092_v25 = vpop.f32.mrb[13].mxu0 }
 0x7ba   :  { %v1004_v26 = vadd.f32 %v1003_v24, %v1002_v16  ;;  %v907_v27 = vpop.f32.mrb[14].mxu0 }
 0x7bb   :  { %v2093_v29 = vpop.f32.mrb[15].mxu0 }
 0x7bc   :  { %v950_v30 = vpop.f32.mrb[28].mxu1 }
 0x7bd   :  { %v1005_v14 = vsel %vm210_vm0, %v950_v30, 0.0  ;;  %v2098_v31 = vpop.f32.mrb[29].mxu1 }
 0x7be   :  { %v1006_v32 = vadd.f32 %v1005_v14, %v1004_v26  ;;  %v953_v33 = vpop.f32.mrb[30].mxu1  ;;  %v3122_v14 = vld [vmem:[#allocation13] ss:$0 sm:$0xff] }
 0x7bf   :  { %v2099_v35 = vpop.f32.mrb[31].mxu1 }
 0x7c0   :  { %v996_v36 = vpop.f32.mrb[16].mxu0 }
 0x7c1   :  { %v1007_v37 = vsel %vm210_vm0, %v996_v36, 0.0  ;;  %v2104_v38 = vpop.f32.mrb[17].mxu0 }
 0x7c2   :  { %v1008_v40 = vadd.f32 %v1007_v37, %v1006_v32  ;;  %v999_v41 = vpop.f32.mrb[18].mxu0 }
 0x7c3   :  { %v2105_v43 = vpop.f32.mrb[19].mxu0 }
 0x7c4   :  { %v1636_v30 = vadd.f32 %v1008_v40, %v2924_v0 }
 0x7c5   :  { %v1054_v44 = vpop.f32.mrb[32].mxu1 }
 0x7c6   :  { %v2110_v45 = vpop.f32.mrb[33].mxu1  ;;  %v1213_v47 = vsel %vm379_vm2, %v1054_v44, -inf  ;;  %v3125_v31 = vadd.f32 %v3122_v14, %v1636_v30 }
 0x7c7   :  { %1214 = vmax.xlane.f32.xlu0 %v1213_v47  ;;  %v1057_v49 = vpop.f32.mrb[34].mxu1 }
 0x7c8   :  { %v2111_v50 = vpop.f32.mrb[35].mxu1  ;;  %v1649_v57 = vsel %vm210_vm0, %v3125_v31, 0.0 }
 0x7c9   :  { %v1105_v51 = vpop.f32.mrb[20].mxu0 }
 0x7ca   :  { %v2116_v52 = vpop.f32.mrb[21].mxu0  ;;  %v1216_v54 = vsel %vm379_vm2, %v1105_v51, -inf }
 0x7cb   :  { %1217 = vmax.xlane.f32.xlu1 %v1216_v54  ;;  %v1108_v55 = vpop.f32.mrb[22].mxu0 }
 0x7cc   :  { %v2117_v56 = vpop.f32.mrb[23].mxu0 }
 0x7cd   :  { %v1156_v59 = vpop.f32.mrb[36].mxu1 }
 0x7ce   :  { %v2122_v60 = vpop.f32.mrb[37].mxu1  ;;  %v1219_v61 = vsel %vm379_vm2, %v1156_v59, -inf }
 0x7cf   :  { %1220 = vmax.xlane.f32.xlu0 %v1219_v61  ;;  %v1159_v3 = vpop.f32.mrb[38].mxu1 }
 0x7d0   :  { %v2123_v4 = vpop.f32.mrb[39].mxu1 }
 0x7d1   :  { %v1207_v5 = vpop.f32.mrb[24].mxu0 }
 0x7d2   :  { %v2128_v7 = vpop.f32.mrb[25].mxu0  ;;  %v1222_v8 = vsel %vm379_vm2, %v1207_v5, -inf }
 0x7d3   :  { %v1210_v9 = vpop.f32.mrb[26].mxu0  ;;  %1223 = vmax.xlane.f32.xlu0 %v1222_v8 }
 0x7d4   :  { %v2129_v10 = vpop.f32.mrb[27].mxu0 }
 0x854   :  { %v1215_v11 = vpop.xlane.xlu0 %1214 }
 0x855   :  { %v1225_v12 = vsub.f32 %v1054_v44, %v1215_v11 }
 0x857   :  { %v1229_v13 = vmul.f32 1.442695, %v1225_v12 }
 0x858   :  { %v1218_v17 = vpop.xlane.xlu1 %1217 }
 0x859   :  { %2292 = vpow2.f32 %v1229_v13  ;;  %v1226_v18 = vsub.f32 %v1105_v51, %v1218_v17 }
 0x85b   :  { %v1231_v46 = vmul.f32 1.442695, %v1226_v18 }
 0x85c   :  { %v1221_v6 = vpop.xlane.xlu0 %1220 }
 0x85d   :  { %2294 = vpow2.f32 %v1231_v46  ;;  %v1227_v19 = vsub.f32 %v1156_v59, %v1221_v6 }
 0x85f   :  { %v1233_v20 = vmul.f32 1.442695, %v1227_v19 }
 0x860   :  { %v1224_v26 = vpop.xlane.xlu0 %1223 }
 0x861   :  { %2296 = vpow2.f32 %v1233_v20  ;;  %v1228_v27 = vsub.f32 %v1207_v5, %v1224_v26 }
 0x863   :  { %v2293_v21 = vpop.eup %2292  ;;  %v1235_v29 = vmul.f32 1.442695, %v1228_v27 }
 0x864   :  { %v1237_v22 = vsel %vm379_vm2, %v2293_v21, 0.0 }
 0x865   :  { %1238 = vadd.xlane.f32.xlu0 %v1237_v22  ;;  %2298 = vpow2.f32 %v1235_v29 }
 0x867   :  { %v2295_v23 = vpop.eup %2294 }
 0x868   :  { %v1240_v16 = vsel %vm379_vm2, %v2295_v23, 0.0 }
 0x869   :  { %1241 = vadd.xlane.f32.xlu1 %v1240_v16 }
 0x86b   :  { %v2297_v24 = vpop.eup %2296 }
 0x86c   :  { %v1243_v25 = vsel %vm379_vm2, %v2297_v24, 0.0 }
 0x86d   :  { %1244 = vadd.xlane.f32.xlu0 %v1243_v25 }
 0x86f   :  { %v2299_v53 = vpop.eup %2298 }
 0x87a   :  { %1309 = vrot.lane.b32.xlu1 %v1062_v1, %s2647_s1 }
 0x87e   :  { %1357 = vrot.lane.b32.xlu1 %v1113_v63, %s2647_s1  ;;  %v1246_v63 = vsel %vm379_vm2, %v2299_v53, 0.0 }
 0x883   :  { %1261 = vrot.lane.b32.xlu0 %v1011_v62, %s2647_s1 }
 0x8a2   :  { %1650 = vadd.xlane.f32.xlu0 %v1649_v57  ;;  %1247 = vadd.xlane.f32.xlu1 %v1246_v63 }
 0x8b3   :  { %1405 = vrot.lane.b32.xlu1 %v1164_v2, %s2647_s1  ;;  %s2668_s1 = smov [#allocation23]  }
 0x8b4   :  { %s1897_s0 = sshll.u32 %s2668_s1, 4  ;;  %s1898_s0 = int_to_ptr.vmem [resolvable:$true] %s1897_s0 }
 0x8b5   :  { %s2607_s15 = scalar_lea.vmem %s1898_s0, 256  ;;  %p2612_p7 = scmp.lt.s32.totalorder %s1898_s0, %s1898_s0 }
 0x8b6   :  { %p2608_p6 = scmp.ne.s32.totalorder %s1898_s0, %s2607_s15  ;;  %p2613_p8 = scmp.lt.s32.totalorder %s2607_s15, %s2607_s15 }
 0x8b8   :  { %p2614_p9 = por %p2613_p8, %p2612_p7 }
 0x8ba   :  { %p2615_p10 = pnand %p2614_p9, %p2608_p6 }
 0x8f2   :  { %v1239_v42 = vpop.xlane.xlu0 %1238 }
 0x8f3   :  { %2300 = vrcp.f32 %v1239_v42 }
 0x8f6   :  { %v1242_v0 = vpop.xlane.xlu1 %1241 }
 0x8f7   :  { %2302 = vrcp.f32 %v1242_v0 }
 0x8fa   :  { %v1310_v62 = vpop.permute.xlu1 %1309  ;;  %v1245_v1 = vpop.xlane.xlu0 %1244 }
 0x8fb   :  { %v1315_v32 = vsel %vm626_vm3, %v1310_v62, 0  ;;  %2304 = vrcp.f32 %v1245_v1 }
 0x8fc   :  { %2137 = vmatpush3.bf16.msra.mxu0 %v1315_v32 }
 0x8fd   :  { %v2301_v33 = vpop.eup %2300  ;;  %2148 = vmatprep.subr.bf16.mxu0 %v2662_v15 }
 0x8fe   :  { %v1253_v35 = vmul.f32 %v2301_v33, %v2293_v21  ;;  %v1262_v36 = vpop.permute.xlu0 %1261  ;;  %v1358_v38 = vpop.permute.xlu1 %1357 }
 0x8ff   :  { %v1267_v37 = vsel %vm626_vm3, %v1262_v36, 0  ;;  %v1363_v41 = vsel %vm626_vm3, %v1358_v38, 0 }
 0x900   :  { %2131 = vmatpush3.bf16.msra.mxu1 %v1267_v37  ;;  %v1257_v58 = vpack.c.bf16 %v1253_v35, %v1253_v35 }
 0x901   :  { %v2303_v2 = vpop.eup %2302  ;;  %2142 = vmatprep.subr.bf16.mxu1 %v2662_v15 }
 0x902   :  { %v1254_v40 = vmul.f32 %v2303_v2, %v2295_v23  ;;  %v2320_v2 = vld [vmem:[#allocation2 + $0x8] sm:$0xff] }
 0x903   :  { %2133 = vmatmul.mubr.msk.bf16.vlgmr.msra.gmra.mrb[40].mxu1 %vm379_vm2, %v1257_v58 }
 0x904   :  { %2143 = vmatpush3.bf16.msra.mxu1 %v1363_v41  ;;  %v1258_v43 = vpack.c.bf16 %v1254_v40, %v1254_v40  ;;  %2144 = vmatprep.mubr.msk.bf16.mxu1 %vm2663_vm1, %v2662_v15 }
 0x905   :  { %v2305_v44 = vpop.eup %2304  ;;  %2154 = vmatprep.subr.bf16.mxu1 %v2662_v15 }
 0x906   :  { %v1255_v45 = vmul.f32 %v2305_v44, %v2297_v24  ;;  %2139 = vmatmul.mubr.msk.bf16.vlgmr.msra.gmra.mrb[28].mxu0 %vm379_vm2, %v1258_v43 }
 0x907   :  { %2150 = vmatprep.mubr.msk.bf16.mxu0 %vm2663_vm1, %v2662_v15 }
 0x908   :  { %v1259_v47 = vpack.c.bf16 %v1255_v45, %v1255_v45 }
 0x90b   :  { %2145 = vmatmul.mubr.msk.bf16.vlgmr.msra.gmra.mrb[44].mxu1 %vm379_vm2, %v1259_v47 }
 0x90c   :  { %2155 = vmatpush3.bf16.msra.mxu1 %v3038_v28  ;;  %2156 = vmatprep.mubr.msk.bf16.mxu1 %vm2663_vm1, %v2662_v15 }
 0x90d   :  { %2166 = vmatprep.subr.bf16.mxu1 %v2662_v15 }
 0x92f   :  { %v1248_v49 = vpop.xlane.xlu1 %1247  ;;  %v1651_v50 = vpop.xlane.xlu0 %1650 }
 0x930   :  { %2306 = vrcp.f32 %v1248_v49  ;;  %v1655_v51 = vmul.f32 0.03125, %v1651_v50 }
 0x932   :  { %v3151_v52 = vsub.f32 %v3125_v31, %v1655_v51  ;;  %v2262_v51 = vld [vmem:[#allocation17] sm:$0xff]  }
 0x933   :  { %v1406_v54 = vpop.permute.xlu1 %1405 }
 0x934   :  { %v1411_v55 = vsel %vm626_vm3, %v1406_v54, 0  ;;  %v1659_v56 = vmul.f32 %v3151_v52, %v3151_v52  ;;  %v2263_v54 = vld [vmem:[#allocation17 + $0x8] sm:$0xff]  }
 0x935   :  { %2149 = vmatpush3.bf16.msra.mxu0 %v1411_v55 }
 0x936   :  { %v1661_v28 = vsel %vm210_vm0, %v1659_v56, 0.0  ;;  %2160 = vmatprep.subr.bf16.mxu0 %v2662_v15 }
 0x937   :  { %1662 = vadd.xlane.f32.xlu0 %v1661_v28 }
 0x93a   :  { %v2307_v59 = vpop.eup %2306 }
 0x93b   :  { %v1256_v60 = vmul.f32 %v2307_v59, %v2299_v53 }
 0x93d   :  { %v1260_v61 = vpack.c.bf16 %v1256_v60, %v1256_v60 }
 0x93f   :  { %2151 = vmatmul.mubr.msk.bf16.vlgmr.msra.gmra.mrb[32].mxu0 %vm379_vm2, %v1260_v61 }
 0x940   :  { %2161 = vmatpush3.bf16.msra.mxu0 %v3051_v34  ;;  %2162 = vmatprep.mubr.msk.bf16.mxu0 %vm2663_vm1, %v2662_v15 }
 0x941   :  { %2172 = vmatprep.subr.bf16.mxu0 %v2662_v15 }
 0x9d6   :  { %v1303_v3 = vpop.f32.mrb[40].mxu1 }
 0x9d7   :  { %v1453_v4 = vpack.c.bf16 %v1303_v3, %v1303_v3  ;;  %v2134_v5 = vpop.f32.mrb[41].mxu1 }
 0x9d8   :  { %v1306_v7 = vpop.f32.mrb[42].mxu1 }
 0x9d9   :  { %v2135_v8 = vpop.f32.mrb[43].mxu1  ;;  %v1351_v9 = vpop.f32.mrb[28].mxu0  ;;  %2157 = vmatmul.mubr.msk.bf16.vlgmr.msra.gmra.mrb[48].mxu1 %vm379_vm2, %v1453_v4  ;;  %v1946_v4 = vld [vmem:[#allocation14] ss:$0 sm:$0xff] }
 0x9da   :  { %v1454_v10 = vpack.c.bf16 %v1351_v9, %v1351_v9  ;;  %v2140_v11 = vpop.f32.mrb[29].mxu0  ;;  %2167 = vmatpush3.bf16.msra.mxu1 %v3056_v39  ;;  %2168 = vmatprep.mubr.msk.bf16.mxu1 %vm2663_vm1, %v2662_v15  ;;  %v1947_v9 = vld [vmem:[#allocation16] ss:$0 sm:$0xff] }
 0x9db   :  { %v1354_v34 = vpop.f32.mrb[30].mxu0  ;;  %2178 = vmatprep.subr.bf16.mxu1 %v2662_v15 }
 0x9dc   :  { %v2141_v12 = vpop.f32.mrb[31].mxu0  ;;  %2163 = vmatmul.mubr.msk.bf16.vlgmr.msra.gmra.mrb[36].mxu0 %vm379_vm2, %v1454_v10 }
 0x9dd   :  { %2173 = vmatpush3.bf16.msra.mxu0 %v3063_v48  ;;  %2174 = vmatprep.mubr.msk.bf16.mxu0 %vm2663_vm1, %v2662_v15 }
 0x9de   :  { %v1399_v13 = vpop.f32.mrb[44].mxu1  ;;  %2186 = vmatprep.subr.bf16.mxu0 %v2662_v15 }
 0x9df   :  { %v1455_v17 = vpack.c.bf16 %v1399_v13, %v1399_v13  ;;  %v2146_v18 = vpop.f32.mrb[45].mxu1  ;;  %v2264_v13 = vld [vmem:[#allocation20] sm:$0xff]  }
 0x9e0   :  { %v1402_v39 = vpop.f32.mrb[46].mxu1  ;;  %v2267_v18 = vld [vmem:[#allocation20 + $0x18] sm:$0xff]  }
 0x9e1   :  { %v2147_v46 = vpop.f32.mrb[47].mxu1  ;;  %2169 = vmatmul.mubr.msk.bf16.vlgmr.msra.gmra.mrb[52].mxu1 %vm379_vm2, %v1455_v17  ;;  %v2265_v17 = vld [vmem:[#allocation20 + $0x8] sm:$0xff]   ;;  %v2268_v39 = vld [vmem:[#allocation20 + $0x20] sm:$0xff]  }
 0x9e2   :  { %2182 = vmatprep.mubr.msk.bf16.mxu1 %vm2663_vm1, %v2662_v15  ;;  %2179 = vmatpush3.bf16.msra.mxu1 %v2262_v51  ;;  %v2269_v46 = vld [vmem:[#allocation20 + $0x28] sm:$0xff]  }
 0x9e3   :  { %2180 = vmatprep.subr.bf16.mxu1 %v2662_v15 }
 0x9e6   :  { %2181 = vmatpush3.bf16.msra.mxu1 %v2263_v54 }
 0xa12   :  { %v1447_v6 = vpop.f32.mrb[32].mxu0 }
 0xa13   :  { %v1456_v19 = vpack.c.bf16 %v1447_v6, %v1447_v6  ;;  %v2152_v20 = vpop.f32.mrb[33].mxu0  ;;  %v2270_v6 = vld [vmem:[#allocation20 + $0x30] sm:$0xff]  }
 0xa14   :  { %v1450_v21 = vpop.f32.mrb[34].mxu0  ;;  %v1948_v20 = vld [vmem:[#allocation19] ss:$0 sm:$0xff] }
 0xa15   :  { %v2153_v48 = vpop.f32.mrb[35].mxu0  ;;  %2175 = vmatmul.mubr.msk.bf16.vlgmr.msra.gmra.mrb[40].mxu0 %vm379_vm2, %v1456_v19  ;;  %v2271_v19 = vld [vmem:[#allocation20 + $0x38] sm:$0xff]  }
 0xa16   :  { %2202 = vmatprep.mubr.msk.bf16.mxu0 %vm2663_vm1, %v2662_v15  ;;  %2187 = vmatpush3.bf16.msra.mxu0 %v2264_v13 }
 0xa17   :  { %2188 = vmatprep.subr.bf16.mxu0 %v2662_v15 }
 0xa1a   :  { %2189 = vmatpush3.bf16.msra.mxu0 %v2265_v17 }
 0xa1b   :  { %2190 = vmatprep.subr.bf16.mxu0 %v2662_v15 }
 0xaac   :  { %v1494_v22 = vpop.f32.mrb[48].mxu1 }
 0xaad   :  { %v2158_v23 = vpop.f32.mrb[49].mxu1  ;;  %v1629_v26 = vsel %vm210_vm0, %v1494_v22, 0.0 }
 0xaae   :  { %v1497_v16 = vpop.f32.mrb[50].mxu1 }
 0xaaf   :  { %v2159_v24 = vpop.f32.mrb[51].mxu1  ;;  %v1537_v25 = vpop.f32.mrb[36].mxu0 }
 0xab0   :  { %v1630_v27 = vsel %vm210_vm0, %v1537_v25, 0.0  ;;  %v2164_v29 = vpop.f32.mrb[37].mxu0 }
 0xab1   :  { %v1631_v30 = vadd.f32 %v1630_v27, %v1629_v26  ;;  %v1540_v53 = vpop.f32.mrb[38].mxu0 }
 0xab2   :  { %v2165_v57 = vpop.f32.mrb[39].mxu0 }
 0xab4   :  { %v1580_v63 = vpop.f32.mrb[52].mxu1 }
 0xab5   :  { %v1632_v42 = vsel %vm210_vm0, %v1580_v63, 0.0  ;;  %v2170_v0 = vpop.f32.mrb[53].mxu1 }
 0xab6   :  { %v1633_v62 = vadd.f32 %v1632_v42, %v1631_v30  ;;  %v1583_v1 = vpop.f32.mrb[54].mxu1 }
 0xab7   :  { %v2171_v32 = vpop.f32.mrb[55].mxu1 }
 0xab8   :  { %v1954_v32 = vld [vmem:[#allocation22] ss:$0 sm:$0xff] }
 0xae8   :  { %v1623_v33 = vpop.f32.mrb[40].mxu0 }
 0xae9   :  { %v1634_v35 = vsel %vm210_vm0, %v1623_v33, 0.0  ;;  %v2176_v36 = vpop.f32.mrb[41].mxu0 }
 0xaea   :  { %v1635_v37 = vadd.f32 %v1634_v35, %v1633_v62  ;;  %v1626_v38 = vpop.f32.mrb[42].mxu0 }
 0xaeb   :  { %v2177_v58 = vpop.f32.mrb[43].mxu0 }
 0xaec   :  { %v1637_v40 = vadd.f32 %v2320_v2, %v1635_v37 }
 0xaee   :  { %v3184_v41 = vadd.f32 %v3122_v14, %v1637_v40  ;;  %v1663_v14 = vpop.xlane.xlu0 %1662 }
 0xaef   :  { %v1667_v55 = vmul.f32 0.03125, %v1663_v14 }
 0xaf0   :  { %v1652_v43 = vsel %vm210_vm0, %v3184_v41, 0.0 }
 0xaf1   :  { %1653 = vadd.xlane.f32.xlu1 %v1652_v43  ;;  %v1669_v56 = vadd.f32 1e-05, %v1667_v55 }
 0xaf3   :  { %2308 = vrsqrt.f32 %v1669_v56 }
 0xafd   :  { %v2309_v61 = vpop.eup %2308 }
 0xafe   :  { %v1673_v3 = vmul.f32 %v2309_v61, %v3151_v52  ;;  %v2266_v52 = vld [vmem:[#allocation20 + $0x10] sm:$0xff]  }
 0xaff   :  { %2191 = vmatpush3.bf16.msra.mxu0 %v2266_v52 }
 0xb00   :  { %v1681_v7 = vmul.f32 %v1946_v4, %v1673_v3  ;;  %2192 = vmatprep.subr.bf16.mxu0 %v2662_v15 }
 0xb02   :  { %v1689_v11 = vadd.f32 %v1947_v9, %v1681_v7 }
 0xb03   :  { %2193 = vmatpush3.bf16.msra.mxu0 %v2267_v18 }
 0xb04   :  { %2194 = vmatprep.subr.bf16.mxu0 %v2662_v15 }
 0xb07   :  { %2195 = vmatpush3.bf16.msra.mxu0 %v2268_v39 }
 0xb08   :  { %2196 = vmatprep.subr.bf16.mxu0 %v2662_v15 }
 0xb0b   :  { %2197 = vmatpush3.bf16.msra.mxu0 %v2269_v46 }
 0xb0c   :  { %2198 = vmatprep.subr.bf16.mxu0 %v2662_v15 }
 0xb0f   :  { %2199 = vmatpush3.bf16.msra.mxu0 %v2270_v6 }
 0xb10   :  { %2200 = vmatprep.subr.bf16.mxu0 %v2662_v15 }
 0xb13   :  { %2201 = vmatpush3.bf16.msra.mxu0 %v2271_v19 }
 0xb7e   :  { %v1654_v44 = vpop.xlane.xlu1 %1653 }
 0xb7f   :  { %v1656_v45 = vmul.f32 0.03125, %v1654_v44 }
 0xb81   :  { %v1658_v47 = vsub.f32 %v3184_v41, %v1656_v45 }
 0xb83   :  { %v1660_v49 = vmul.f32 %v1658_v47, %v1658_v47 }
 0xb85   :  { %v1664_v50 = vsel %vm210_vm0, %v1660_v49, 0.0 }
 0xb86   :  { %1665 = vadd.xlane.f32.xlu0 %v1664_v50 }
 0xc13   :  { %v1666_v28 = vpop.xlane.xlu0 %1665 }
 0xc14   :  { %v1668_v59 = vmul.f32 0.03125, %v1666_v28 }
 0xc16   :  { %v1670_v60 = vadd.f32 1e-05, %v1668_v59 }
 0xc18   :  { %2310 = vrsqrt.f32 %v1670_v60 }
 0xc22   :  { %v2311_v5 = vpop.eup %2310 }
 0xc23   :  { %v1674_v8 = vmul.f32 %v2311_v5, %v1658_v47 }
 0xc25   :  { %v1682_v10 = vmul.f32 %v1946_v4, %v1674_v8 }
 0xc27   :  { %v1690_v34 = vadd.f32 %v1947_v9, %v1682_v10 }
 0xc29   :  { %v1691_v12 = vpack.c.bf16 %v1690_v34, %v1689_v11 }
 0xc2b   :  { %2183 = vmatmul.mubr.msk.bf16.vlgmr.msra.gmra.mrb[56].mxu1 %vm210_vm0, %v1691_v12 }
 0xcfe   :  { %v1752_v21 = vpop.f32.mrb[56].mxu1 }
 0xcff   :  { %v1753_v48 = vadd.f32 %v1948_v20, %v1752_v21  ;;  %v2184_v22 = vpop.f32.mrb[57].mxu1 }
 0xd00   :  { %v1755_v23 = vpop.f32.mrb[58].mxu1 }
 0xd01   :  { %v1952_v16 = vmul.f32 -1.702, %v1753_v48  ;;  %v1756_v24 = vadd.f32 %v1948_v20, %v1755_v23  ;;  %v2185_v25 = vpop.f32.mrb[59].mxu1 }
 0xd03   :  { %v1763_v26 = vmul.f32 1.442695, %v1952_v16  ;;  %v1953_v27 = vmul.f32 -1.702, %v1756_v24 }
 0xd05   :  { %2312 = vpow2.f32 %v1763_v26  ;;  %v1765_v29 = vmul.f32 1.442695, %v1953_v27 }
 0xd07   :  { %2314 = vpow2.f32 %v1765_v29 }
 0xd0f   :  { %v2313_v30 = vpop.eup %2312 }
 0xd10   :  { %v1767_v53 = vadd.f32 1.0, %v2313_v30 }
 0xd11   :  { %v2315_v57 = vpop.eup %2314 }
 0xd12   :  { %2316 = vrcp.f32 %v1767_v53  ;;  %v1768_v15 = vadd.f32 1.0, %v2315_v57 }
 0xd14   :  { %2318 = vrcp.f32 %v1768_v15 }
 0xd1c   :  { %v2317_v63 = vpop.eup %2316 }
 0xd1d   :  { %v1773_v0 = vmul.f32 %v2317_v63, %v1753_v48 }
 0xd1e   :  { %v2319_v42 = vpop.eup %2318 }
 0xd1f   :  { %v1774_v62 = vmul.f32 %v2319_v42, %v1756_v24 }
 0xd21   :  { %v1775_v1 = vpack.c.bf16 %v1774_v62, %v1773_v0 }
 0xd23   :  { %2203 = vmatmul.mubr.bf16.vlgmr.msra.gmra.mrb[44].mxu0 %v1775_v1 }
 0xdf6   :  { %v1881_v33 = vpop.f32.mrb[44].mxu0 }
 0xdf7   :  { %v1882_v35 = vadd.f32 %v1954_v32, %v1881_v33  ;;  %v2204_v36 = vpop.f32.mrb[45].mxu0 }
 0xdf8   :  { %v1884_v37 = vpop.f32.mrb[46].mxu0 }
 0xdf9   :  { %v1888_v38 = vadd.f32 %v1882_v35, %v3125_v31  ;;  %v1885_v58 = vadd.f32 %v1954_v32, %v1884_v37  ;;  %v2205_v2 = vpop.f32.mrb[47].mxu0 }
 0xdfb   :  { %1890 = vst.msk [vmem:[#allocation23] sm:$0xff] %vm210_vm0, %v1888_v38  ;;  %v1889_v40 = vadd.f32 %v1885_v58, %v3184_v41 }
 0xdfd   :  { %1891 = vst.msk [vmem:[#allocation23 + $0x8] sm:$0xff] %vm210_vm0, %v1889_v40 }
 0xdfe   :  { %2618 = shalt.err (!%p2615_p10)
}
 0xdff   :  { %s2619_s7 = scalar_lea.hbm %s3232_s13, 256 }
 0xe00   :  { %p2620_p11 = scmp.ne.s32.totalorder %s3232_s13, %s2619_s7  ;;  %p2623_p12 = scmp.lt.u32.totalorder %s2619_s7, %s3232_s13 }
 0xe02   :  { %p2625_p13 = pnand %p2623_p12, %p2620_p11 }
 0xe04   :  { %2628 = shalt.err (!%p2625_p13)
}
 0xe05   :  { %1903 = dma.vmem_to_hbm [thread:$0]  %s1898_s0, 256, %s3232_s13, [#allocation4], %s2654_s11, %s2654_s11, %s2655_s26  }
 0xe06   :  { %2643 = dma.done.wait [#allocation4], 256  }
 0xe07   :  { %2644 = vsyncadd [#allocation4], 4294967040 }
 0xe08   :  { %1907 = vsyncpa [#allocation3], 1 }
 0xe09   :  { %1908 = vsyncpa [#allocation6], 1 }
 0xe0a   :  { %1909 = vsyncpa [#allocation9], 1 }
 0xe0b   :  { %1910 = vsyncpa [#allocation12], 1 }
 0xe0c   :  { %1911 = vsyncpa [#allocation15], 1 }
 0xe0d   :  { %1912 = vsyncpa [#allocation18], 1 }
 0xe0e   :  { %1913 = vsyncpa [#allocation21], 1 }
 0xe0f   :  { %1914 = vsyncpa [#allocation4], 1 }

</bundles_post_ra>
